<compile_context>
chip_gen: v5e
topology: v5e:2x2
jax: 0.10.0
libtpu: 0.0.40
codegen_flags: <defaults>
</compile_context>

<pallas_src>
import functools

import jax
import jax.numpy as jnp
from jax.experimental import pallas as pl
from jax.experimental.pallas import tpu as pltpu

BN_EPS = 1e-5
LRELU_SLOPE = 0.2
KSIZE = 4
STRIDE = 2
PAD = 1


# ----------------------------- Pallas kernels ------------------------------

def _conv_bn_lrelu_kernel(w_ref, at_ref, gamma_ref, beta_ref, o_ref,
                          sum_ref, ssq_ref, *, inv_m):
    p = pl.program_id(0)   # 0 = stats pass, 1 = normalize pass
    j = pl.program_id(1)   # M tile index

    # Conv3d as MXU matmul on im2col^T patches:
    # (C_out, K)bf16 @ (K, tm)bf16 -> (C_out, tm)f32.  Recomputed in pass 1
    # (bit-identical) so the raw conv output never round-trips through HBM.
    y = jnp.dot(w_ref[...], at_ref[...], preferred_element_type=jnp.float32)

    @pl.when(jnp.logical_and(p == 0, j == 0))
    def _():
        sum_ref[...] = jnp.zeros_like(sum_ref)
        ssq_ref[...] = jnp.zeros_like(ssq_ref)

    @pl.when(p == 0)
    def _():
        # Per-channel batch statistics over (N, D, H, W) == lane axis of (C, M).
        sum_ref[...] += jnp.sum(y, axis=-1, keepdims=True)
        ssq_ref[...] += jnp.sum(y * y, axis=-1, keepdims=True)
        o_ref[...] = y  # placeholder write; fully overwritten in pass 1

    @pl.when(p == 1)
    def _():
        mean = sum_ref[...] * inv_m
        # Single-pass variance; clamp at 0 against catastrophic cancellation.
        var = jnp.maximum(ssq_ref[...] * inv_m - mean * mean, 0.0)
        z = (y - mean) * jax.lax.rsqrt(var + BN_EPS) * gamma_ref[...] + beta_ref[...]
        o_ref[...] = jnp.where(z >= 0.0, z, LRELU_SLOPE * z)


def _linear_sigmoid_kernel(x_ref, w_ref, b_ref, o_ref):
    y = jnp.dot(x_ref[...], w_ref[...], preferred_element_type=jnp.float32) + b_ref[...]
    o_ref[...] = 1.0 / (1.0 + jnp.exp(-y))


# ----------------------------- kernel wrappers ------------------------------

def _choose_tile_m(M, K, C, budget_bytes=20 << 20):
    """Largest M-tile (multiple of 128, dividing M) fitting the VMEM budget."""
    smallest_div = None
    for tm in (512, 256, 128):
        if M % tm == 0:
            need = 2 * K * tm * 2 + 2 * C * tm * 4 + 2 * C * K * 2 + (1 << 20)
            if need <= budget_bytes:
                return tm
            smallest_div = tm
    return smallest_div if smallest_div is not None else M


def conv_bn_lrelu(at, w_mat, gamma, beta):
    """at: (K, M) bf16; w_mat: (C, K) bf16; gamma/beta: (C, 1) f32 -> (C, M) f32."""
    K, M = at.shape
    C = w_mat.shape[0]
    tm = _choose_tile_m(M, K, C)
    n_m = M // tm

    # Explicit VMEM budget (double-buffered blocks + headroom), capped for v7x.
    need = 2 * K * tm * 2 + 2 * C * tm * 4 + 2 * C * K * 2 + 4 * C * 4 + (2 << 20)
    vmem_limit = int(min(max(2 * need, 16 << 20), 64 << 20))

    kernel = functools.partial(_conv_bn_lrelu_kernel, inv_m=1.0 / M)
    return pl.pallas_call(
        kernel,
        out_shape=jax.ShapeDtypeStruct((C, M), jnp.float32),
        grid_spec=pltpu.PrefetchScalarGridSpec(
            num_scalar_prefetch=0,
            grid=(2, n_m),                                   # (pass, M tile)
            in_specs=[
                pl.BlockSpec((C, K), lambda p, j: (0, 0)),   # weights stay resident
                pl.BlockSpec((K, tm), lambda p, j: (0, j)),  # A^T tiles (pipelined)
                pl.BlockSpec((C, 1), lambda p, j: (0, 0)),   # gamma
                pl.BlockSpec((C, 1), lambda p, j: (0, 0)),   # beta
            ],
            out_specs=pl.BlockSpec((C, tm), lambda p, j: (0, j)),  # lane-dense
            scratch_shapes=[pltpu.VMEM((C, 1), jnp.float32),   # per-channel sum
                            pltpu.VMEM((C, 1), jnp.float32)],  # per-channel sumsq
        ),
        compiler_params=pltpu.CompilerParams(
            # Both axes are sequential: the M axis accumulates BN statistics in
            # VMEM scratch and the pass axis consumes them.
            dimension_semantics=("arbitrary", "arbitrary"),
            vmem_limit_bytes=vmem_limit,
        ),
    )(w_mat, at, gamma, beta)


def linear_sigmoid(x, w, b):
    B, F = x.shape
    return pl.pallas_call(
        _linear_sigmoid_kernel,
        out_shape=jax.ShapeDtypeStruct((B, 1), jnp.float32),
        grid=(1,),
        in_specs=[pl.BlockSpec((B, F), lambda i: (0, 0)),
                  pl.BlockSpec((F, 1), lambda i: (0, 0)),
                  pl.BlockSpec((1, 1), lambda i: (0, 0))],
        out_specs=pl.BlockSpec((B, 1), lambda i: (0, 0)),
    )(x, w, b)


# ------------------------------- JAX glue ----------------------------------

def im2col_T(x, k=KSIZE, s=STRIDE, p=PAD):
    """x: (C, N, D, H, W) -> A^T: (k^3*C, N*Do*Ho*Wo). No transposes needed."""
    C, N, D, H, W = x.shape
    xp = jnp.pad(x, ((0, 0), (0, 0), (p, p), (p, p), (p, p)))
    Do = (D + 2 * p - k) // s + 1
    Ho = (H + 2 * p - k) // s + 1
    Wo = (W + 2 * p - k) // s + 1
    cols = []
    for kd in range(k):
        for kh in range(k):
            for kw in range(k):
                cols.append(
                    xp[:, :, kd:kd + s * Do:s, kh:kh + s * Ho:s, kw:kw + s * Wo:s])
    at = jnp.stack(cols, axis=0)                 # (k^3, C, N, Do, Ho, Wo)
    return at.reshape(k * k * k * C, N * Do * Ho * Wo), (N, Do, Ho, Wo)


def conv_layer(act, p):
    """act: (C_in, N, D, H, W) f32 -> (C_out, N, Do, Ho, Wo) f32."""
    at, (N, Do, Ho, Wo) = im2col_T(act.astype(jnp.bfloat16))
    y = conv_bn_lrelu(at, p["w_mat"], p["gamma"], p["beta"])   # (C_out, M)
    C_out = p["w_mat"].shape[0]
    return y.reshape(C_out, N, Do, Ho, Wo)


def discriminator_forward(params, x):
    # x: (N, C_in, D, H, W) PyTorch layout. One transpose to C-leading; after
    # that no activation transposes are needed between layers.
    act = jnp.transpose(x, (1, 0, 2, 3, 4))
    for name in ("conv1", "conv2", "conv3", "conv4"):
        act = conv_layer(act, params[name])
    N = act.shape[1]
    # PyTorch .view flattens features in (C, D, H, W) order per batch element.
    feat = jnp.transpose(act, (1, 0, 2, 3, 4)).reshape(N, -1)  # tiny
    return linear_sigmoid(feat, params["out"]["w"], params["out"]["b"])


# ------------------------------ params / test -------------------------------

def init_params(key, in_channels=1, dim=16, out_conv_channels=64):
    c1 = out_conv_channels // 8
    c2 = out_conv_channels // 4
    c3 = out_conv_channels // 2
    out_dim = dim // 16
    feat = out_conv_channels * out_dim * out_dim * out_dim
    keys = jax.random.split(key, 5)

    def conv_layer_params(k, cout, cin):
        fan_in = cin * KSIZE ** 3
        w = jax.random.normal(k, (cout, cin, KSIZE, KSIZE, KSIZE), jnp.float32)
        w = w * (1.0 / fan_in) ** 0.5
        # Pre-flatten once at init: columns ordered (kd, kh, kw, c_in) to match
        # the im2col^T row order; cast to bf16 for the MXU.
        w_mat = jnp.transpose(w, (0, 2, 3, 4, 1)).reshape(cout, -1).astype(jnp.bfloat16)
        return {"w_mat": w_mat,
                "gamma": jnp.ones((cout, 1), jnp.float32),
                "beta": jnp.zeros((cout, 1), jnp.float32)}

    return {
        "conv1": conv_layer_params(keys[0], c1, in_channels),
        "conv2": conv_layer_params(keys[1], c2, c1),
        "conv3": conv_layer_params(keys[2], c3, c2),
        "conv4": conv_layer_params(keys[3], out_conv_channels, c3),
        "out": {"w": jax.random.normal(keys[4], (feat, 1), jnp.float32) * (1.0 / feat) ** 0.5,
                "b": jnp.zeros((1, 1), jnp.float32)},
    }


def _w_mat_to_torch(w_mat, c_in, k=KSIZE):
    c_out = w_mat.shape[0]
    w = w_mat.astype(jnp.float32).reshape(c_out, k, k, k, c_in)
    return jnp.transpose(w, (0, 4, 1, 2, 3))      # (C_out, C_in, kD, kH, kW)


def reference_forward(params, x):
    """Pure-JAX reference (f32) matching the PyTorch module in train() mode."""
    act = x
    c_in = x.shape[1]
    for name in ("conv1", "conv2", "conv3", "conv4"):
        p = params[name]
        w = _w_mat_to_torch(p["w_mat"], c_in)
        c_in = w.shape[0]
        act = jax.lax.conv_general_dilated(
            act, w, window_strides=(STRIDE,) * 3, padding=[(PAD, PAD)] * 3,
            dimension_numbers=("NCDHW", "OIDHW", "NCDHW"))
        mean = jnp.mean(act, axis=(0, 2, 3, 4), keepdims=True)
        var = jnp.mean((act - mean) ** 2, axis=(0, 2, 3, 4), keepdims=True)
        g = p["gamma"].reshape(1, -1, 1, 1, 1)
        b = p["beta"].reshape(1, -1, 1, 1, 1)
        act = (act - mean) * jax.lax.rsqrt(var + BN_EPS) * g + b
        act = jnp.where(act >= 0.0, act, LRELU_SLOPE * act)
    flat = act.reshape(act.shape[0], -1)
    return jax.nn.sigmoid(flat @ params["out"]["w"] + params["out"]["b"])


if __name__ == "__main__":
    # Small shapes consistent with the module: dim=16 -> out_dim=1,
    # out_conv_channels=64 -> conv channels (8, 16, 32, 64), batch=2.
    key = jax.random.PRNGKey(0)
    pkey, xkey = jax.random.split(key)
    params = init_params(pkey, in_channels=1, dim=16, out_conv_channels=64)
    x = jax.random.normal(xkey, (2, 1, 16, 16, 16), jnp.float32)

    fwd = jax.jit(discriminator_forward)
    out = fwd(params, x)
    jax.block_until_ready(out)

    assert out.shape == (2, 1)
    assert bool(jnp.all(jnp.isfinite(out)))
    assert bool(jnp.all((out >= 0.0) & (out <= 1.0)))

    # Loose tolerance: kernel path uses bf16 MXU inputs with f32 accumulation.
    ref = reference_forward(params, x)
    assert float(jnp.max(jnp.abs(out - ref))) < 5e-2

    print("KERNEL_OK")
</pallas_src>

<mosaic_0001>
module attributes {stable_mosaic.version = 11 : i64} {
  func.func @_conv_bn_lrelu_kernel(%arg0: i32, %arg1: i32, %arg2: memref<8x64xbf16, #tpu.memory_space<vmem>>, %arg3: memref<64x512xbf16, #tpu.memory_space<vmem>>, %arg4: memref<8x1xf32, #tpu.memory_space<vmem>>, %arg5: memref<8x1xf32, #tpu.memory_space<vmem>>, %arg6: memref<8x512xf32, #tpu.memory_space<vmem>>, %arg7: memref<8x1xf32, #tpu.memory_space<vmem>>, %arg8: memref<8x1xf32, #tpu.memory_space<vmem>>) attributes {dimension_semantics = [#tpu.dimension_semantics<arbitrary>, #tpu.dimension_semantics<arbitrary>], iteration_bounds = array<i64: 2, 2>, scalar_prefetch = 0 : i64, scratch_operands = 2 : i64, tpu.core_type = #tpu.core_type<tc>, window_params = [{pipeline_mode = #tpu.pipeline_mode<synchronous>, transform_indices = @transform_0, window_bounds = array<i64: 8, 64>}, {transform_indices = @transform_1, window_bounds = array<i64: 64, 512>}, {pipeline_mode = #tpu.pipeline_mode<synchronous>, transform_indices = @transform_2, window_bounds = array<i64: 8, 1>}, {pipeline_mode = #tpu.pipeline_mode<synchronous>, transform_indices = @transform_3, window_bounds = array<i64: 8, 1>}, {transform_indices = @transform_4, window_bounds = array<i64: 8, 512>}]} {
    %c0 = arith.constant 0 : index
    %c0_0 = arith.constant 0 : index
    %0 = vector.load %arg2[%c0, %c0_0] : memref<8x64xbf16, #tpu.memory_space<vmem>>, vector<8x64xbf16>
    %c0_1 = arith.constant 0 : index
    %c0_2 = arith.constant 0 : index
    %1 = vector.load %arg3[%c0_1, %c0_2] : memref<64x512xbf16, #tpu.memory_space<vmem>>, vector<64x512xbf16>
    %cst = arith.constant dense<0.000000e+00> : vector<8x512xf32>
    %2 = tpu.matmul %0, %1, %cst {dimension_numbers = #tpu.dot_dimension_numbers<[1], [0], [0], [1], [0, 0, 1, 1], [], []>} : vector<8x64xbf16>, vector<64x512xbf16>, vector<8x512xf32> -> vector<8x512xf32>
    %c0_i32 = arith.constant 0 : i32
    %3 = arith.cmpi eq, %arg0, %c0_i32 : i32
    %c0_i32_3 = arith.constant 0 : i32
    %4 = arith.cmpi eq, %arg1, %c0_i32_3 : i32
    %5 = arith.andi %3, %4 : i1
    %6 = arith.extui %5 : i1 to i32
    %c0_i32_4 = arith.constant 0 : i32
    %7 = arith.cmpi ne, %6, %c0_i32_4 : i32
    scf.if %7 {
      %cst_8 = arith.constant 0.000000e+00 : f32
      %14 = vector.broadcast %cst_8 : f32 to vector<8x1xf32>
      %c0_9 = arith.constant 0 : index
      %c0_10 = arith.constant 0 : index
      %15 = vector.load %arg7[%c0_9, %c0_10] : memref<8x1xf32, #tpu.memory_space<vmem>>, vector<8x1xf32>
      tpu.vector_store %arg7[%c0_9, %c0_10], %14 {strides = array<i32>} : memref<8x1xf32, #tpu.memory_space<vmem>>, vector<8x1xf32>,
      %cst_11 = arith.constant 0.000000e+00 : f32
      %16 = vector.broadcast %cst_11 : f32 to vector<8x1xf32>
      %c0_12 = arith.constant 0 : index
      %c0_13 = arith.constant 0 : index
      %17 = vector.load %arg8[%c0_12, %c0_13] : memref<8x1xf32, #tpu.memory_space<vmem>>, vector<8x1xf32>
      tpu.vector_store %arg8[%c0_12, %c0_13], %16 {strides = array<i32>} : memref<8x1xf32, #tpu.memory_space<vmem>>, vector<8x1xf32>,
    } else {
    }
    %c0_i32_5 = arith.constant 0 : i32
    %8 = arith.cmpi eq, %arg0, %c0_i32_5 : i32
    %9 = arith.extui %8 : i1 to i32
    %c0_i32_6 = arith.constant 0 : i32
    %10 = arith.cmpi ne, %9, %c0_i32_6 : i32
    scf.if %10 {
      %c0_8 = arith.constant 0 : index
      %c0_9 = arith.constant 0 : index
      %14 = vector.load %arg7[%c0_8, %c0_9] : memref<8x1xf32, #tpu.memory_space<vmem>>, vector<8x1xf32>
      %cst_10 = arith.constant dense<0.000000e+00> : vector<8xf32>
      %15 = vector.multi_reduction <add>, %2, %cst_10 [1] : vector<8x512xf32> to vector<8xf32>
      %16 = vector.shape_cast %15 : vector<8xf32> to vector<8x1xf32>
      %17 = arith.addf %14, %16 : vector<8x1xf32>
      %c0_11 = arith.constant 0 : index
      %c0_12 = arith.constant 0 : index
      %18 = vector.load %arg7[%c0_11, %c0_12] : memref<8x1xf32, #tpu.memory_space<vmem>>, vector<8x1xf32>
      tpu.vector_store %arg7[%c0_11, %c0_12], %17 {strides = array<i32>} : memref<8x1xf32, #tpu.memory_space<vmem>>, vector<8x1xf32>,
      %c0_13 = arith.constant 0 : index
      %c0_14 = arith.constant 0 : index
      %19 = vector.load %arg8[%c0_13, %c0_14] : memref<8x1xf32, #tpu.memory_space<vmem>>, vector<8x1xf32>
      %20 = arith.mulf %2, %2 : vector<8x512xf32>
      %cst_15 = arith.constant dense<0.000000e+00> : vector<8xf32>
      %21 = vector.multi_reduction <add>, %20, %cst_15 [1] : vector<8x512xf32> to vector<8xf32>
      %22 = vector.shape_cast %21 : vector<8xf32> to vector<8x1xf32>
      %23 = arith.addf %19, %22 : vector<8x1xf32>
      %c0_16 = arith.constant 0 : index
      %c0_17 = arith.constant 0 : index
      %24 = vector.load %arg8[%c0_16, %c0_17] : memref<8x1xf32, #tpu.memory_space<vmem>>, vector<8x1xf32>
      tpu.vector_store %arg8[%c0_16, %c0_17], %23 {strides = array<i32>} : memref<8x1xf32, #tpu.memory_space<vmem>>, vector<8x1xf32>,
      %c0_18 = arith.constant 0 : index
      %c0_19 = arith.constant 0 : index
      %25 = vector.load %arg6[%c0_18, %c0_19] : memref<8x512xf32, #tpu.memory_space<vmem>>, vector<8x512xf32>
      tpu.vector_store %arg6[%c0_18, %c0_19], %2 {strides = array<i32>} : memref<8x512xf32, #tpu.memory_space<vmem>>, vector<8x512xf32>,
    } else {
    }
    %c1_i32 = arith.constant 1 : i32
    %11 = arith.cmpi eq, %arg0, %c1_i32 : i32
    %12 = arith.extui %11 : i1 to i32
    %c0_i32_7 = arith.constant 0 : i32
    %13 = arith.cmpi ne, %12, %c0_i32_7 : i32
    scf.if %13 {
      %c0_8 = arith.constant 0 : index
      %c0_9 = arith.constant 0 : index
      %14 = vector.load %arg7[%c0_8, %c0_9] : memref<8x1xf32, #tpu.memory_space<vmem>>, vector<8x1xf32>
      %cst_10 = arith.constant 9.765625E-4 : f32
      %15 = vector.broadcast %cst_10 : f32 to vector<8x1xf32>
      %16 = arith.mulf %14, %15 : vector<8x1xf32>
      %c0_11 = arith.constant 0 : index
      %c0_12 = arith.constant 0 : index
      %17 = vector.load %arg8[%c0_11, %c0_12] : memref<8x1xf32, #tpu.memory_space<vmem>>, vector<8x1xf32>
      %cst_13 = arith.constant 9.765625E-4 : f32
      %18 = vector.broadcast %cst_13 : f32 to vector<8x1xf32>
      %19 = arith.mulf %17, %18 : vector<8x1xf32>
      %20 = arith.mulf %16, %16 : vector<8x1xf32>
      %21 = arith.subf %19, %20 : vector<8x1xf32>
      %cst_14 = arith.constant 0.000000e+00 : f32
      %22 = vector.broadcast %cst_14 : f32 to vector<8x1xf32>
      %23 = arith.maximumf %21, %22 : vector<8x1xf32>
      %24 = vector.broadcast %16 : vector<8x1xf32> to vector<8x512xf32>
      %25 = arith.subf %2, %24 : vector<8x512xf32>
      %cst_15 = arith.constant 9.99999974E-6 : f32
      %26 = vector.broadcast %cst_15 : f32 to vector<8x1xf32>
      %27 = arith.addf %23, %26 : vector<8x1xf32>
      %28 = math.rsqrt %27 : vector<8x1xf32>
      %29 = vector.broadcast %28 : vector<8x1xf32> to vector<8x512xf32>
      %30 = arith.mulf %25, %29 : vector<8x512xf32>
      %c0_16 = arith.constant 0 : index
      %c0_17 = arith.constant 0 : index
      %31 = vector.load %arg4[%c0_16, %c0_17] : memref<8x1xf32, #tpu.memory_space<vmem>>, vector<8x1xf32>
      %32 = vector.broadcast %31 : vector<8x1xf32> to vector<8x512xf32>
      %33 = arith.mulf %30, %32 : vector<8x512xf32>
      %c0_18 = arith.constant 0 : index
      %c0_19 = arith.constant 0 : index
      %34 = vector.load %arg5[%c0_18, %c0_19] : memref<8x1xf32, #tpu.memory_space<vmem>>, vector<8x1xf32>
      %35 = vector.broadcast %34 : vector<8x1xf32> to vector<8x512xf32>
      %36 = arith.addf %33, %35 : vector<8x512xf32>
      %cst_20 = arith.constant 0.000000e+00 : f32
      %37 = vector.broadcast %cst_20 : f32 to vector<8x512xf32>
      %38 = arith.cmpf oge, %36, %37 : vector<8x512xf32>
      %cst_21 = arith.constant 2.000000e-01 : f32
      %39 = vector.broadcast %cst_21 : f32 to vector<8x512xf32>
      %40 = arith.mulf %39, %36 : vector<8x512xf32>
      %41 = arith.select %38, %36, %40 : vector<8x512xi1>, vector<8x512xf32>
      %c0_22 = arith.constant 0 : index
      %c0_23 = arith.constant 0 : index
      %42 = vector.load %arg6[%c0_22, %c0_23] : memref<8x512xf32, #tpu.memory_space<vmem>>, vector<8x512xf32>
      tpu.vector_store %arg6[%c0_22, %c0_23], %41 {strides = array<i32>} : memref<8x512xf32, #tpu.memory_space<vmem>>, vector<8x512xf32>,
    } else {
    }
    return
  }
  func.func @transform_0(%arg0: i32, %arg1: i32) -> (i32, i32) {
    %c0_i32 = arith.constant 0 : i32
    %c0_i32_0 = arith.constant 0 : i32
    %c0_i32_1 = arith.constant 0 : i32
    return %c0_i32, %c0_i32_0 : i32, i32
  }
  func.func @transform_1(%arg0: i32, %arg1: i32) -> (i32, i32) {
    %c0_i32 = arith.constant 0 : i32
    %c0_i32_0 = arith.constant 0 : i32
    return %c0_i32, %arg1 : i32, i32
  }
  func.func @transform_2(%arg0: i32, %arg1: i32) -> (i32, i32) {
    %c0_i32 = arith.constant 0 : i32
    %c0_i32_0 = arith.constant 0 : i32
    %c0_i32_1 = arith.constant 0 : i32
    return %c0_i32, %c0_i32_0 : i32, i32
  }
  func.func @transform_3(%arg0: i32, %arg1: i32) -> (i32, i32) {
    %c0_i32 = arith.constant 0 : i32
    %c0_i32_0 = arith.constant 0 : i32
    %c0_i32_1 = arith.constant 0 : i32
    return %c0_i32, %c0_i32_0 : i32, i32
  }
  func.func @transform_4(%arg0: i32, %arg1: i32) -> (i32, i32) {
    %c0_i32 = arith.constant 0 : i32
    %c0_i32_0 = arith.constant 0 : i32
    return %c0_i32, %arg1 : i32, i32
  }
}

module attributes {stable_mosaic.version = 11 : i64} {
  func.func @_conv_bn_lrelu_kernel(%arg0: i32, %arg1: i32, %arg2: memref<16x512xbf16, #tpu.memory_space<vmem>>, %arg3: memref<512x128xbf16, #tpu.memory_space<vmem>>, %arg4: memref<16x1xf32, #tpu.memory_space<vmem>>, %arg5: memref<16x1xf32, #tpu.memory_space<vmem>>, %arg6: memref<16x128xf32, #tpu.memory_space<vmem>>, %arg7: memref<16x1xf32, #tpu.memory_space<vmem>>, %arg8: memref<16x1xf32, #tpu.memory_space<vmem>>) attributes {dimension_semantics = [#tpu.dimension_semantics<arbitrary>, #tpu.dimension_semantics<arbitrary>], iteration_bounds = array<i64: 2, 1>, scalar_prefetch = 0 : i64, scratch_operands = 2 : i64, tpu.core_type = #tpu.core_type<tc>, window_params = [{pipeline_mode = #tpu.pipeline_mode<synchronous>, transform_indices = @transform_0, window_bounds = array<i64: 16, 512>}, {transform_indices = @transform_1, window_bounds = array<i64: 512, 128>}, {pipeline_mode = #tpu.pipeline_mode<synchronous>, transform_indices = @transform_2, window_bounds = array<i64: 16, 1>}, {pipeline_mode = #tpu.pipeline_mode<synchronous>, transform_indices = @transform_3, window_bounds = array<i64: 16, 1>}, {transform_indices = @transform_4, window_bounds = array<i64: 16, 128>}]} {
    %c0 = arith.constant 0 : index
    %c0_0 = arith.constant 0 : index
    %0 = vector.load %arg2[%c0, %c0_0] : memref<16x512xbf16, #tpu.memory_space<vmem>>, vector<16x512xbf16>
    %c0_1 = arith.constant 0 : index
    %c0_2 = arith.constant 0 : index
    %1 = vector.load %arg3[%c0_1, %c0_2] : memref<512x128xbf16, #tpu.memory_space<vmem>>, vector<512x128xbf16>
    %cst = arith.constant dense<0.000000e+00> : vector<16x128xf32>
    %2 = tpu.matmul %0, %1, %cst {dimension_numbers = #tpu.dot_dimension_numbers<[1], [0], [0], [1], [0, 0, 1, 1], [], []>} : vector<16x512xbf16>, vector<512x128xbf16>, vector<16x128xf32> -> vector<16x128xf32>
    %c0_i32 = arith.constant 0 : i32
    %3 = arith.cmpi eq, %arg0, %c0_i32 : i32
    %c0_i32_3 = arith.constant 0 : i32
    %4 = arith.cmpi eq, %arg1, %c0_i32_3 : i32
    %5 = arith.andi %3, %4 : i1
    %6 = arith.extui %5 : i1 to i32
    %c0_i32_4 = arith.constant 0 : i32
    %7 = arith.cmpi ne, %6, %c0_i32_4 : i32
    scf.if %7 {
      %cst_8 = arith.constant 0.000000e+00 : f32
      %14 = vector.broadcast %cst_8 : f32 to vector<16x1xf32>
      %c0_9 = arith.constant 0 : index
      %c0_10 = arith.constant 0 : index
      %15 = vector.load %arg7[%c0_9, %c0_10] : memref<16x1xf32, #tpu.memory_space<vmem>>, vector<16x1xf32>
      tpu.vector_store %arg7[%c0_9, %c0_10], %14 {strides = array<i32>} : memref<16x1xf32, #tpu.memory_space<vmem>>, vector<16x1xf32>,
      %cst_11 = arith.constant 0.000000e+00 : f32
      %16 = vector.broadcast %cst_11 : f32 to vector<16x1xf32>
      %c0_12 = arith.constant 0 : index
      %c0_13 = arith.constant 0 : index
      %17 = vector.load %arg8[%c0_12, %c0_13] : memref<16x1xf32, #tpu.memory_space<vmem>>, vector<16x1xf32>
      tpu.vector_store %arg8[%c0_12, %c0_13], %16 {strides = array<i32>} : memref<16x1xf32, #tpu.memory_space<vmem>>, vector<16x1xf32>,
    } else {
    }
    %c0_i32_5 = arith.constant 0 : i32
    %8 = arith.cmpi eq, %arg0, %c0_i32_5 : i32
    %9 = arith.extui %8 : i1 to i32
    %c0_i32_6 = arith.constant 0 : i32
    %10 = arith.cmpi ne, %9, %c0_i32_6 : i32
    scf.if %10 {
      %c0_8 = arith.constant 0 : index
      %c0_9 = arith.constant 0 : index
      %14 = vector.load %arg7[%c0_8, %c0_9] : memref<16x1xf32, #tpu.memory_space<vmem>>, vector<16x1xf32>
      %cst_10 = arith.constant dense<0.000000e+00> : vector<16xf32>
      %15 = vector.multi_reduction <add>, %2, %cst_10 [1] : vector<16x128xf32> to vector<16xf32>
      %16 = vector.shape_cast %15 : vector<16xf32> to vector<16x1xf32>
      %17 = arith.addf %14, %16 : vector<16x1xf32>
      %c0_11 = arith.constant 0 : index
      %c0_12 = arith.constant 0 : index
      %18 = vector.load %arg7[%c0_11, %c0_12] : memref<16x1xf32, #tpu.memory_space<vmem>>, vector<16x1xf32>
      tpu.vector_store %arg7[%c0_11, %c0_12], %17 {strides = array<i32>} : memref<16x1xf32, #tpu.memory_space<vmem>>, vector<16x1xf32>,
      %c0_13 = arith.constant 0 : index
      %c0_14 = arith.constant 0 : index
      %19 = vector.load %arg8[%c0_13, %c0_14] : memref<16x1xf32, #tpu.memory_space<vmem>>, vector<16x1xf32>
      %20 = arith.mulf %2, %2 : vector<16x128xf32>
      %cst_15 = arith.constant dense<0.000000e+00> : vector<16xf32>
      %21 = vector.multi_reduction <add>, %20, %cst_15 [1] : vector<16x128xf32> to vector<16xf32>
      %22 = vector.shape_cast %21 : vector<16xf32> to vector<16x1xf32>
      %23 = arith.addf %19, %22 : vector<16x1xf32>
      %c0_16 = arith.constant 0 : index
      %c0_17 = arith.constant 0 : index
      %24 = vector.load %arg8[%c0_16, %c0_17] : memref<16x1xf32, #tpu.memory_space<vmem>>, vector<16x1xf32>
      tpu.vector_store %arg8[%c0_16, %c0_17], %23 {strides = array<i32>} : memref<16x1xf32, #tpu.memory_space<vmem>>, vector<16x1xf32>,
      %c0_18 = arith.constant 0 : index
      %c0_19 = arith.constant 0 : index
      %25 = vector.load %arg6[%c0_18, %c0_19] : memref<16x128xf32, #tpu.memory_space<vmem>>, vector<16x128xf32>
      tpu.vector_store %arg6[%c0_18, %c0_19], %2 {strides = array<i32>} : memref<16x128xf32, #tpu.memory_space<vmem>>, vector<16x128xf32>,
    } else {
    }
    %c1_i32 = arith.constant 1 : i32
    %11 = arith.cmpi eq, %arg0, %c1_i32 : i32
    %12 = arith.extui %11 : i1 to i32
    %c0_i32_7 = arith.constant 0 : i32
    %13 = arith.cmpi ne, %12, %c0_i32_7 : i32
    scf.if %13 {
      %c0_8 = arith.constant 0 : index
      %c0_9 = arith.constant 0 : index
      %14 = vector.load %arg7[%c0_8, %c0_9] : memref<16x1xf32, #tpu.memory_space<vmem>>, vector<16x1xf32>
      %cst_10 = arith.constant 7.812500e-03 : f32
      %15 = vector.broadcast %cst_10 : f32 to vector<16x1xf32>
      %16 = arith.mulf %14, %15 : vector<16x1xf32>
      %c0_11 = arith.constant 0 : index
      %c0_12 = arith.constant 0 : index
      %17 = vector.load %arg8[%c0_11, %c0_12] : memref<16x1xf32, #tpu.memory_space<vmem>>, vector<16x1xf32>
      %cst_13 = arith.constant 7.812500e-03 : f32
      %18 = vector.broadcast %cst_13 : f32 to vector<16x1xf32>
      %19 = arith.mulf %17, %18 : vector<16x1xf32>
      %20 = arith.mulf %16, %16 : vector<16x1xf32>
      %21 = arith.subf %19, %20 : vector<16x1xf32>
      %cst_14 = arith.constant 0.000000e+00 : f32
      %22 = vector.broadcast %cst_14 : f32 to vector<16x1xf32>
      %23 = arith.maximumf %21, %22 : vector<16x1xf32>
      %24 = vector.broadcast %16 : vector<16x1xf32> to vector<16x128xf32>
      %25 = arith.subf %2, %24 : vector<16x128xf32>
      %cst_15 = arith.constant 9.99999974E-6 : f32
      %26 = vector.broadcast %cst_15 : f32 to vector<16x1xf32>
      %27 = arith.addf %23, %26 : vector<16x1xf32>
      %28 = math.rsqrt %27 : vector<16x1xf32>
      %29 = vector.broadcast %28 : vector<16x1xf32> to vector<16x128xf32>
      %30 = arith.mulf %25, %29 : vector<16x128xf32>
      %c0_16 = arith.constant 0 : index
      %c0_17 = arith.constant 0 : index
      %31 = vector.load %arg4[%c0_16, %c0_17] : memref<16x1xf32, #tpu.memory_space<vmem>>, vector<16x1xf32>
      %32 = vector.broadcast %31 : vector<16x1xf32> to vector<16x128xf32>
      %33 = arith.mulf %30, %32 : vector<16x128xf32>
      %c0_18 = arith.constant 0 : index
      %c0_19 = arith.constant 0 : index
      %34 = vector.load %arg5[%c0_18, %c0_19] : memref<16x1xf32, #tpu.memory_space<vmem>>, vector<16x1xf32>
      %35 = vector.broadcast %34 : vector<16x1xf32> to vector<16x128xf32>
      %36 = arith.addf %33, %35 : vector<16x128xf32>
      %cst_20 = arith.constant 0.000000e+00 : f32
      %37 = vector.broadcast %cst_20 : f32 to vector<16x128xf32>
      %38 = arith.cmpf oge, %36, %37 : vector<16x128xf32>
      %cst_21 = arith.constant 2.000000e-01 : f32
      %39 = vector.broadcast %cst_21 : f32 to vector<16x128xf32>
      %40 = arith.mulf %39, %36 : vector<16x128xf32>
      %41 = arith.select %38, %36, %40 : vector<16x128xi1>, vector<16x128xf32>
      %c0_22 = arith.constant 0 : index
      %c0_23 = arith.constant 0 : index
      %42 = vector.load %arg6[%c0_22, %c0_23] : memref<16x128xf32, #tpu.memory_space<vmem>>, vector<16x128xf32>
      tpu.vector_store %arg6[%c0_22, %c0_23], %41 {strides = array<i32>} : memref<16x128xf32, #tpu.memory_space<vmem>>, vector<16x128xf32>,
    } else {
    }
    return
  }
  func.func @transform_0(%arg0: i32, %arg1: i32) -> (i32, i32) {
    %c0_i32 = arith.constant 0 : i32
    %c0_i32_0 = arith.constant 0 : i32
    %c0_i32_1 = arith.constant 0 : i32
    return %c0_i32, %c0_i32_0 : i32, i32
  }
  func.func @transform_1(%arg0: i32, %arg1: i32) -> (i32, i32) {
    %c0_i32 = arith.constant 0 : i32
    %c0_i32_0 = arith.constant 0 : i32
    return %c0_i32, %arg1 : i32, i32
  }
  func.func @transform_2(%arg0: i32, %arg1: i32) -> (i32, i32) {
    %c0_i32 = arith.constant 0 : i32
    %c0_i32_0 = arith.constant 0 : i32
    %c0_i32_1 = arith.constant 0 : i32
    return %c0_i32, %c0_i32_0 : i32, i32
  }
  func.func @transform_3(%arg0: i32, %arg1: i32) -> (i32, i32) {
    %c0_i32 = arith.constant 0 : i32
    %c0_i32_0 = arith.constant 0 : i32
    %c0_i32_1 = arith.constant 0 : i32
    return %c0_i32, %c0_i32_0 : i32, i32
  }
  func.func @transform_4(%arg0: i32, %arg1: i32) -> (i32, i32) {
    %c0_i32 = arith.constant 0 : i32
    %c0_i32_0 = arith.constant 0 : i32
    return %c0_i32, %arg1 : i32, i32
  }
}

module attributes {stable_mosaic.version = 11 : i64} {
  func.func @_conv_bn_lrelu_kernel(%arg0: i32, %arg1: i32, %arg2: memref<32x1024xbf16, #tpu.memory_space<vmem>>, %arg3: memref<1024x16xbf16, #tpu.memory_space<vmem>>, %arg4: memref<32x1xf32, #tpu.memory_space<vmem>>, %arg5: memref<32x1xf32, #tpu.memory_space<vmem>>, %arg6: memref<32x16xf32, #tpu.memory_space<vmem>>, %arg7: memref<32x1xf32, #tpu.memory_space<vmem>>, %arg8: memref<32x1xf32, #tpu.memory_space<vmem>>) attributes {dimension_semantics = [#tpu.dimension_semantics<arbitrary>, #tpu.dimension_semantics<arbitrary>], iteration_bounds = array<i64: 2, 1>, scalar_prefetch = 0 : i64, scratch_operands = 2 : i64, tpu.core_type = #tpu.core_type<tc>, window_params = [{pipeline_mode = #tpu.pipeline_mode<synchronous>, transform_indices = @transform_0, window_bounds = array<i64: 32, 1024>}, {transform_indices = @transform_1, window_bounds = array<i64: 1024, 16>}, {pipeline_mode = #tpu.pipeline_mode<synchronous>, transform_indices = @transform_2, window_bounds = array<i64: 32, 1>}, {pipeline_mode = #tpu.pipeline_mode<synchronous>, transform_indices = @transform_3, window_bounds = array<i64: 32, 1>}, {transform_indices = @transform_4, window_bounds = array<i64: 32, 16>}]} {
    %c0 = arith.constant 0 : index
    %c0_0 = arith.constant 0 : index
    %0 = vector.load %arg2[%c0, %c0_0] : memref<32x1024xbf16, #tpu.memory_space<vmem>>, vector<32x1024xbf16>
    %c0_1 = arith.constant 0 : index
    %c0_2 = arith.constant 0 : index
    %1 = vector.load %arg3[%c0_1, %c0_2] : memref<1024x16xbf16, #tpu.memory_space<vmem>>, vector<1024x16xbf16>
    %cst = arith.constant dense<0.000000e+00> : vector<32x16xf32>
    %2 = tpu.matmul %0, %1, %cst {dimension_numbers = #tpu.dot_dimension_numbers<[1], [0], [0], [1], [0, 0, 1, 1], [], []>} : vector<32x1024xbf16>, vector<1024x16xbf16>, vector<32x16xf32> -> vector<32x16xf32>
    %c0_i32 = arith.constant 0 : i32
    %3 = arith.cmpi eq, %arg0, %c0_i32 : i32
    %c0_i32_3 = arith.constant 0 : i32
    %4 = arith.cmpi eq, %arg1, %c0_i32_3 : i32
    %5 = arith.andi %3, %4 : i1
    %6 = arith.extui %5 : i1 to i32
    %c0_i32_4 = arith.constant 0 : i32
    %7 = arith.cmpi ne, %6, %c0_i32_4 : i32
    scf.if %7 {
      %cst_8 = arith.constant 0.000000e+00 : f32
      %14 = vector.broadcast %cst_8 : f32 to vector<32x1xf32>
      %c0_9 = arith.constant 0 : index
      %c0_10 = arith.constant 0 : index
      %15 = vector.load %arg7[%c0_9, %c0_10] : memref<32x1xf32, #tpu.memory_space<vmem>>, vector<32x1xf32>
      tpu.vector_store %arg7[%c0_9, %c0_10], %14 {strides = array<i32>} : memref<32x1xf32, #tpu.memory_space<vmem>>, vector<32x1xf32>,
      %cst_11 = arith.constant 0.000000e+00 : f32
      %16 = vector.broadcast %cst_11 : f32 to vector<32x1xf32>
      %c0_12 = arith.constant 0 : index
      %c0_13 = arith.constant 0 : index
      %17 = vector.load %arg8[%c0_12, %c0_13] : memref<32x1xf32, #tpu.memory_space<vmem>>, vector<32x1xf32>
      tpu.vector_store %arg8[%c0_12, %c0_13], %16 {strides = array<i32>} : memref<32x1xf32, #tpu.memory_space<vmem>>, vector<32x1xf32>,
    } else {
    }
    %c0_i32_5 = arith.constant 0 : i32
    %8 = arith.cmpi eq, %arg0, %c0_i32_5 : i32
    %9 = arith.extui %8 : i1 to i32
    %c0_i32_6 = arith.constant 0 : i32
    %10 = arith.cmpi ne, %9, %c0_i32_6 : i32
    scf.if %10 {
      %c0_8 = arith.constant 0 : index
      %c0_9 = arith.constant 0 : index
      %14 = vector.load %arg7[%c0_8, %c0_9] : memref<32x1xf32, #tpu.memory_space<vmem>>, vector<32x1xf32>
      %cst_10 = arith.constant dense<0.000000e+00> : vector<32xf32>
      %15 = vector.multi_reduction <add>, %2, %cst_10 [1] : vector<32x16xf32> to vector<32xf32>
      %16 = vector.shape_cast %15 : vector<32xf32> to vector<32x1xf32>
      %17 = arith.addf %14, %16 : vector<32x1xf32>
      %c0_11 = arith.constant 0 : index
      %c0_12 = arith.constant 0 : index
      %18 = vector.load %arg7[%c0_11, %c0_12] : memref<32x1xf32, #tpu.memory_space<vmem>>, vector<32x1xf32>
      tpu.vector_store %arg7[%c0_11, %c0_12], %17 {strides = array<i32>} : memref<32x1xf32, #tpu.memory_space<vmem>>, vector<32x1xf32>,
      %c0_13 = arith.constant 0 : index
      %c0_14 = arith.constant 0 : index
      %19 = vector.load %arg8[%c0_13, %c0_14] : memref<32x1xf32, #tpu.memory_space<vmem>>, vector<32x1xf32>
      %20 = arith.mulf %2, %2 : vector<32x16xf32>
      %cst_15 = arith.constant dense<0.000000e+00> : vector<32xf32>
      %21 = vector.multi_reduction <add>, %20, %cst_15 [1] : vector<32x16xf32> to vector<32xf32>
      %22 = vector.shape_cast %21 : vector<32xf32> to vector<32x1xf32>
      %23 = arith.addf %19, %22 : vector<32x1xf32>
      %c0_16 = arith.constant 0 : index
      %c0_17 = arith.constant 0 : index
      %24 = vector.load %arg8[%c0_16, %c0_17] : memref<32x1xf32, #tpu.memory_space<vmem>>, vector<32x1xf32>
      tpu.vector_store %arg8[%c0_16, %c0_17], %23 {strides = array<i32>} : memref<32x1xf32, #tpu.memory_space<vmem>>, vector<32x1xf32>,
      %c0_18 = arith.constant 0 : index
      %c0_19 = arith.constant 0 : index
      %25 = vector.load %arg6[%c0_18, %c0_19] : memref<32x16xf32, #tpu.memory_space<vmem>>, vector<32x16xf32>
      tpu.vector_store %arg6[%c0_18, %c0_19], %2 {strides = array<i32>} : memref<32x16xf32, #tpu.memory_space<vmem>>, vector<32x16xf32>,
    } else {
    }
    %c1_i32 = arith.constant 1 : i32
    %11 = arith.cmpi eq, %arg0, %c1_i32 : i32
    %12 = arith.extui %11 : i1 to i32
    %c0_i32_7 = arith.constant 0 : i32
    %13 = arith.cmpi ne, %12, %c0_i32_7 : i32
    scf.if %13 {
      %c0_8 = arith.constant 0 : index
      %c0_9 = arith.constant 0 : index
      %14 = vector.load %arg7[%c0_8, %c0_9] : memref<32x1xf32, #tpu.memory_space<vmem>>, vector<32x1xf32>
      %cst_10 = arith.constant 6.250000e-02 : f32
      %15 = vector.broadcast %cst_10 : f32 to vector<32x1xf32>
      %16 = arith.mulf %14, %15 : vector<32x1xf32>
      %c0_11 = arith.constant 0 : index
      %c0_12 = arith.constant 0 : index
      %17 = vector.load %arg8[%c0_11, %c0_12] : memref<32x1xf32, #tpu.memory_space<vmem>>, vector<32x1xf32>
      %cst_13 = arith.constant 6.250000e-02 : f32
      %18 = vector.broadcast %cst_13 : f32 to vector<32x1xf32>
      %19 = arith.mulf %17, %18 : vector<32x1xf32>
      %20 = arith.mulf %16, %16 : vector<32x1xf32>
      %21 = arith.subf %19, %20 : vector<32x1xf32>
      %cst_14 = arith.constant 0.000000e+00 : f32
      %22 = vector.broadcast %cst_14 : f32 to vector<32x1xf32>
      %23 = arith.maximumf %21, %22 : vector<32x1xf32>
      %24 = vector.broadcast %16 : vector<32x1xf32> to vector<32x16xf32>
      %25 = arith.subf %2, %24 : vector<32x16xf32>
      %cst_15 = arith.constant 9.99999974E-6 : f32
      %26 = vector.broadcast %cst_15 : f32 to vector<32x1xf32>
      %27 = arith.addf %23, %26 : vector<32x1xf32>
      %28 = math.rsqrt %27 : vector<32x1xf32>
      %29 = vector.broadcast %28 : vector<32x1xf32> to vector<32x16xf32>
      %30 = arith.mulf %25, %29 : vector<32x16xf32>
      %c0_16 = arith.constant 0 : index
      %c0_17 = arith.constant 0 : index
      %31 = vector.load %arg4[%c0_16, %c0_17] : memref<32x1xf32, #tpu.memory_space<vmem>>, vector<32x1xf32>
      %32 = vector.broadcast %31 : vector<32x1xf32> to vector<32x16xf32>
      %33 = arith.mulf %30, %32 : vector<32x16xf32>
      %c0_18 = arith.constant 0 : index
      %c0_19 = arith.constant 0 : index
      %34 = vector.load %arg5[%c0_18, %c0_19] : memref<32x1xf32, #tpu.memory_space<vmem>>, vector<32x1xf32>
      %35 = vector.broadcast %34 : vector<32x1xf32> to vector<32x16xf32>
      %36 = arith.addf %33, %35 : vector<32x16xf32>
      %cst_20 = arith.constant 0.000000e+00 : f32
      %37 = vector.broadcast %cst_20 : f32 to vector<32x16xf32>
      %38 = arith.cmpf oge, %36, %37 : vector<32x16xf32>
      %cst_21 = arith.constant 2.000000e-01 : f32
      %39 = vector.broadcast %cst_21 : f32 to vector<32x16xf32>
      %40 = arith.mulf %39, %36 : vector<32x16xf32>
      %41 = arith.select %38, %36, %40 : vector<32x16xi1>, vector<32x16xf32>
      %c0_22 = arith.constant 0 : index
      %c0_23 = arith.constant 0 : index
      %42 = vector.load %arg6[%c0_22, %c0_23] : memref<32x16xf32, #tpu.memory_space<vmem>>, vector<32x16xf32>
      tpu.vector_store %arg6[%c0_22, %c0_23], %41 {strides = array<i32>} : memref<32x16xf32, #tpu.memory_space<vmem>>, vector<32x16xf32>,
    } else {
    }
    return
  }
  func.func @transform_0(%arg0: i32, %arg1: i32) -> (i32, i32) {
    %c0_i32 = arith.constant 0 : i32
    %c0_i32_0 = arith.constant 0 : i32
    %c0_i32_1 = arith.constant 0 : i32
    return %c0_i32, %c0_i32_0 : i32, i32
  }
  func.func @transform_1(%arg0: i32, %arg1: i32) -> (i32, i32) {
    %c0_i32 = arith.constant 0 : i32
    %c0_i32_0 = arith.constant 0 : i32
    return %c0_i32, %arg1 : i32, i32
  }
  func.func @transform_2(%arg0: i32, %arg1: i32) -> (i32, i32) {
    %c0_i32 = arith.constant 0 : i32
    %c0_i32_0 = arith.constant 0 : i32
    %c0_i32_1 = arith.constant 0 : i32
    return %c0_i32, %c0_i32_0 : i32, i32
  }
  func.func @transform_3(%arg0: i32, %arg1: i32) -> (i32, i32) {
    %c0_i32 = arith.constant 0 : i32
    %c0_i32_0 = arith.constant 0 : i32
    %c0_i32_1 = arith.constant 0 : i32
    return %c0_i32, %c0_i32_0 : i32, i32
  }
  func.func @transform_4(%arg0: i32, %arg1: i32) -> (i32, i32) {
    %c0_i32 = arith.constant 0 : i32
    %c0_i32_0 = arith.constant 0 : i32
    return %c0_i32, %arg1 : i32, i32
  }
}

module attributes {stable_mosaic.version = 11 : i64} {
  func.func @_conv_bn_lrelu_kernel(%arg0: i32, %arg1: i32, %arg2: memref<64x2048xbf16, #tpu.memory_space<vmem>>, %arg3: memref<2048x2xbf16, #tpu.memory_space<vmem>>, %arg4: memref<64x1xf32, #tpu.memory_space<vmem>>, %arg5: memref<64x1xf32, #tpu.memory_space<vmem>>, %arg6: memref<64x2xf32, #tpu.memory_space<vmem>>, %arg7: memref<64x1xf32, #tpu.memory_space<vmem>>, %arg8: memref<64x1xf32, #tpu.memory_space<vmem>>) attributes {dimension_semantics = [#tpu.dimension_semantics<arbitrary>, #tpu.dimension_semantics<arbitrary>], iteration_bounds = array<i64: 2, 1>, scalar_prefetch = 0 : i64, scratch_operands = 2 : i64, tpu.core_type = #tpu.core_type<tc>, window_params = [{pipeline_mode = #tpu.pipeline_mode<synchronous>, transform_indices = @transform_0, window_bounds = array<i64: 64, 2048>}, {transform_indices = @transform_1, window_bounds = array<i64: 2048, 2>}, {pipeline_mode = #tpu.pipeline_mode<synchronous>, transform_indices = @transform_2, window_bounds = array<i64: 64, 1>}, {pipeline_mode = #tpu.pipeline_mode<synchronous>, transform_indices = @transform_3, window_bounds = array<i64: 64, 1>}, {transform_indices = @transform_4, window_bounds = array<i64: 64, 2>}]} {
    %c0 = arith.constant 0 : index
    %c0_0 = arith.constant 0 : index
    %0 = vector.load %arg2[%c0, %c0_0] : memref<64x2048xbf16, #tpu.memory_space<vmem>>, vector<64x2048xbf16>
    %c0_1 = arith.constant 0 : index
    %c0_2 = arith.constant 0 : index
    %1 = vector.load %arg3[%c0_1, %c0_2] : memref<2048x2xbf16, #tpu.memory_space<vmem>>, vector<2048x2xbf16>
    %cst = arith.constant dense<0.000000e+00> : vector<64x2xf32>
    %2 = tpu.matmul %0, %1, %cst {dimension_numbers = #tpu.dot_dimension_numbers<[1], [0], [0], [1], [0, 0, 1, 1], [], []>} : vector<64x2048xbf16>, vector<2048x2xbf16>, vector<64x2xf32> -> vector<64x2xf32>
    %c0_i32 = arith.constant 0 : i32
    %3 = arith.cmpi eq, %arg0, %c0_i32 : i32
    %c0_i32_3 = arith.constant 0 : i32
    %4 = arith.cmpi eq, %arg1, %c0_i32_3 : i32
    %5 = arith.andi %3, %4 : i1
    %6 = arith.extui %5 : i1 to i32
    %c0_i32_4 = arith.constant 0 : i32
    %7 = arith.cmpi ne, %6, %c0_i32_4 : i32
    scf.if %7 {
      %cst_8 = arith.constant 0.000000e+00 : f32
      %14 = vector.broadcast %cst_8 : f32 to vector<64x1xf32>
      %c0_9 = arith.constant 0 : index
      %c0_10 = arith.constant 0 : index
      %15 = vector.load %arg7[%c0_9, %c0_10] : memref<64x1xf32, #tpu.memory_space<vmem>>, vector<64x1xf32>
      tpu.vector_store %arg7[%c0_9, %c0_10], %14 {strides = array<i32>} : memref<64x1xf32, #tpu.memory_space<vmem>>, vector<64x1xf32>,
      %cst_11 = arith.constant 0.000000e+00 : f32
      %16 = vector.broadcast %cst_11 : f32 to vector<64x1xf32>
      %c0_12 = arith.constant 0 : index
      %c0_13 = arith.constant 0 : index
      %17 = vector.load %arg8[%c0_12, %c0_13] : memref<64x1xf32, #tpu.memory_space<vmem>>, vector<64x1xf32>
      tpu.vector_store %arg8[%c0_12, %c0_13], %16 {strides = array<i32>} : memref<64x1xf32, #tpu.memory_space<vmem>>, vector<64x1xf32>,
    } else {
    }
    %c0_i32_5 = arith.constant 0 : i32
    %8 = arith.cmpi eq, %arg0, %c0_i32_5 : i32
    %9 = arith.extui %8 : i1 to i32
    %c0_i32_6 = arith.constant 0 : i32
    %10 = arith.cmpi ne, %9, %c0_i32_6 : i32
    scf.if %10 {
      %c0_8 = arith.constant 0 : index
      %c0_9 = arith.constant 0 : index
      %14 = vector.load %arg7[%c0_8, %c0_9] : memref<64x1xf32, #tpu.memory_space<vmem>>, vector<64x1xf32>
      %cst_10 = arith.constant dense<0.000000e+00> : vector<64xf32>
      %15 = vector.multi_reduction <add>, %2, %cst_10 [1] : vector<64x2xf32> to vector<64xf32>
      %16 = vector.shape_cast %15 : vector<64xf32> to vector<64x1xf32>
      %17 = arith.addf %14, %16 : vector<64x1xf32>
      %c0_11 = arith.constant 0 : index
      %c0_12 = arith.constant 0 : index
      %18 = vector.load %arg7[%c0_11, %c0_12] : memref<64x1xf32, #tpu.memory_space<vmem>>, vector<64x1xf32>
      tpu.vector_store %arg7[%c0_11, %c0_12], %17 {strides = array<i32>} : memref<64x1xf32, #tpu.memory_space<vmem>>, vector<64x1xf32>,
      %c0_13 = arith.constant 0 : index
      %c0_14 = arith.constant 0 : index
      %19 = vector.load %arg8[%c0_13, %c0_14] : memref<64x1xf32, #tpu.memory_space<vmem>>, vector<64x1xf32>
      %20 = arith.mulf %2, %2 : vector<64x2xf32>
      %cst_15 = arith.constant dense<0.000000e+00> : vector<64xf32>
      %21 = vector.multi_reduction <add>, %20, %cst_15 [1] : vector<64x2xf32> to vector<64xf32>
      %22 = vector.shape_cast %21 : vector<64xf32> to vector<64x1xf32>
      %23 = arith.addf %19, %22 : vector<64x1xf32>
      %c0_16 = arith.constant 0 : index
      %c0_17 = arith.constant 0 : index
      %24 = vector.load %arg8[%c0_16, %c0_17] : memref<64x1xf32, #tpu.memory_space<vmem>>, vector<64x1xf32>
      tpu.vector_store %arg8[%c0_16, %c0_17], %23 {strides = array<i32>} : memref<64x1xf32, #tpu.memory_space<vmem>>, vector<64x1xf32>,
      %c0_18 = arith.constant 0 : index
      %c0_19 = arith.constant 0 : index
      %25 = vector.load %arg6[%c0_18, %c0_19] : memref<64x2xf32, #tpu.memory_space<vmem>>, vector<64x2xf32>
      tpu.vector_store %arg6[%c0_18, %c0_19], %2 {strides = array<i32>} : memref<64x2xf32, #tpu.memory_space<vmem>>, vector<64x2xf32>,
    } else {
    }
    %c1_i32 = arith.constant 1 : i32
    %11 = arith.cmpi eq, %arg0, %c1_i32 : i32
    %12 = arith.extui %11 : i1 to i32
    %c0_i32_7 = arith.constant 0 : i32
    %13 = arith.cmpi ne, %12, %c0_i32_7 : i32
    scf.if %13 {
      %c0_8 = arith.constant 0 : index
      %c0_9 = arith.constant 0 : index
      %14 = vector.load %arg7[%c0_8, %c0_9] : memref<64x1xf32, #tpu.memory_space<vmem>>, vector<64x1xf32>
      %cst_10 = arith.constant 5.000000e-01 : f32
      %15 = vector.broadcast %cst_10 : f32 to vector<64x1xf32>
      %16 = arith.mulf %14, %15 : vector<64x1xf32>
      %c0_11 = arith.constant 0 : index
      %c0_12 = arith.constant 0 : index
      %17 = vector.load %arg8[%c0_11, %c0_12] : memref<64x1xf32, #tpu.memory_space<vmem>>, vector<64x1xf32>
      %cst_13 = arith.constant 5.000000e-01 : f32
      %18 = vector.broadcast %cst_13 : f32 to vector<64x1xf32>
      %19 = arith.mulf %17, %18 : vector<64x1xf32>
      %20 = arith.mulf %16, %16 : vector<64x1xf32>
      %21 = arith.subf %19, %20 : vector<64x1xf32>
      %cst_14 = arith.constant 0.000000e+00 : f32
      %22 = vector.broadcast %cst_14 : f32 to vector<64x1xf32>
      %23 = arith.maximumf %21, %22 : vector<64x1xf32>
      %24 = vector.broadcast %16 : vector<64x1xf32> to vector<64x2xf32>
      %25 = arith.subf %2, %24 : vector<64x2xf32>
      %cst_15 = arith.constant 9.99999974E-6 : f32
      %26 = vector.broadcast %cst_15 : f32 to vector<64x1xf32>
      %27 = arith.addf %23, %26 : vector<64x1xf32>
      %28 = math.rsqrt %27 : vector<64x1xf32>
      %29 = vector.broadcast %28 : vector<64x1xf32> to vector<64x2xf32>
      %30 = arith.mulf %25, %29 : vector<64x2xf32>
      %c0_16 = arith.constant 0 : index
      %c0_17 = arith.constant 0 : index
      %31 = vector.load %arg4[%c0_16, %c0_17] : memref<64x1xf32, #tpu.memory_space<vmem>>, vector<64x1xf32>
      %32 = vector.broadcast %31 : vector<64x1xf32> to vector<64x2xf32>
      %33 = arith.mulf %30, %32 : vector<64x2xf32>
      %c0_18 = arith.constant 0 : index
      %c0_19 = arith.constant 0 : index
      %34 = vector.load %arg5[%c0_18, %c0_19] : memref<64x1xf32, #tpu.memory_space<vmem>>, vector<64x1xf32>
      %35 = vector.broadcast %34 : vector<64x1xf32> to vector<64x2xf32>
      %36 = arith.addf %33, %35 : vector<64x2xf32>
      %cst_20 = arith.constant 0.000000e+00 : f32
      %37 = vector.broadcast %cst_20 : f32 to vector<64x2xf32>
      %38 = arith.cmpf oge, %36, %37 : vector<64x2xf32>
      %cst_21 = arith.constant 2.000000e-01 : f32
      %39 = vector.broadcast %cst_21 : f32 to vector<64x2xf32>
      %40 = arith.mulf %39, %36 : vector<64x2xf32>
      %41 = arith.select %38, %36, %40 : vector<64x2xi1>, vector<64x2xf32>
      %c0_22 = arith.constant 0 : index
      %c0_23 = arith.constant 0 : index
      %42 = vector.load %arg6[%c0_22, %c0_23] : memref<64x2xf32, #tpu.memory_space<vmem>>, vector<64x2xf32>
      tpu.vector_store %arg6[%c0_22, %c0_23], %41 {strides = array<i32>} : memref<64x2xf32, #tpu.memory_space<vmem>>, vector<64x2xf32>,
    } else {
    }
    return
  }
  func.func @transform_0(%arg0: i32, %arg1: i32) -> (i32, i32) {
    %c0_i32 = arith.constant 0 : i32
    %c0_i32_0 = arith.constant 0 : i32
    %c0_i32_1 = arith.constant 0 : i32
    return %c0_i32, %c0_i32_0 : i32, i32
  }
  func.func @transform_1(%arg0: i32, %arg1: i32) -> (i32, i32) {
    %c0_i32 = arith.constant 0 : i32
    %c0_i32_0 = arith.constant 0 : i32
    return %c0_i32, %arg1 : i32, i32
  }
  func.func @transform_2(%arg0: i32, %arg1: i32) -> (i32, i32) {
    %c0_i32 = arith.constant 0 : i32
    %c0_i32_0 = arith.constant 0 : i32
    %c0_i32_1 = arith.constant 0 : i32
    return %c0_i32, %c0_i32_0 : i32, i32
  }
  func.func @transform_3(%arg0: i32, %arg1: i32) -> (i32, i32) {
    %c0_i32 = arith.constant 0 : i32
    %c0_i32_0 = arith.constant 0 : i32
    %c0_i32_1 = arith.constant 0 : i32
    return %c0_i32, %c0_i32_0 : i32, i32
  }
  func.func @transform_4(%arg0: i32, %arg1: i32) -> (i32, i32) {
    %c0_i32 = arith.constant 0 : i32
    %c0_i32_0 = arith.constant 0 : i32
    return %c0_i32, %arg1 : i32, i32
  }
}

module attributes {stable_mosaic.version = 11 : i64} {
  func.func @_linear_sigmoid_kernel(%arg0: i32, %arg1: memref<2x64xf32, #tpu.memory_space<vmem>>, %arg2: memref<64x1xf32, #tpu.memory_space<vmem>>, %arg3: memref<1x1xf32, #tpu.memory_space<vmem>>, %arg4: memref<2x1xf32, #tpu.memory_space<vmem>>) attributes {dimension_semantics = [#tpu.dimension_semantics<arbitrary>], iteration_bounds = array<i64: 1>, scalar_prefetch = 0 : i64, scratch_operands = 0 : i64, tpu.core_type = #tpu.core_type<tc>, window_params = [{pipeline_mode = #tpu.pipeline_mode<synchronous>, transform_indices = @transform_0, window_bounds = array<i64: 2, 64>}, {pipeline_mode = #tpu.pipeline_mode<synchronous>, transform_indices = @transform_1, window_bounds = array<i64: 64, 1>}, {pipeline_mode = #tpu.pipeline_mode<synchronous>, transform_indices = @transform_2, window_bounds = array<i64: 1, 1>}, {pipeline_mode = #tpu.pipeline_mode<synchronous>, transform_indices = @transform_3, window_bounds = array<i64: 2, 1>}]} {
    %c0 = arith.constant 0 : index
    %c0_0 = arith.constant 0 : index
    %0 = vector.load %arg1[%c0, %c0_0] : memref<2x64xf32, #tpu.memory_space<vmem>>, vector<2x64xf32>
    %c0_1 = arith.constant 0 : index
    %c0_2 = arith.constant 0 : index
    %1 = vector.load %arg2[%c0_1, %c0_2] : memref<64x1xf32, #tpu.memory_space<vmem>>, vector<64x1xf32>
    %cst = arith.constant dense<0.000000e+00> : vector<2x1xf32>
    %2 = tpu.matmul %0, %1, %cst {dimension_numbers = #tpu.dot_dimension_numbers<[1], [0], [0], [1], [0, 0, 1, 1], [], []>} : vector<2x64xf32>, vector<64x1xf32>, vector<2x1xf32> -> vector<2x1xf32>
    %c0_3 = arith.constant 0 : index
    %c0_4 = arith.constant 0 : index
    %3 = vector.load %arg3[%c0_3, %c0_4] : memref<1x1xf32, #tpu.memory_space<vmem>>, vector<1x1xf32>
    %4 = vector.broadcast %3 : vector<1x1xf32> to vector<2x1xf32>
    %5 = arith.addf %2, %4 : vector<2x1xf32>
    %cst_5 = arith.constant 0.000000e+00 : f32
    %6 = vector.broadcast %cst_5 : f32 to vector<2x1xf32>
    %7 = arith.subf %6, %5 : vector<2x1xf32>
    %8 = math.exp %7 : vector<2x1xf32>
    %cst_6 = arith.constant 1.000000e+00 : f32
    %9 = vector.broadcast %cst_6 : f32 to vector<2x1xf32>
    %10 = arith.addf %9, %8 : vector<2x1xf32>
    %cst_7 = arith.constant 1.000000e+00 : f32
    %11 = vector.broadcast %cst_7 : f32 to vector<2x1xf32>
    %12 = arith.divf %11, %10 : vector<2x1xf32>
    %c0_8 = arith.constant 0 : index
    %c0_9 = arith.constant 0 : index
    %13 = vector.load %arg4[%c0_8, %c0_9] : memref<2x1xf32, #tpu.memory_space<vmem>>, vector<2x1xf32>
    tpu.vector_store %arg4[%c0_8, %c0_9], %12 {strides = array<i32>} : memref<2x1xf32, #tpu.memory_space<vmem>>, vector<2x1xf32>,
    return
  }
  func.func @transform_0(%arg0: i32) -> (i32, i32) {
    %c0_i32 = arith.constant 0 : i32
    %c0_i32_0 = arith.constant 0 : i32
    %c0_i32_1 = arith.constant 0 : i32
    return %c0_i32, %c0_i32_0 : i32, i32
  }
  func.func @transform_1(%arg0: i32) -> (i32, i32) {
    %c0_i32 = arith.constant 0 : i32
    %c0_i32_0 = arith.constant 0 : i32
    %c0_i32_1 = arith.constant 0 : i32
    return %c0_i32, %c0_i32_0 : i32, i32
  }
  func.func @transform_2(%arg0: i32) -> (i32, i32) {
    %c0_i32 = arith.constant 0 : i32
    %c0_i32_0 = arith.constant 0 : i32
    %c0_i32_1 = arith.constant 0 : i32
    return %c0_i32, %c0_i32_0 : i32, i32
  }
  func.func @transform_3(%arg0: i32) -> (i32, i32) {
    %c0_i32 = arith.constant 0 : i32
    %c0_i32_0 = arith.constant 0 : i32
    %c0_i32_1 = arith.constant 0 : i32
    return %c0_i32, %c0_i32_0 : i32, i32
  }
}

</mosaic_0001>

<bundles_post_ra>
// kernel: discriminator_forward.5
= control target key start
LH: loop header
LB: loop body
LE: loop exit
PB: predicated region body
PF: predicated region fallthrough
CT: control target
= control target key end

     0   :  { %s848_s15 = smov 0   ;;  %s850_s16 = smov 0   ;;  %s1036_s0 = inlined_call_operand.vmem [shape: bf16[8,64], index: 0, kind: input, shape index: {}]   ;;  %s1037_s1 = inlined_call_operand.vmem [shape: bf16[64,1024], index: 1, kind: input, shape index: {}]   ;;  %s1038_s2 = inlined_call_operand.vmem [shape: f32[8,1], index: 2, kind: input, shape index: {}]   ;;  %s1039_s3 = inlined_call_operand.vmem [shape: f32[8,1], index: 3, kind: input, shape index: {}]   ;;  %s1040_s4 = inlined_call_operand.vmem [shape: f32[8,1024], index: 4, kind: output, shape index: {}]  }
   0x1   :  { %s852_s17 = smov 0   ;;  %s854_s18 = smov 0  }
   0x2   :  { %s856_s19 = smov 0   ;;  %s858_s20 = smov 0  }
   0x3   :  { %s860_s21 = smov 0  }
   0x4 LB: > { %s23_s22 = sadd.s32 1, %s811_s19  ;;  %s26_s23 = sadd.s32 1, %s815_s20  ;;  %s819_s21 = sphi %s860_s21, %s14_s21   ;;  %s815_s20 = sphi %s858_s20, %s1046_s20   ;;  %s811_s19 = sphi %s856_s19, %s1045_s19   ;;  %s807_s18 = sphi %s854_s18, %s1044_s18   ;;  %s803_s17 = sphi %s852_s17, %s1043_s17   ;;  %s799_s16 = sphi %s850_s16, %s1042_s16   ;;  %s795_s15 = sphi %s848_s15, %s1041_s15  }
   0x5   : > { %p24_p0 = scmp.ge.s32.totalorder %s23_s22, 2  ;;  %s54_s24 = sadd.s32 1, %s799_s16 }
   0x6   : > { %p61_p1 = scmp.ne.s32.totalorder %s799_s16, %s795_s15  ;;  %p62_p2 = scmp.eq.s32.totalorder %s819_s21, 0 }
   0x7   : > { %s1048_s22 = smov (%p24_p0, %s23_s22), 0  ;;  %s1050_s23 = smov (!%p24_p0, %s26_s23), %s815_s20 }
   0x8   : > { %s51_s25 = ssub.s32 %s811_s19, %s1048_s22  ;;  %p63_p3 = por %p62_p2, %p61_p1 }
   0x9   : > { %p28_p4 = scmp.ge.s32.totalorder %s1050_s23, 2  ;;  %p52_p5 = scmp.eq.s32.totalorder %s51_s25, 0 }
   0xa   : > { %p606_p6 = scmp.ge.s32.totalorder %s819_s21, 4 }
   0xb   : > { %s1052_s23 = smov (%p28_p4, %s1050_s23), 0 }
   0xc   : > { %s897_s26 = scalar_select %p52_p5, %s799_s16, %s54_s24  }
   0xd   : > { %164 = sbr.rel (%p606_p6) target bundleno = 38 (0x26), region = 28 }
  0x12   : > { %167 = sbr.rel (!%p63_p3) target bundleno = 38 (0x26), region = 32  ;;  %s169_s27 = sand.u32 (%p63_p3), 1, %s799_s16  }
  0x13   : > { %s686_s28 = sshll.u32 (%p63_p3), %s811_s19, 4  ;;  %s607_s29 = sshll.u32 (%p63_p3), %s169_s27, 7 }
  0x14   : > { %s905_s6 = scalar_lea.vmem (%p63_p3), %s1037_s1, %s686_s28  ;;  %s171_s7 = scalar_lea.vmem (%p63_p3), [#allocation4], %s607_s29 }
  0x15   : > { %v187_v0 = vld [vmem:[%s905_s6] sm:$0xff] (%p63_p3)  ;;  %v189_v1 = vld [vmem:[%s905_s6 + $0x8] sm:$0xff] (%p63_p3) }
  0x16   : > { %v191_v2 = vld [vmem:[%s905_s6 + $0x20] sm:$0xff] (%p63_p3)  ;;  %188 = vst [vmem:[%s171_s7] sm:$0xff] (%p63_p3), %v187_v0  ;;  %v193_v3 = vld [vmem:[%s905_s6 + $0x28] sm:$0xff] (%p63_p3) }
  0x17   : > { %190 = vst [vmem:[%s171_s7 + $0x8] sm:$0xff] %v189_v1  ;;  %v195_v4 = vld [vmem:[%s905_s6 + $0x40] sm:$0xff]  ;;  %v197_v5 = vld [vmem:[%s905_s6 + $0x48] sm:$0xff] }
  0x18   : > { %192 = vst [vmem:[%s171_s7 + $0x10] sm:$0xff] %v191_v2  ;;  %v199_v6 = vld [vmem:[%s905_s6 + $0x60] sm:$0xff]  ;;  %v201_v7 = vld [vmem:[%s905_s6 + $0x68] sm:$0xff] }
  0x19   : > { %194 = vst [vmem:[%s171_s7 + $0x18] sm:$0xff] %v193_v3  ;;  %v203_v8 = vld [vmem:[%s905_s6 + $0x80] sm:$0xff]  ;;  %v205_v9 = vld [vmem:[%s905_s6 + $0x88] sm:$0xff] }
  0x1a   : > { %196 = vst [vmem:[%s171_s7 + $0x20] sm:$0xff] %v195_v4  ;;  %v207_v10 = vld [vmem:[%s905_s6 + $0xa0] sm:$0xff]  ;;  %v209_v11 = vld [vmem:[%s905_s6 + $0xa8] sm:$0xff] }
  0x1b   : > { %198 = vst [vmem:[%s171_s7 + $0x28] sm:$0xff] %v197_v5  ;;  %v211_v12 = vld [vmem:[%s905_s6 + $0xc0] sm:$0xff]  ;;  %v213_v13 = vld [vmem:[%s905_s6 + $0xc8] sm:$0xff] }
  0x1c   : > { %200 = vst [vmem:[%s171_s7 + $0x30] sm:$0xff] %v199_v6  ;;  %v215_v14 = vld [vmem:[%s905_s6 + $0xe0] sm:$0xff]  ;;  %v217_v15 = vld [vmem:[%s905_s6 + $0xe8] sm:$0xff] }
  0x1d   : > { %202 = vst [vmem:[%s171_s7 + $0x38] sm:$0xff] %v201_v7 }
  0x1e   : > { %204 = vst [vmem:[%s171_s7 + $0x40] sm:$0xff] %v203_v8 }
  0x1f   : > { %206 = vst [vmem:[%s171_s7 + $0x48] sm:$0xff] %v205_v9 }
  0x20   : > { %208 = vst [vmem:[%s171_s7 + $0x50] sm:$0xff] %v207_v10 }
  0x21   : > { %210 = vst [vmem:[%s171_s7 + $0x58] sm:$0xff] %v209_v11 }
  0x22   : > { %212 = vst [vmem:[%s171_s7 + $0x60] sm:$0xff] %v211_v12 }
  0x23   : > { %214 = vst [vmem:[%s171_s7 + $0x68] sm:$0xff] %v213_v13 }
  0x24   : > { %216 = vst [vmem:[%s171_s7 + $0x70] sm:$0xff] %v215_v14 }
  0x25   : > { %218 = vst [vmem:[%s171_s7 + $0x78] sm:$0xff] %v217_v15 }
  0x26 PF: > { %p610_p7 = scmp.ge.s32.totalorder %s819_s21, 1  ;;  %p223_p8 = scmp.lt.s32.totalorder %s819_s21, 5 }
  0x28   : > { %p224_p9 = pnand %p610_p7, %p223_p8 }
  0x29   : > { %s230_s8 = sand.u32 (!%p224_p9), 1, %s795_s15   ;;  %s612_s9 = sshll.u32 (!%p224_p9), %s803_s17, 2 }
  0x2a   : > { %227 = sbr.rel (%p224_p9) target bundleno = 516 (0x204), region = 55  ;;  %s611_s10 = sshll.u32 (!%p224_p9), %s230_s8, 7 }
  0x2b   : > { %p257_p10 = scmp.lt.s32.totalorder (!%p224_p9), %s612_s9, 7  ;;  %s927_s11 = scalar_lea.vmem (!%p224_p9), [#allocation4], %s611_s10 }
  0x2c   : > { %p416_p11 = scmp.eq.s32.totalorder (!%p224_p9), %s807_s18, 0  ;;  %p417_p12 = scmp.eq.s32.totalorder (!%p224_p9), %s803_s17, 0 }
  0x2e   : > { %p418_p13 = pnand (!%p224_p9), %p417_p12, %p416_p11 }
  0x2f   : > { %s1054_s9 = smov (!%p257_p10, %s612_s9), 7  ;;  %v664_v16 = vld [vmem:[%s927_s11 + $0x60] sm:$0xf]  ;;  %v701_v17 = vld [vmem:[%s927_s11 + $0x6c] sm:$0xf0]  ;;  %vm360_vm0 = vcmask 523264  }
  0x30   : > { %v665_v18 = vor.u32 %v701_v17, %v664_v16  ;;  %v699_v19 = vld [vmem:[%s927_s11 + $0x64] sm:$0xf]  ;;  %v666_v20 = vld [vmem:[%s927_s11 + $0x70] sm:$0xf0]  ;;  %v672_v21 = vld [vmem:[%s927_s11 + $0x68] sm:$0xf] }
  0x31   : > { %s613_s12 = sshll.u32 %s1054_s9, 3  ;;  %v669_v22 = vor.u32 %v699_v19, %v666_v20  ;;  %v702_v23 = vld [vmem:[%s927_s11 + $0x74] sm:$0xf0]  ;;  %v700_v24 = vld [vmem:[%s927_s11 + $0x6c] sm:$0xf] }
  0x32   : > { %s939_s15 = scalar_lea.vmem %s1040_s4, %s613_s12  ;;  %368 = vmatpush.bf16.msra.mxu0 %v665_v18  ;;  %v673_v25 = vor.u32 %v702_v23, %v672_v21  ;;  %v674_v26 = vld [vmem:[%s927_s11 + $0x78] sm:$0xf0]  ;;  %v648_v27 = vld [vmem:[%s927_s11 + $0x40] sm:$0xf]  ;;  %v697_v28 = vld [vmem:[%s927_s11 + $0x4c] sm:$0xf0] }
  0x33   : > { %381 = vmatpush.bf16.msra.mxu1 %v669_v22  ;;  %v677_v29 = vor.u32 %v700_v24, %v674_v26  ;;  %v649_v30 = vor.u32 %v697_v28, %v648_v27  ;;  %v695_v31 = vld [vmem:[%s927_s11 + $0x44] sm:$0xf]  ;;  %v650_v32 = vld [vmem:[%s927_s11 + $0x50] sm:$0xf0]  ;;  %v656_v33 = vld [vmem:[%s927_s11 + $0x48] sm:$0xf] }
  0x34   : > { %394 = vmatpush.bf16.msra.mxu2 %v673_v25  ;;  %v653_v34 = vor.u32 %v695_v31, %v650_v32  ;;  %v698_v35 = vld [vmem:[%s927_s11 + $0x54] sm:$0xf0]  ;;  %v696_v36 = vld [vmem:[%s927_s11 + $0x4c] sm:$0xf]  ;;  %v658_v37 = vld [vmem:[%s927_s11 + $0x58] sm:$0xf0] }
  0x35   : > { %407 = vmatpush.bf16.msra.mxu3 %v677_v29  ;;  %v657_v38 = vor.u32 %v698_v35, %v656_v33  ;;  %v661_v39 = vor.u32 %v696_v36, %v658_v37  ;;  %v632_v40 = vld [vmem:[%s927_s11 + $0x20] sm:$0xf]  ;;  %v693_v41 = vld [vmem:[%s927_s11 + $0x2c] sm:$0xf0]  ;;  %v691_v42 = vld [vmem:[%s927_s11 + $0x24] sm:$0xf] }
  0x36   : > { %369 = vmatpush.bf16.msra.mxu0 %v649_v30  ;;  %v633_v43 = vor.u32 %v693_v41, %v632_v40  ;;  %v634_v44 = vld [vmem:[%s927_s11 + $0x30] sm:$0xf0]  ;;  %v640_v45 = vld [vmem:[%s927_s11 + $0x28] sm:$0xf]  ;;  %v694_v46 = vld [vmem:[%s927_s11 + $0x34] sm:$0xf0] }
  0x37   : > { %382 = vmatpush.bf16.msra.mxu1 %v653_v34  ;;  %v637_v47 = vor.u32 %v691_v42, %v634_v44  ;;  %v692_v48 = vld [vmem:[%s927_s11 + $0x2c] sm:$0xf]  ;;  %v642_v49 = vld [vmem:[%s927_s11 + $0x38] sm:$0xf0]  ;;  %v616_v50 = vld [vmem:[%s927_s11] sm:$0xf]  ;;  %v641_v51 = vor.u32 %v694_v46, %v640_v45 }
  0x38   : > { %395 = vmatpush.bf16.msra.mxu2 %v657_v38  ;;  %v689_v52 = vld [vmem:[%s927_s11 + $0xc] sm:$0xf0]  ;;  %v687_v53 = vld [vmem:[%s927_s11 + $0x4] sm:$0xf]  ;;  %v618_v54 = vld [vmem:[%s927_s11 + $0x10] sm:$0xf0]  ;;  %v645_v55 = vor.u32 %v692_v48, %v642_v49 }
  0x39   : > { %408 = vmatpush.bf16.msra.mxu3 %v661_v39  ;;  %v624_v56 = vld [vmem:[%s927_s11 + $0x8] sm:$0xf]  ;;  %v690_v57 = vld [vmem:[%s927_s11 + $0x14] sm:$0xf0]  ;;  %v617_v58 = vor.u32 %v689_v52, %v616_v50  ;;  %v688_v59 = vld [vmem:[%s927_s11 + $0xc] sm:$0xf]  ;;  %v621_v61 = vor.u32 %v687_v53, %v618_v54 }
  0x3a   : > { %370 = vmatpush.bf16.msra.mxu0 %v633_v43  ;;  %v626_v60 = vld [vmem:[%s927_s11 + $0x18] sm:$0xf0]  ;;  %v625_v62 = vor.u32 %v690_v57, %v624_v56  ;;  %v263_v0 = vld [vmem:[%s1036_s0] sm:$0xf] }
  0x3b   : > { %383 = vmatpush.bf16.msra.mxu1 %v637_v47  ;;  %v629_v63 = vor.u32 %v688_v59, %v626_v60 }
  0x3c   : > { %396 = vmatpush.bf16.msra.mxu2 %v641_v51 }
  0x3d   : > { %409 = vmatpush.bf16.msra.mxu3 %v645_v55 }
  0x3e   : > { %371 = vmatpush.bf16.msra.mxu0 %v617_v58 }
  0x3f   : > { %384 = vmatpush.bf16.msra.mxu1 %v621_v61 }
  0x40   : > { %397 = vmatpush.bf16.msra.mxu2 %v625_v62 }
  0x41   : > { %410 = vmatpush.bf16.msra.mxu3 %v629_v63  ;;  %678 = vmatmul.msk.bf16.vlgmr.msra.gmra.mxu0 %vm360_vm0, %v263_v0 }
  0x42   : > { %679 = vmatmul.msk.bf16.vlgmr.msra.gmra.mxu1 %vm360_vm0, %v263_v0 }
  0x43   : > { %680 = vmatmul.msk.bf16.vlgmr.msra.gmra.mxu2 %vm360_vm0, %v263_v0 }
  0x44   : > { %681 = vmatmul.msk.bf16.vlgmr.msra.gmra.mxu3 %vm360_vm0, %v263_v0 }
  0xbe   : > { %v971_v1 = vpop.f32.mrf.mxu0 }
  0xbf   : > { %v973_v2 = vpop.f32.mrf.mxu1 }
  0xc6   : > { %v975_v3 = vpop.f32.mrf.mxu2  ;;  %v375_v4 = vpop.f32.mrf.mxu0 }
  0xc7   : > { %v977_v5 = vpop.f32.mrf.mxu3  ;;  %v388_v6 = vpop.f32.mrf.mxu1 }
  0xcb   : > { %421 = sbr.rel (%p418_p13) target bundleno = 211 (0xd3), region = 63 }
  0xce   : > { %v401_v7 = vpop.f32.mrf.mxu2 }
  0xcf   : > { %v414_v8 = vpop.f32.mrf.mxu3 }
  0xd0   : > { %vm422_vm1 = vcmask 7168   ;;  %v821_v9 = vmov 0.0  }
  0xd1   : > { %423 = vst.msk [vmem:[#allocation2] sm:$0xff] %vm422_vm1, %v821_v9 }
  0xd2   : > { %424 = vst.msk [vmem:[#allocation3] sm:$0xff] %vm422_vm1, %v821_v9 }
  0xd3 PF: > { %p682_p0 = scmp.ne.s32.totalorder %s807_s18, 0 }
  0xd5   : > { %427 = sbr.rel (%p682_p0) target bundleno = 351 (0x15f), region = 67 }
  0xda   : > { %v429_v10 = vadd.f32 %v973_v2, %v971_v1  ;;  %v438_v11 = vmul.f32 %v971_v1, %v971_v1  ;;  %v439_v12 = vmul.f32 %v973_v2, %v973_v2  ;;  %449 = vst [vmem:[%s939_s15] sm:$0xff] %v971_v1  ;;  %v440_v14 = vmul.f32 %v975_v3, %v975_v3  ;;  %v428_v20 = vld [vmem:[#allocation2] sm:$0xff]  ;;  %v437_v23 = vld [vmem:[#allocation3] sm:$0xff] }
  0xdb   : > { %450 = vst [vmem:[%s939_s15 + $0x8] sm:$0xff] %v973_v2  ;;  %v441_v17 = vmul.f32 %v977_v5, %v977_v5  ;;  %vm435_vm2 = vcmask 7168  }
  0xdc   : > { %v430_v13 = vadd.f32 %v429_v10, %v975_v3  ;;  %v442_v15 = vadd.f32 %v439_v12, %v438_v11  ;;  %451 = vst [vmem:[%s939_s15 + $0x10] sm:$0xff] %v975_v3 }
  0xdd   : > { %452 = vst [vmem:[%s939_s15 + $0x18] sm:$0xff] %v977_v5 }
  0xde   : > { %v431_v16 = vadd.f32 %v430_v13, %v977_v5  ;;  %v443_v18 = vadd.f32 %v442_v15, %v440_v14 }
  0xe0   : > { %432 = vadd.xlane.f32.xlu0 %v431_v16  ;;  %v444_v19 = vadd.f32 %v443_v18, %v441_v17 }
  0xe8   : > { %445 = vadd.xlane.f32.xlu0 %v444_v19 }
 0x153   : > { %v433_v21 = vpop.xlane.xlu0 %432 }
 0x154   : > { %v434_v22 = vadd.f32 %v433_v21, %v428_v20 }
 0x156   : > { %436 = vst.msk [vmem:[#allocation2] sm:$0xff] %vm435_vm2, %v434_v22 }
 0x15b   : > { %v446_v24 = vpop.xlane.xlu0 %445 }
 0x15c   : > { %v447_v25 = vadd.f32 %v446_v24, %v437_v23 }
 0x15e   : > { %448 = vst.msk [vmem:[#allocation3] sm:$0xff] %vm435_vm2, %v447_v25 }
 0x15f PF: > { %p683_p1 = scmp.ne.s32.totalorder %s807_s18, 1 }
 0x161   : > { %456 = sbr.rel (%p683_p1) target bundleno = 516 (0x204), region = 71 }
 0x166   : > { %v493_v26 = vld [vmem:[%s1038_s2] sm:$0xff]  ;;  %v459_v28 = vld [vmem:[#allocation3] sm:$0xff]  ;;  %v822_v29 = vmov 0  }
 0x167   : > { %v457_v27 = vld [vmem:[#allocation2] sm:$0xff]  ;;  %762 = vset.pattern.permute.xlu1 %v822_v29  ;;  %761 = vset.pattern.permute.xlu0 %v822_v29  ;;  %v460_v31 = vmul.f32 0.0009765625, %v459_v28 }
 0x168   : > { %v458_v30 = vmul.f32 0.0009765625, %v457_v27  ;;  %496 = vperm.xlu1 %762, %v493_v26   ;;  %v503_v35 = vld [vmem:[%s1039_s3] sm:$0xff] }
 0x16a   : > { %466 = vperm.xlu0 %761, %v458_v30   ;;  %v461_v32 = vmul.f32 %v458_v30, %v458_v30 }
 0x16c   : > { %v462_v33 = vsub.f32 %v460_v31, %v461_v32 }
 0x16e   : > { %v463_v34 = vmax.f32 %v462_v33, 0.0 }
 0x170   : > { %v473_v36 = vadd.f32 1e-05, %v463_v34  ;;  %506 = vperm.xlu1 %762, %v503_v35  }
 0x172   : > { %763 = vrsqrt.f32 %v473_v36  ;;  %vm480_vm3 = vweird.f32 %v473_v36 }
 0x178   : > { %v764_v37 = vpop.eup %763 }
 0x179   : > { %v475_v38 = vmul.f32 %v764_v37, %v473_v36  ;;  %vm481_vm4 = vweird.f32 %v764_v37 }
 0x17a   : > { %vm482_vm5 = vmor %vm480_vm3, %vm481_vm4 }
 0x17b   : > { %v476_v39 = vmul.f32 %v764_v37, %v475_v38 }
 0x17d   : > { %v477_v40 = vmul.f32 0.5, %v476_v39 }
 0x17f   : > { %v478_v41 = vsub.f32 1.5, %v477_v40 }
 0x181   : > { %v479_v42 = vmul.f32 %v764_v37, %v478_v41 }
 0x183   : > { %v483_v43 = vsel %vm482_vm5, %v764_v37, %v479_v42 }
 0x184   : > { %486 = vperm.xlu0 %761, %v483_v43  }
 0x1da   : > { %v497_v45 = vpop.permute.xlu1 %496 }
 0x1dc   : > { %v467_v44 = vpop.permute.xlu0 %466 }
 0x1dd   : > { %v469_v46 = vsub.f32 %v971_v1, %v467_v44  ;;  %v470_v47 = vsub.f32 %v973_v2, %v467_v44  ;;  %v471_v48 = vsub.f32 %v975_v3, %v467_v44  ;;  %v472_v49 = vsub.f32 %v977_v5, %v467_v44 }
 0x1e2   : > { %v507_v59 = vpop.permute.xlu1 %506 }
 0x1f6   : > { %v487_v50 = vpop.permute.xlu0 %486 }
 0x1f7   : > { %v489_v51 = vmul.f32 %v487_v50, %v469_v46  ;;  %v490_v52 = vmul.f32 %v487_v50, %v470_v47  ;;  %v491_v53 = vmul.f32 %v487_v50, %v471_v48  ;;  %v492_v54 = vmul.f32 %v487_v50, %v472_v49 }
 0x1f9   : > { %v499_v55 = vmul.f32 %v497_v45, %v489_v51  ;;  %v500_v56 = vmul.f32 %v497_v45, %v490_v52  ;;  %v501_v57 = vmul.f32 %v497_v45, %v491_v53  ;;  %v502_v58 = vmul.f32 %v497_v45, %v492_v54 }
 0x1fb   : > { %v509_v60 = vadd.f32 %v507_v59, %v499_v55  ;;  %v510_v61 = vadd.f32 %v507_v59, %v500_v56  ;;  %v511_v62 = vadd.f32 %v507_v59, %v501_v57  ;;  %v512_v63 = vadd.f32 %v507_v59, %v502_v58 }
 0x1fd   : > { %vm513_vm6 = vcmp.ge.f32.partialorder %v509_v60, 0.0  ;;  %vm514_vm7 = vcmp.ge.f32.partialorder %v510_v61, 0.0  ;;  %v517_v0 = vmul.f32 0.2, %v509_v60  ;;  %v518_v1 = vmul.f32 0.2, %v510_v61 }
 0x1fe   : > { %v519_v2 = vmul.f32 0.2, %v511_v62  ;;  %vm515_vm8 = vcmp.ge.f32.partialorder %v511_v62, 0.0  ;;  %v520_v3 = vmul.f32 0.2, %v512_v63  ;;  %vm516_vm9 = vcmp.ge.f32.partialorder %v512_v63, 0.0 }
 0x1ff   : > { %v521_v4 = vsel %vm513_vm6, %v509_v60, %v517_v0  ;;  %v522_v5 = vsel %vm514_vm7, %v510_v61, %v518_v1 }
 0x200   : > { %525 = vst [vmem:[%s939_s15] sm:$0xff] %v521_v4  ;;  %v523_v6 = vsel %vm515_vm8, %v511_v62, %v519_v2  ;;  %v524_v7 = vsel %vm516_vm9, %v512_v63, %v520_v3 }
 0x201   : > { %526 = vst [vmem:[%s939_s15 + $0x8] sm:$0xff] %v522_v5 }
 0x202   : > { %527 = vst [vmem:[%s939_s15 + $0x10] sm:$0xff] %v523_v6 }
 0x203   : > { %528 = vst [vmem:[%s939_s15 + $0x18] sm:$0xff] %v524_v7 }
 0x204 PF: > { %s14_s21 = sadd.s32 1, %s819_s21   ;;  %s1041_s15 = smov %s799_s16 }
 0x205   : > { %p11_p2 = scmp.ge.s32.totalorder %s14_s21, 6   ;;  %s1042_s16 = smov %s897_s26 }
 0x206   : > { %s1043_s17 = smov %s811_s19  ;;  %s1044_s18 = smov %s815_s20 }
 0x207   : > { %s1045_s19 = smov %s1048_s22  ;;  %s1046_s20 = smov %s1052_s23 }
 0x208   :  { %13 = sbr.rel (!%p11_p2) target bundleno = 4 (0x4), region = 106 }

// kernel: discriminator_forward.6
= control target key start
LH: loop header
LB: loop body
LE: loop exit
PB: predicated region body
PF: predicated region fallthrough
CT: control target
= control target key end

     0   :  { %s1017_s15 = smov 0   ;;  %s1019_s16 = smov 0   ;;  %s1209_s0 = inlined_call_operand.vmem [shape: bf16[16,512], index: 0, kind: input, shape index: {}]   ;;  %s1210_s1 = inlined_call_operand.vmem [shape: bf16[512,128], index: 1, kind: input, shape index: {}]   ;;  %s1211_s2 = inlined_call_operand.vmem [shape: f32[16,1], index: 2, kind: input, shape index: {}]   ;;  %s1212_s3 = inlined_call_operand.vmem [shape: f32[16,1], index: 3, kind: input, shape index: {}]   ;;  %s1213_s4 = inlined_call_operand.vmem [shape: f32[16,128], index: 4, kind: output, shape index: {}]  }
   0x1   :  { %s1021_s17 = smov 0  }
   0x2 LB: > { %s26_s18 = sadd.s32 1, %s984_s16  ;;  %p745_p0 = scmp.ge.s32.totalorder %s988_s17, 1  ;;  %s988_s17 = sphi %s1021_s17, %s14_s17   ;;  %s984_s16 = sphi %s1019_s16, %s1215_s16   ;;  %s980_s15 = sphi %s1017_s15, %s1214_s15  }
   0x3   : > { %p28_p1 = scmp.ge.s32.totalorder %s26_s18, 2  ;;  %p173_p2 = scmp.lt.s32.totalorder %s988_s17, 3 }
   0x5   : > { %s1217_s18 = smov (%p28_p1, %s26_s18), 0  ;;  %p174_p3 = pnand %p745_p0, %p173_p2 }
   0x6   : > { %p541_p4 = scmp.eq.s32.totalorder (!%p174_p3), %s980_s15, 0 }
   0x7   : > { %177 = sbr.rel (%p174_p3) target bundleno = 498 (0x1f2), region = 36 }
   0xc   : > { %v907_v0 = vld [vmem:[%s1210_s1 + $0x38] sm:$0xff]  ;;  %v906_v4 = vld [vmem:[%s1210_s1 + $0x30] sm:$0xff]  ;;  %v905_v8 = vld [vmem:[%s1210_s1 + $0x28] sm:$0xff]  ;;  %vm547_vm0 = vcmask (%p541_p4), 7168   ;;  %v990_v58 = vmov (%p541_p4), 0.0  }
   0xd   : > { %v915_v1 = vld [vmem:[%s1210_s1 + $0x78] sm:$0xff]  ;;  %485 = vmatpush.bf16.msra.mxu0 %v907_v0  ;;  %v914_v5 = vld [vmem:[%s1210_s1 + $0x70] sm:$0xff]  ;;  %v913_v9 = vld [vmem:[%s1210_s1 + $0x68] sm:$0xff]  ;;  %548 = vst.msk [vmem:[#allocation2] sm:$0xff] (%p541_p4), %vm547_vm0, %v990_v58 }
   0xe   : > { %v923_v2 = vld [vmem:[%s1210_s1 + $0xb8] sm:$0xff]  ;;  %499 = vmatpush.bf16.msra.mxu1 %v915_v1  ;;  %v922_v6 = vld [vmem:[%s1210_s1 + $0xb0] sm:$0xff]  ;;  %v921_v10 = vld [vmem:[%s1210_s1 + $0xa8] sm:$0xff]  ;;  %549 = vst.msk [vmem:[#allocation2 + $0x8] sm:$0xff] (%p541_p4), %vm547_vm0, %v990_v58 }
   0xf   : > { %v931_v3 = vld [vmem:[%s1210_s1 + $0xf8] sm:$0xff]  ;;  %513 = vmatpush.bf16.msra.mxu2 %v923_v2  ;;  %v930_v7 = vld [vmem:[%s1210_s1 + $0xf0] sm:$0xff]  ;;  %v929_v11 = vld [vmem:[%s1210_s1 + $0xe8] sm:$0xff]  ;;  %550 = vst.msk [vmem:[#allocation3] sm:$0xff] (%p541_p4), %vm547_vm0, %v990_v58 }
  0x10   : > { %527 = vmatpush.bf16.msra.mxu3 %v931_v3  ;;  %v904_v12 = vld [vmem:[%s1210_s1 + $0x20] sm:$0xff]  ;;  %v903_v16 = vld [vmem:[%s1210_s1 + $0x18] sm:$0xff]  ;;  %v902_v20 = vld [vmem:[%s1210_s1 + $0x10] sm:$0xff]  ;;  %551 = vst.msk [vmem:[#allocation3 + $0x8] sm:$0xff] (%p541_p4), %vm547_vm0, %v990_v58 }
  0x11   : > { %486 = vmatpush.bf16.msra.mxu0 %v906_v4  ;;  %v912_v13 = vld [vmem:[%s1210_s1 + $0x60] sm:$0xff]  ;;  %v911_v17 = vld [vmem:[%s1210_s1 + $0x58] sm:$0xff]  ;;  %v910_v21 = vld [vmem:[%s1210_s1 + $0x50] sm:$0xff] }
  0x12   : > { %500 = vmatpush.bf16.msra.mxu1 %v914_v5  ;;  %v920_v14 = vld [vmem:[%s1210_s1 + $0xa0] sm:$0xff]  ;;  %v919_v18 = vld [vmem:[%s1210_s1 + $0x98] sm:$0xff]  ;;  %v918_v22 = vld [vmem:[%s1210_s1 + $0x90] sm:$0xff] }
  0x13   : > { %514 = vmatpush.bf16.msra.mxu2 %v922_v6  ;;  %v928_v15 = vld [vmem:[%s1210_s1 + $0xe0] sm:$0xff]  ;;  %v927_v19 = vld [vmem:[%s1210_s1 + $0xd8] sm:$0xff]  ;;  %v926_v23 = vld [vmem:[%s1210_s1 + $0xd0] sm:$0xff] }
  0x14   : > { %528 = vmatpush.bf16.msra.mxu3 %v930_v7  ;;  %v901_v24 = vld [vmem:[%s1210_s1 + $0x8] sm:$0xff]  ;;  %v900_v28 = vld [vmem:[%s1210_s1] sm:$0xff]  ;;  %v898_v33 = vld [vmem:[%s1209_s0 + $0xc] sm:$0xf0] }
  0x15   : > { %487 = vmatpush.bf16.msra.mxu0 %v905_v8  ;;  %v909_v25 = vld [vmem:[%s1210_s1 + $0x48] sm:$0xff]  ;;  %v908_v29 = vld [vmem:[%s1210_s1 + $0x40] sm:$0xff]  ;;  %v750_v35 = vld [vmem:[%s1209_s0 + $0x10] sm:$0xf0] }
  0x16   : > { %501 = vmatpush.bf16.msra.mxu1 %v913_v9  ;;  %v917_v26 = vld [vmem:[%s1210_s1 + $0x88] sm:$0xff]  ;;  %v916_v30 = vld [vmem:[%s1210_s1 + $0x80] sm:$0xff]  ;;  %v899_v37 = vld [vmem:[%s1209_s0 + $0x14] sm:$0xf0] }
  0x17   : > { %515 = vmatpush.bf16.msra.mxu2 %v921_v10  ;;  %v925_v27 = vld [vmem:[%s1210_s1 + $0xc8] sm:$0xff]  ;;  %v924_v31 = vld [vmem:[%s1210_s1 + $0xc0] sm:$0xff]  ;;  %v758_v39 = vld [vmem:[%s1209_s0 + $0x18] sm:$0xf0] }
  0x18   : > { %529 = vmatpush.bf16.msra.mxu3 %v929_v11  ;;  %v748_v32 = vld [vmem:[%s1209_s0] sm:$0xf]  ;;  %v896_v34 = vld [vmem:[%s1209_s0 + $0x4] sm:$0xf]  ;;  %v756_v36 = vld [vmem:[%s1209_s0 + $0x8] sm:$0xf] }
  0x19   : > { %488 = vmatpush.bf16.msra.mxu0 %v904_v12  ;;  %v897_v38 = vld [vmem:[%s1209_s0 + $0xc] sm:$0xf]  ;;  %v749_v40 = vor.u32 %v898_v33, %v748_v32  ;;  %v753_v41 = vor.u32 %v896_v34, %v750_v35  ;;  %v757_v42 = vor.u32 %v899_v37, %v756_v36 }
  0x1a   : > { %502 = vmatpush.bf16.msra.mxu1 %v912_v13  ;;  %v761_v43 = vor.u32 %v897_v38, %v758_v39 }
  0x1b   : > { %516 = vmatpush.bf16.msra.mxu2 %v920_v14 }
  0x1c   : > { %530 = vmatpush.bf16.msra.mxu3 %v928_v15 }
  0x1d   : > { %489 = vmatpush.bf16.msra.mxu0 %v903_v16 }
  0x1e   : > { %503 = vmatpush.bf16.msra.mxu1 %v911_v17 }
  0x1f   : > { %517 = vmatpush.bf16.msra.mxu2 %v919_v18 }
  0x20   : > { %531 = vmatpush.bf16.msra.mxu3 %v927_v19 }
  0x21   : > { %490 = vmatpush.bf16.msra.mxu0 %v902_v20 }
  0x22   : > { %504 = vmatpush.bf16.msra.mxu1 %v910_v21 }
  0x23   : > { %518 = vmatpush.bf16.msra.mxu2 %v918_v22 }
  0x24   : > { %532 = vmatpush.bf16.msra.mxu3 %v926_v23 }
  0x25   : > { %491 = vmatpush.bf16.msra.mxu0 %v901_v24 }
  0x26   : > { %505 = vmatpush.bf16.msra.mxu1 %v909_v25 }
  0x27   : > { %519 = vmatpush.bf16.msra.mxu2 %v917_v26 }
  0x28   : > { %533 = vmatpush.bf16.msra.mxu3 %v925_v27 }
  0x29   : > { %492 = vmatpush.bf16.msra.mxu0 %v900_v28 }
  0x2a   : > { %506 = vmatpush.bf16.msra.mxu1 %v908_v29 }
  0x2b   : > { %520 = vmatpush.bf16.msra.mxu2 %v916_v30 }
  0x2c   : > { %534 = vmatpush.bf16.msra.mxu3 %v924_v31  ;;  %493 = vmatmul.bf16.vlgmr.msra.gmra.mxu0 %v749_v40 }
  0x2d   : > { %507 = vmatmul.bf16.vlgmr.msra.gmra.mxu1 %v753_v41 }
  0x2e   : > { %521 = vmatmul.bf16.vlgmr.msra.gmra.mxu2 %v757_v42 }
  0x2f   : > { %535 = vmatmul.bf16.vlgmr.msra.gmra.mxu3 %v761_v43 }
  0xa9   : > { %v494_v44 = vpop.f32.mrf.mxu0 }
  0xaa   : > { %v508_v45 = vpop.f32.mrf.mxu1 }
  0xab   : > { %v509_v46 = vadd.f32 %v508_v45, %v494_v44 }
  0xb1   : > { %v522_v47 = vpop.f32.mrf.mxu2  ;;  %v496_v51 = vpop.f32.mrf.mxu0 }
  0xb2   : > { %v536_v48 = vpop.f32.mrf.mxu3  ;;  %v523_v49 = vadd.f32 %v522_v47, %v509_v46  ;;  %v510_v52 = vpop.f32.mrf.mxu1 }
  0xb3   : > { %v511_v53 = vadd.f32 %v510_v52, %v496_v51 }
  0xb4   : > { %v1158_v50 = vadd.f32 %v536_v48, %v523_v49 }
  0xb8   : > { %546 = sbr.rel (!%p541_p4) target bundleno = 189 (0xbd), region = 40 }
  0xb9   : > { %v524_v54 = vpop.f32.mrf.mxu2 }
  0xba   : > { %v525_v55 = vadd.f32 %v524_v54, %v511_v53  ;;  %v538_v56 = vpop.f32.mrf.mxu3 }
  0xbc   : > { %v1160_v57 = vadd.f32 %v538_v56, %v525_v55 }
  0xbd PF: > { %p891_p5 = scmp.ne.s32.totalorder %s980_s15, 0 }
  0xbf   : > { %554 = sbr.rel (%p891_p5) target bundleno = 325 (0x145), region = 44 }
  0xc4   : > { %557 = vadd.xlane.f32.xlu0 %v1158_v50  ;;  %v568_v59 = vmul.f32 %v1158_v50, %v1158_v50  ;;  %578 = vst [vmem:[%s1213_s4] sm:$0xff] %v1158_v50  ;;  %v569_v60 = vmul.f32 %v1160_v57, %v1160_v57  ;;  %v555_v61 = vld [vmem:[#allocation2] sm:$0xff]  ;;  %vm563_vm1 = vcmask 7168   ;;  %v566_v63 = vld [vmem:[#allocation3] sm:$0xff]  ;;  %v556_v3 = vld [vmem:[#allocation2 + $0x8] sm:$0xff] }
  0xc5   : > { %579 = vst [vmem:[%s1213_s4 + $0x8] sm:$0xff] %v1160_v57  ;;  %v567_v5 = vld [vmem:[#allocation3 + $0x8] sm:$0xff] }
  0xc6   : > { %570 = vadd.xlane.f32.xlu1 %v568_v59 }
  0xcc   : > { %559 = vadd.xlane.f32.xlu0 %v1160_v57 }
  0xce   : > { %572 = vadd.xlane.f32.xlu1 %v569_v60 }
 0x137   : > { %v558_v62 = vpop.xlane.xlu0 %557 }
 0x138   : > { %v561_v0 = vadd.f32 %v558_v62, %v555_v61 }
 0x139   : > { %v571_v1 = vpop.xlane.xlu1 %570 }
 0x13a   : > { %564 = vst.msk [vmem:[#allocation2] sm:$0xff] %vm563_vm1, %v561_v0  ;;  %v574_v2 = vadd.f32 %v571_v1, %v566_v63 }
 0x13c   : > { %576 = vst.msk [vmem:[#allocation3] sm:$0xff] %vm563_vm1, %v574_v2 }
 0x13f   : > { %v560_v4 = vpop.xlane.xlu0 %559 }
 0x140   : > { %v562_v6 = vadd.f32 %v560_v4, %v556_v3 }
 0x141   : > { %v573_v7 = vpop.xlane.xlu1 %572 }
 0x142   : > { %565 = vst.msk [vmem:[#allocation2 + $0x8] sm:$0xff] %vm563_vm1, %v562_v6  ;;  %v575_v8 = vadd.f32 %v573_v7, %v567_v5 }
 0x144   : > { %577 = vst.msk [vmem:[#allocation3 + $0x8] sm:$0xff] %vm563_vm1, %v575_v8 }
 0x145 PF: > { %p892_p6 = scmp.ne.s32.totalorder %s980_s15, 1 }
 0x147   : > { %583 = sbr.rel (%p892_p6) target bundleno = 498 (0x1f2), region = 48 }
 0x14c   : > { %v584_v9 = vld [vmem:[#allocation2] sm:$0xff]  ;;  %v588_v10 = vld [vmem:[#allocation3] sm:$0xff]  ;;  %v585_v11 = vld [vmem:[#allocation2 + $0x8] sm:$0xff]  ;;  %v991_v12 = vmov 0  }
 0x14d   : > { %959 = vset.pattern.permute.xlu0 %v991_v12  ;;  %v586_v13 = vmul.f32 0.0078125, %v584_v9  ;;  %v590_v14 = vmul.f32 0.0078125, %v588_v10  ;;  %v587_v15 = vmul.f32 0.0078125, %v585_v11  ;;  %v589_v16 = vld [vmem:[#allocation3 + $0x8] sm:$0xff]  ;;  %961 = vset.pattern.permute.xlu1 %v991_v12  ;;  %v644_v26 = vld [vmem:[%s1211_s2] sm:$0xff]  ;;  %v645_v32 = vld [vmem:[%s1211_s2 + $0x8] sm:$0xff] }
 0x14e   : > { %v591_v17 = vmul.f32 0.0078125, %v589_v16  ;;  %960 = vset.pattern.permute.xlu2 %v991_v12  ;;  %v658_v27 = vld [vmem:[%s1212_s3] sm:$0xff]  ;;  %v659_v43 = vld [vmem:[%s1212_s3 + $0x8] sm:$0xff] }
 0x14f   : > { %600 = vperm.xlu0 %959, %v586_v13   ;;  %v592_v18 = vmul.f32 %v586_v13, %v586_v13  ;;  %v593_v19 = vmul.f32 %v587_v15, %v587_v15  ;;  %648 = vperm.xlu2 %960, %v644_v26  }
 0x151   : > { %v594_v20 = vsub.f32 %v590_v14, %v592_v18  ;;  %v595_v21 = vsub.f32 %v591_v17, %v593_v19 }
 0x153   : > { %v596_v22 = vmax.f32 %v594_v20, 0.0  ;;  %v597_v23 = vmax.f32 %v595_v21, 0.0 }
 0x155   : > { %v610_v24 = vadd.f32 1e-05, %v596_v22  ;;  %v611_v25 = vadd.f32 1e-05, %v597_v23 }
 0x157   : > { %962 = vrsqrt.f32 %v610_v24  ;;  %605 = vperm.xlu0 %959, %v587_v15   ;;  %vm618_vm2 = vweird.f32 %v610_v24  ;;  %653 = vperm.xlu2 %960, %v645_v32   ;;  %vm628_vm5 = vweird.f32 %v611_v25 }
 0x158   : > { %964 = vrsqrt.f32 %v611_v25 }
 0x15d   : > { %v963_v28 = vpop.eup %962 }
 0x15e   : > { %v965_v29 = vpop.eup %964  ;;  %v613_v30 = vmul.f32 %v963_v28, %v610_v24  ;;  %vm619_vm3 = vweird.f32 %v963_v28 }
 0x15f   : > { %662 = vperm.xlu0 %959, %v658_v27   ;;  %v623_v31 = vmul.f32 %v965_v29, %v611_v25  ;;  %vm620_vm4 = vmor %vm618_vm2, %vm619_vm3  ;;  %vm629_vm6 = vweird.f32 %v965_v29 }
 0x160   : > { %v614_v33 = vmul.f32 %v963_v28, %v613_v30  ;;  %vm630_vm7 = vmor %vm628_vm5, %vm629_vm6 }
 0x161   : > { %v624_v34 = vmul.f32 %v965_v29, %v623_v31 }
 0x162   : > { %v615_v35 = vmul.f32 0.5, %v614_v33 }
 0x163   : > { %v625_v36 = vmul.f32 0.5, %v624_v34 }
 0x164   : > { %v616_v37 = vsub.f32 1.5, %v615_v35 }
 0x165   : > { %v626_v39 = vsub.f32 1.5, %v625_v36 }
 0x166   : > { %v617_v38 = vmul.f32 %v963_v28, %v616_v37 }
 0x167   : > { %v627_v41 = vmul.f32 %v965_v29, %v626_v39 }
 0x168   : > { %v621_v40 = vsel %vm620_vm4, %v963_v28, %v617_v38 }
 0x169   : > { %634 = vperm.xlu1 %961, %v621_v40   ;;  %v631_v42 = vsel %vm630_vm7, %v965_v29, %v627_v41 }
 0x171   : > { %639 = vperm.xlu1 %961, %v631_v42  }
 0x179   : > { %667 = vperm.xlu1 %961, %v659_v43  }
 0x1a9   : > { %v649_v49 = vpop.permute.xlu2 %648 }
 0x1b1   : > { %v654_v60 = vpop.permute.xlu2 %653 }
 0x1c1   : > { %v601_v44 = vpop.permute.xlu0 %600 }
 0x1c2   : > { %v608_v46 = vsub.f32 %v1158_v50, %v601_v44 }
 0x1c9   : > { %v606_v45 = vpop.permute.xlu0 %605 }
 0x1ca   : > { %v609_v56 = vsub.f32 %v1160_v57, %v606_v45 }
 0x1d1   : > { %v663_v52 = vpop.permute.xlu0 %662 }
 0x1db   : > { %v635_v47 = vpop.permute.xlu1 %634 }
 0x1dc   : > { %v642_v48 = vmul.f32 %v635_v47, %v608_v46 }
 0x1de   : > { %v656_v51 = vmul.f32 %v649_v49, %v642_v48 }
 0x1e0   : > { %v670_v53 = vadd.f32 %v663_v52, %v656_v51 }
 0x1e2   : > { %vm672_vm8 = vcmp.ge.f32.partialorder %v670_v53, 0.0  ;;  %v674_v54 = vmul.f32 0.2, %v670_v53 }
 0x1e3   : > { %v640_v55 = vpop.permute.xlu1 %639 }
 0x1e4   : > { %v676_v58 = vsel %vm672_vm8, %v670_v53, %v674_v54  ;;  %v643_v59 = vmul.f32 %v640_v55, %v609_v56 }
 0x1e5   : > { %678 = vst [vmem:[%s1213_s4] sm:$0xff] %v676_v58 }
 0x1e6   : > { %v657_v61 = vmul.f32 %v654_v60, %v643_v59 }
 0x1eb   : > { %v668_v50 = vpop.permute.xlu1 %667 }
 0x1ec   : > { %v671_v62 = vadd.f32 %v668_v50, %v657_v61 }
 0x1ee   : > { %vm673_vm9 = vcmp.ge.f32.partialorder %v671_v62, 0.0  ;;  %v675_v63 = vmul.f32 0.2, %v671_v62 }
 0x1f0   : > { %v677_v0 = vsel %vm673_vm9, %v671_v62, %v675_v63 }
 0x1f1   : > { %679 = vst [vmem:[%s1213_s4 + $0x8] sm:$0xff] %v677_v0 }
 0x1f2 PF: > { %s14_s17 = sadd.s32 1, %s988_s17   ;;  %s1214_s15 = smov %s984_s16 }
 0x1f3   : > { %p11_p7 = scmp.ge.s32.totalorder %s14_s17, 4   ;;  %s1215_s16 = smov %s1217_s18 }
 0x1f5   :  { %13 = sbr.rel (!%p11_p7) target bundleno = 2 (0x2), region = 78 }

// kernel: discriminator_forward.7
= control target key start
LH: loop header
LB: loop body
LE: loop exit
PB: predicated region body
PF: predicated region fallthrough
CT: control target
= control target key end

     0   :  { %s1799_s15 = smov 0   ;;  %s1801_s16 = smov 0   ;;  %s2221_s0 = inlined_call_operand.vmem [shape: bf16[32,1024], index: 0, kind: input, shape index: {}]   ;;  %s2222_s1 = inlined_call_operand.vmem [shape: bf16[1024,16], index: 1, kind: input, shape index: {}]   ;;  %s2223_s2 = inlined_call_operand.vmem [shape: f32[32,1], index: 2, kind: input, shape index: {}]   ;;  %s2224_s3 = inlined_call_operand.vmem [shape: f32[32,1], index: 3, kind: input, shape index: {}]   ;;  %s2225_s4 = inlined_call_operand.vmem [shape: f32[32,16], index: 4, kind: output, shape index: {}]  }
   0x1   :  { %s1803_s17 = smov 0  }
   0x2 LB: > { %s26_s18 = sadd.s32 1, %s1766_s16  ;;  %p1303_p0 = scmp.ge.s32.totalorder %s1770_s17, 1  ;;  %s1770_s17 = sphi %s1803_s17, %s14_s17   ;;  %s1766_s16 = sphi %s1801_s16, %s2227_s16   ;;  %s1762_s15 = sphi %s1799_s15, %s2226_s15  }
   0x3   : > { %p28_p1 = scmp.ge.s32.totalorder %s26_s18, 2  ;;  %p173_p2 = scmp.lt.s32.totalorder %s1770_s17, 3 }
   0x5   : > { %s2229_s18 = smov (%p28_p1, %s26_s18), 0  ;;  %p174_p3 = pnand %p1303_p0, %p173_p2 }
   0x6   : > { %p965_p4 = scmp.eq.s32.totalorder (!%p174_p3), %s1762_s15, 0 }
   0x7   : > { %177 = sbr.rel (%p174_p3) target bundleno = 555 (0x22b), region = 36 }
   0xc   : > { %v1653_v0 = vld [vmem:[%s2222_s1 + $0x38] sm:$0xff]  ;;  %v1652_v4 = vld [vmem:[%s2222_s1 + $0x30] sm:$0xff]  ;;  %v1651_v8 = vld [vmem:[%s2222_s1 + $0x28] sm:$0xff]  ;;  %vm971_vm0 = vcmask (%p965_p4), 7168  }
   0xd   : > { %v1661_v1 = vld [vmem:[%s2222_s1 + $0x78] sm:$0xff]  ;;  %813 = vmatpush.bf16.msra.mxu0 %v1653_v0  ;;  %v1660_v5 = vld [vmem:[%s2222_s1 + $0x70] sm:$0xff]  ;;  %v1659_v9 = vld [vmem:[%s2222_s1 + $0x68] sm:$0xff] }
   0xe   : > { %v1669_v2 = vld [vmem:[%s2222_s1 + $0xb8] sm:$0xff]  ;;  %832 = vmatpush.bf16.msra.mxu1 %v1661_v1  ;;  %v1668_v6 = vld [vmem:[%s2222_s1 + $0xb0] sm:$0xff]  ;;  %v1667_v10 = vld [vmem:[%s2222_s1 + $0xa8] sm:$0xff] }
   0xf   : > { %v1677_v3 = vld [vmem:[%s2222_s1 + $0xf8] sm:$0xff]  ;;  %851 = vmatpush.bf16.msra.mxu2 %v1669_v2  ;;  %v1676_v7 = vld [vmem:[%s2222_s1 + $0xf0] sm:$0xff]  ;;  %v1675_v11 = vld [vmem:[%s2222_s1 + $0xe8] sm:$0xff] }
  0x10   : > { %870 = vmatpush.bf16.msra.mxu3 %v1677_v3  ;;  %v1650_v12 = vld [vmem:[%s2222_s1 + $0x20] sm:$0xff]  ;;  %v1649_v16 = vld [vmem:[%s2222_s1 + $0x18] sm:$0xff]  ;;  %v1648_v20 = vld [vmem:[%s2222_s1 + $0x10] sm:$0xff] }
  0x11   : > { %814 = vmatpush.bf16.msra.mxu0 %v1652_v4  ;;  %v1658_v13 = vld [vmem:[%s2222_s1 + $0x60] sm:$0xff]  ;;  %v1657_v17 = vld [vmem:[%s2222_s1 + $0x58] sm:$0xff]  ;;  %v1656_v21 = vld [vmem:[%s2222_s1 + $0x50] sm:$0xff] }
  0x12   : > { %833 = vmatpush.bf16.msra.mxu1 %v1660_v5  ;;  %v1666_v14 = vld [vmem:[%s2222_s1 + $0xa0] sm:$0xff]  ;;  %v1665_v18 = vld [vmem:[%s2222_s1 + $0x98] sm:$0xff]  ;;  %v1664_v22 = vld [vmem:[%s2222_s1 + $0x90] sm:$0xff] }
  0x13   : > { %852 = vmatpush.bf16.msra.mxu2 %v1668_v6  ;;  %v1674_v15 = vld [vmem:[%s2222_s1 + $0xe0] sm:$0xff]  ;;  %v1673_v19 = vld [vmem:[%s2222_s1 + $0xd8] sm:$0xff]  ;;  %v1672_v23 = vld [vmem:[%s2222_s1 + $0xd0] sm:$0xff] }
  0x14   : > { %871 = vmatpush.bf16.msra.mxu3 %v1676_v7  ;;  %v1647_v24 = vld [vmem:[%s2222_s1 + $0x8] sm:$0xff]  ;;  %v1646_v28 = vld [vmem:[%s2222_s1] sm:$0xff]  ;;  %v1701_v40 = vld [vmem:[%s2222_s1 + $0x1b8] sm:$0xff] }
  0x15   : > { %815 = vmatpush.bf16.msra.mxu0 %v1651_v8  ;;  %v1655_v25 = vld [vmem:[%s2222_s1 + $0x48] sm:$0xff]  ;;  %v1654_v29 = vld [vmem:[%s2222_s1 + $0x40] sm:$0xff]  ;;  %v1685_v41 = vld [vmem:[%s2222_s1 + $0x138] sm:$0xff] }
  0x16   : > { %834 = vmatpush.bf16.msra.mxu1 %v1659_v9  ;;  %v1663_v26 = vld [vmem:[%s2222_s1 + $0x88] sm:$0xff]  ;;  %v1662_v30 = vld [vmem:[%s2222_s1 + $0x80] sm:$0xff]  ;;  %v1693_v46 = vld [vmem:[%s2222_s1 + $0x178] sm:$0xff] }
  0x17   : > { %853 = vmatpush.bf16.msra.mxu2 %v1667_v10  ;;  %v1671_v27 = vld [vmem:[%s2222_s1 + $0xc8] sm:$0xff]  ;;  %v1670_v31 = vld [vmem:[%s2222_s1 + $0xc0] sm:$0xff]  ;;  %v1709_v47 = vld [vmem:[%s2222_s1 + $0x1f8] sm:$0xff] }
  0x18   : > { %872 = vmatpush.bf16.msra.mxu3 %v1675_v11  ;;  %v1306_v32 = vld [vmem:[%s2221_s0] sm:$0xf]  ;;  %v1630_v34 = vld [vmem:[%s2221_s0 + $0x4] sm:$0xf]  ;;  %v1314_v36 = vld [vmem:[%s2221_s0 + $0x8] sm:$0xf] }
  0x19   : > { %816 = vmatpush.bf16.msra.mxu0 %v1650_v12  ;;  %v1634_v33 = vld [vmem:[%s2221_s0 + $0x1c] sm:$0xf0]  ;;  %v1308_v35 = vld [vmem:[%s2221_s0 + $0x20] sm:$0xf0]  ;;  %v1635_v37 = vld [vmem:[%s2221_s0 + $0x24] sm:$0xf0] }
  0x1a   : > { %835 = vmatpush.bf16.msra.mxu1 %v1658_v13  ;;  %v1631_v38 = vld [vmem:[%s2221_s0 + $0xc] sm:$0xf]  ;;  %v1307_v42 = vor.u32 %v1634_v33, %v1306_v32  ;;  %v1311_v43 = vor.u32 %v1630_v34, %v1308_v35  ;;  %v1315_v44 = vor.u32 %v1635_v37, %v1314_v36  ;;  %v1700_v48 = vld [vmem:[%s2222_s1 + $0x1b0] sm:$0xff]  ;;  %v1698_v56 = vld [vmem:[%s2222_s1 + $0x1a0] sm:$0xff] }
  0x1b   : > { %854 = vmatpush.bf16.msra.mxu2 %v1666_v14  ;;  %v1316_v39 = vld [vmem:[%s2221_s0 + $0x28] sm:$0xf0]  ;;  %v1684_v49 = vld [vmem:[%s2222_s1 + $0x130] sm:$0xff]  ;;  %v1682_v57 = vld [vmem:[%s2222_s1 + $0x120] sm:$0xff] }
  0x1c   : > { %873 = vmatpush.bf16.msra.mxu3 %v1674_v15  ;;  %v1319_v45 = vor.u32 %v1631_v38, %v1316_v39  ;;  %v1692_v50 = vld [vmem:[%s2222_s1 + $0x170] sm:$0xff]  ;;  %v1699_v52 = vld [vmem:[%s2222_s1 + $0x1a8] sm:$0xff]  ;;  %v1690_v58 = vld [vmem:[%s2222_s1 + $0x160] sm:$0xff] }
  0x1d   : > { %817 = vmatpush.bf16.msra.mxu0 %v1649_v16  ;;  %v1708_v51 = vld [vmem:[%s2222_s1 + $0x1f0] sm:$0xff]  ;;  %v1683_v53 = vld [vmem:[%s2222_s1 + $0x128] sm:$0xff]  ;;  %v1706_v59 = vld [vmem:[%s2222_s1 + $0x1e0] sm:$0xff] }
  0x1e   : > { %836 = vmatpush.bf16.msra.mxu1 %v1657_v17  ;;  %v1691_v54 = vld [vmem:[%s2222_s1 + $0x168] sm:$0xff]  ;;  %v1338_v60 = vld [vmem:[%s2221_s0 + $0x40] sm:$0xf]  ;;  %v1638_v62 = vld [vmem:[%s2221_s0 + $0x44] sm:$0xf] }
  0x1f   : > { %855 = vmatpush.bf16.msra.mxu2 %v1665_v18  ;;  %v1707_v55 = vld [vmem:[%s2222_s1 + $0x1e8] sm:$0xff]  ;;  %v1642_v61 = vld [vmem:[%s2221_s0 + $0x5c] sm:$0xf0]  ;;  %v1340_v63 = vld [vmem:[%s2221_s0 + $0x60] sm:$0xf0] }
  0x20   : > { %874 = vmatpush.bf16.msra.mxu3 %v1673_v19  ;;  %v1346_v0 = vld [vmem:[%s2221_s0 + $0x48] sm:$0xf]  ;;  %v1639_v2 = vld [vmem:[%s2221_s0 + $0x4c] sm:$0xf]  ;;  %v1697_v4 = vld [vmem:[%s2222_s1 + $0x198] sm:$0xff]  ;;  %v1339_v6 = vor.u32 %v1642_v61, %v1338_v60  ;;  %v1343_v7 = vor.u32 %v1638_v62, %v1340_v63 }
  0x21   : > { %818 = vmatpush.bf16.msra.mxu0 %v1648_v20  ;;  %v1643_v1 = vld [vmem:[%s2221_s0 + $0x64] sm:$0xf0]  ;;  %v1348_v3 = vld [vmem:[%s2221_s0 + $0x68] sm:$0xf0]  ;;  %v1681_v5 = vld [vmem:[%s2222_s1 + $0x118] sm:$0xff] }
  0x22   : > { %837 = vmatpush.bf16.msra.mxu1 %v1656_v21  ;;  %v1347_v8 = vor.u32 %v1643_v1, %v1346_v0  ;;  %v1351_v9 = vor.u32 %v1639_v2, %v1348_v3  ;;  %v1689_v10 = vld [vmem:[%s2222_s1 + $0x158] sm:$0xff]  ;;  %v1696_v12 = vld [vmem:[%s2222_s1 + $0x190] sm:$0xff]  ;;  %v1695_v16 = vld [vmem:[%s2222_s1 + $0x188] sm:$0xff] }
  0x23   : > { %856 = vmatpush.bf16.msra.mxu2 %v1664_v22  ;;  %v1705_v11 = vld [vmem:[%s2222_s1 + $0x1d8] sm:$0xff]  ;;  %v1680_v13 = vld [vmem:[%s2222_s1 + $0x110] sm:$0xff]  ;;  %v1679_v17 = vld [vmem:[%s2222_s1 + $0x108] sm:$0xff] }
  0x24   : > { %875 = vmatpush.bf16.msra.mxu3 %v1672_v23  ;;  %v1688_v14 = vld [vmem:[%s2222_s1 + $0x150] sm:$0xff]  ;;  %v1687_v18 = vld [vmem:[%s2222_s1 + $0x148] sm:$0xff]  ;;  %v1694_v20 = vld [vmem:[%s2222_s1 + $0x180] sm:$0xff] }
  0x25   : > { %819 = vmatpush.bf16.msra.mxu0 %v1647_v24  ;;  %v1704_v15 = vld [vmem:[%s2222_s1 + $0x1d0] sm:$0xff]  ;;  %v1703_v19 = vld [vmem:[%s2222_s1 + $0x1c8] sm:$0xff]  ;;  %v1678_v21 = vld [vmem:[%s2222_s1 + $0x100] sm:$0xff] }
  0x26   : > { %838 = vmatpush.bf16.msra.mxu1 %v1655_v25  ;;  %v1686_v22 = vld [vmem:[%s2222_s1 + $0x140] sm:$0xff]  ;;  %v1322_v24 = vld [vmem:[%s2221_s0 + $0x10] sm:$0xf]  ;;  %v1640_v38 = vld [vmem:[%s2221_s0 + $0x54] sm:$0xf] }
  0x27   : > { %857 = vmatpush.bf16.msra.mxu2 %v1663_v26  ;;  %v1702_v23 = vld [vmem:[%s2222_s1 + $0x1c0] sm:$0xff]  ;;  %v1636_v25 = vld [vmem:[%s2221_s0 + $0x2c] sm:$0xf0]  ;;  %v1632_v26 = vld [vmem:[%s2221_s0 + $0x14] sm:$0xf] }
  0x28   : > { %876 = vmatpush.bf16.msra.mxu3 %v1671_v27  ;;  %v1324_v27 = vld [vmem:[%s2221_s0 + $0x30] sm:$0xf0]  ;;  %v1323_v32 = vor.u32 %v1636_v25, %v1322_v24  ;;  %v1354_v36 = vld [vmem:[%s2221_s0 + $0x50] sm:$0xf] }
  0x29   : > { %820 = vmatpush.bf16.msra.mxu0 %v1646_v28  ;;  %v1330_v28 = vld [vmem:[%s2221_s0 + $0x18] sm:$0xf]  ;;  %v1327_v33 = vor.u32 %v1632_v26, %v1324_v27  ;;  %v1644_v37 = vld [vmem:[%s2221_s0 + $0x6c] sm:$0xf0]  ;;  %v1356_v39 = vld [vmem:[%s2221_s0 + $0x70] sm:$0xf0] }
  0x2a   : > { %839 = vmatpush.bf16.msra.mxu1 %v1654_v29  ;;  %v1637_v29 = vld [vmem:[%s2221_s0 + $0x34] sm:$0xf0] }
  0x2b   : > { %858 = vmatpush.bf16.msra.mxu2 %v1662_v30  ;;  %v1633_v30 = vld [vmem:[%s2221_s0 + $0x1c] sm:$0xf]  ;;  %v1331_v34 = vor.u32 %v1637_v29, %v1330_v28 }
  0x2c   : > { %877 = vmatpush.bf16.msra.mxu3 %v1670_v31  ;;  %821 = vmatmul.bf16.vlgmr.msra.gmra.mxu0 %v1307_v42  ;;  %v1332_v31 = vld [vmem:[%s2221_s0 + $0x38] sm:$0xf0] }
  0x2d   : > { %889 = vmatpush.bf16.msrb.mxu0 %v1685_v41  ;;  %840 = vmatmul.bf16.vlgmr.msra.gmra.mxu1 %v1311_v43  ;;  %v1335_v35 = vor.u32 %v1633_v30, %v1332_v31  ;;  %v1645_v41 = vld [vmem:[%s2221_s0 + $0x74] sm:$0xf0]  ;;  %v1641_v42 = vld [vmem:[%s2221_s0 + $0x5c] sm:$0xf] }
  0x2e   : > { %859 = vmatmul.bf16.vlgmr.msra.gmra.mxu2 %v1315_v44  ;;  %908 = vmatpush.bf16.msrb.mxu1 %v1693_v46  ;;  %v1364_v43 = vld [vmem:[%s2221_s0 + $0x78] sm:$0xf0]  ;;  %v1355_v44 = vor.u32 %v1644_v37, %v1354_v36 }
  0x2f   : > { %927 = vmatpush.bf16.msrb.mxu2 %v1701_v40  ;;  %878 = vmatmul.bf16.vlgmr.msra.gmra.mxu3 %v1319_v45  ;;  %v1362_v40 = vld [vmem:[%s2221_s0 + $0x58] sm:$0xf]  ;;  %v1359_v45 = vor.u32 %v1640_v38, %v1356_v39 }
  0x30   : > { %946 = vmatpush.bf16.msrb.mxu3 %v1709_v47  ;;  %v1363_v46 = vor.u32 %v1645_v41, %v1362_v40  ;;  %v1367_v47 = vor.u32 %v1641_v42, %v1364_v43 }
  0x31   : > { %890 = vmatpush.bf16.msrb.mxu0 %v1684_v49 }
  0x32   : > { %909 = vmatpush.bf16.msrb.mxu1 %v1692_v50 }
  0x33   : > { %928 = vmatpush.bf16.msrb.mxu2 %v1700_v48 }
  0x34   : > { %947 = vmatpush.bf16.msrb.mxu3 %v1708_v51 }
  0x35   : > { %891 = vmatpush.bf16.msrb.mxu0 %v1683_v53 }
  0x36   : > { %910 = vmatpush.bf16.msrb.mxu1 %v1691_v54 }
  0x37   : > { %929 = vmatpush.bf16.msrb.mxu2 %v1699_v52 }
  0x38   : > { %948 = vmatpush.bf16.msrb.mxu3 %v1707_v55 }
  0x39   : > { %892 = vmatpush.bf16.msrb.mxu0 %v1682_v57 }
  0x3a   : > { %911 = vmatpush.bf16.msrb.mxu1 %v1690_v58 }
  0x3b   : > { %930 = vmatpush.bf16.msrb.mxu2 %v1698_v56 }
  0x3c   : > { %949 = vmatpush.bf16.msrb.mxu3 %v1706_v59  ;;  %826 = vmatmul.bf16.gmra.mxu0 %v1339_v6 }
  0x3d   : > { %893 = vmatpush.bf16.msrb.mxu0 %v1681_v5  ;;  %845 = vmatmul.bf16.gmra.mxu1 %v1343_v7 }
  0x3e   : > { %864 = vmatmul.bf16.gmra.mxu2 %v1347_v8  ;;  %912 = vmatpush.bf16.msrb.mxu1 %v1689_v10 }
  0x3f   : > { %931 = vmatpush.bf16.msrb.mxu2 %v1697_v4  ;;  %883 = vmatmul.bf16.gmra.mxu3 %v1351_v9 }
  0x40   : > { %950 = vmatpush.bf16.msrb.mxu3 %v1705_v11 }
  0x41   : > { %894 = vmatpush.bf16.msrb.mxu0 %v1680_v13 }
  0x42   : > { %913 = vmatpush.bf16.msrb.mxu1 %v1688_v14 }
  0x43   : > { %932 = vmatpush.bf16.msrb.mxu2 %v1696_v12 }
  0x44   : > { %951 = vmatpush.bf16.msrb.mxu3 %v1704_v15 }
  0x45   : > { %895 = vmatpush.bf16.msrb.mxu0 %v1679_v17 }
  0x46   : > { %914 = vmatpush.bf16.msrb.mxu1 %v1687_v18 }
  0x47   : > { %933 = vmatpush.bf16.msrb.mxu2 %v1695_v16 }
  0x48   : > { %952 = vmatpush.bf16.msrb.mxu3 %v1703_v19 }
  0x49   : > { %896 = vmatpush.bf16.msrb.mxu0 %v1678_v21 }
  0x4a   : > { %915 = vmatpush.bf16.msrb.mxu1 %v1686_v22 }
  0x4b   : > { %934 = vmatpush.bf16.msrb.mxu2 %v1694_v20 }
  0x4c   : > { %953 = vmatpush.bf16.msrb.mxu3 %v1702_v23  ;;  %897 = vmatmul.bf16.vlgmr.msrb.gmra.mxu0 %v1323_v32 }
  0x4d   : > { %916 = vmatmul.bf16.vlgmr.msrb.gmra.mxu1 %v1327_v33 }
  0x4e   : > { %935 = vmatmul.bf16.vlgmr.msrb.gmra.mxu2 %v1331_v34 }
  0x4f   : > { %954 = vmatmul.bf16.vlgmr.msrb.gmra.mxu3 %v1335_v35 }
  0x5c   : > { %902 = vmatmul.bf16.gmra.mxu0 %v1355_v44  ;;  %v1772_v44 = vmov (%p965_p4), 0.0  }
  0x5d   : > { %921 = vmatmul.bf16.gmra.mxu1 %v1359_v45  ;;  %972 = vst.msk [vmem:[#allocation2] sm:$0xff] (%p965_p4), %vm971_vm0, %v1772_v44 }
  0x5e   : > { %940 = vmatmul.bf16.gmra.mxu2 %v1363_v46  ;;  %973 = vst.msk [vmem:[#allocation2 + $0x8] sm:$0xff] (%p965_p4), %vm971_vm0, %v1772_v44 }
  0x5f   : > { %959 = vmatmul.bf16.gmra.mxu3 %v1367_v47  ;;  %974 = vst.msk [vmem:[#allocation2 + $0x10] sm:$0xff] (%p965_p4), %vm971_vm0, %v1772_v44 }
  0x60   : > { %975 = vst.msk [vmem:[#allocation2 + $0x18] sm:$0xff] (%p965_p4), %vm971_vm0, %v1772_v44 }
  0x61   : > { %976 = vst.msk [vmem:[#allocation3] sm:$0xff] (%p965_p4), %vm971_vm0, %v1772_v44 }
  0x62   : > { %977 = vst.msk [vmem:[#allocation3 + $0x8] sm:$0xff] (%p965_p4), %vm971_vm0, %v1772_v44 }
  0x63   : > { %978 = vst.msk [vmem:[#allocation3 + $0x10] sm:$0xff] (%p965_p4), %vm971_vm0, %v1772_v44 }
  0x64   : > { %979 = vst.msk [vmem:[#allocation3 + $0x18] sm:$0xff] (%p965_p4), %vm971_vm0, %v1772_v44 }
  0xa9   : > { %v822_v48 = vpop.f32.mrf.mxu0 }
  0xaa   : > { %v841_v49 = vpop.f32.mrf.mxu1 }
  0xab   : > { %v842_v62 = vadd.f32 %v841_v49, %v822_v48 }
  0xb1   : > { %v860_v50 = vpop.f32.mrf.mxu2  ;;  %v824_v52 = vpop.f32.mrf.mxu0 }
  0xb2   : > { %v879_v51 = vpop.f32.mrf.mxu3  ;;  %v843_v53 = vpop.f32.mrf.mxu1  ;;  %v861_v63 = vadd.f32 %v860_v50, %v842_v62 }
  0xb3   : > { %v844_v5 = vadd.f32 %v843_v53, %v824_v52 }
  0xb4   : > { %v880_v2 = vadd.f32 %v879_v51, %v861_v63 }
  0xb9   : > { %v862_v54 = vpop.f32.mrf.mxu2  ;;  %v827_v56 = vpop.f32.mrf.mxu0 }
  0xba   : > { %v881_v55 = vpop.f32.mrf.mxu3  ;;  %v846_v57 = vpop.f32.mrf.mxu1  ;;  %v863_v7 = vadd.f32 %v862_v54, %v844_v5 }
  0xbb   : > { %v847_v15 = vadd.f32 %v846_v57, %v827_v56 }
  0xbc   : > { %v882_v10 = vadd.f32 %v881_v55, %v863_v7 }
  0xc1   : > { %v865_v58 = vpop.f32.mrf.mxu2  ;;  %v829_v60 = vpop.f32.mrf.mxu0 }
  0xc2   : > { %v884_v59 = vpop.f32.mrf.mxu3  ;;  %v848_v61 = vpop.f32.mrf.mxu1  ;;  %v866_v18 = vadd.f32 %v865_v58, %v847_v15 }
  0xc3   : > { %v849_v25 = vadd.f32 %v848_v61, %v829_v60 }
  0xc4   : > { %v885_v21 = vadd.f32 %v884_v59, %v866_v18 }
  0xc9   : > { %v867_v0 = vpop.f32.mrf.mxu2  ;;  %v898_v3 = vpop.f32.mrf.mxu0 }
  0xca   : > { %v886_v1 = vpop.f32.mrf.mxu3  ;;  %v917_v4 = vpop.f32.mrf.mxu1  ;;  %v899_v6 = vadd.f32 %v898_v3, %v880_v2  ;;  %v868_v29 = vadd.f32 %v867_v0, %v849_v25 }
  0xcc   : > { %v918_v8 = vadd.f32 %v917_v4, %v899_v6  ;;  %v887_v32 = vadd.f32 %v886_v1, %v868_v29 }
  0xd1   : > { %v936_v9 = vpop.f32.mrf.mxu2  ;;  %v900_v13 = vpop.f32.mrf.mxu0 }
  0xd2   : > { %v937_v11 = vadd.f32 %v936_v9, %v918_v8  ;;  %v955_v12 = vpop.f32.mrf.mxu3  ;;  %v919_v14 = vpop.f32.mrf.mxu1  ;;  %v901_v17 = vadd.f32 %v900_v13, %v882_v10 }
  0xd4   : > { %v2108_v16 = vadd.f32 %v955_v12, %v937_v11  ;;  %v920_v19 = vadd.f32 %v919_v14, %v901_v17 }
  0xd9   : > { %v938_v20 = vpop.f32.mrf.mxu2  ;;  %v903_v24 = vpop.f32.mrf.mxu0 }
  0xda   : > { %v939_v22 = vadd.f32 %v938_v20, %v920_v19  ;;  %v957_v23 = vpop.f32.mrf.mxu3  ;;  %v904_v27 = vadd.f32 %v903_v24, %v885_v21  ;;  %v922_v28 = vpop.f32.mrf.mxu1 }
  0xdc   : > { %v2110_v26 = vadd.f32 %v957_v23, %v939_v22  ;;  %v923_v30 = vadd.f32 %v922_v28, %v904_v27 }
  0xe1   : > { %v941_v31 = vpop.f32.mrf.mxu2  ;;  %v905_v35 = vpop.f32.mrf.mxu0 }
  0xe2   : > { %v942_v33 = vadd.f32 %v941_v31, %v923_v30  ;;  %v960_v34 = vpop.f32.mrf.mxu3  ;;  %v906_v37 = vadd.f32 %v905_v35, %v887_v32  ;;  %v924_v38 = vpop.f32.mrf.mxu1 }
  0xe4   : > { %v2112_v36 = vadd.f32 %v960_v34, %v942_v33  ;;  %v925_v39 = vadd.f32 %v924_v38, %v906_v37 }
  0xe8   : > { %970 = sbr.rel (!%p965_p4) target bundleno = 237 (0xed), region = 40 }
  0xe9   : > { %v943_v40 = vpop.f32.mrf.mxu2 }
  0xea   : > { %v944_v41 = vadd.f32 %v943_v40, %v925_v39  ;;  %v962_v42 = vpop.f32.mrf.mxu3 }
  0xec   : > { %v2114_v43 = vadd.f32 %v962_v42, %v944_v41 }
  0xed PF: > { %p1625_p5 = scmp.ne.s32.totalorder %s1762_s15, 0 }
  0xef   : > { %982 = sbr.rel (%p1625_p5) target bundleno = 382 (0x17e), region = 44 }
  0xf4   : > { %vm987_vm1 = vcmask 130048   ;;  %v1013_v45 = vmul.f32 %v2108_v16, %v2108_v16  ;;  %v1014_v49 = vmul.f32 %v2110_v26, %v2110_v26  ;;  %v1016_v53 = vmul.f32 %v2114_v43, %v2114_v43  ;;  %v985_v57 = vld [vmem:[#allocation2 + $0x10] sm:$0xff]  ;;  %v983_v58 = vld [vmem:[#allocation2] sm:$0xff]  ;;  %v986_v2 = vld [vmem:[#allocation2 + $0x18] sm:$0xff] }
  0xf5   : > { %v994_v46 = vsel %vm987_vm1, %v2112_v36, 0.0  ;;  %1037 = vst.msk [vmem:[%s2225_s4] sm:$0xff] %vm987_vm1, %v2108_v16  ;;  %v988_v47 = vsel %vm987_vm1, %v2108_v16, 0.0  ;;  %v997_v50 = vsel %vm987_vm1, %v2114_v43, 0.0  ;;  %v991_v51 = vsel %vm987_vm1, %v2110_v26, 0.0  ;;  %v1009_v59 = vld [vmem:[#allocation3] sm:$0xff] }
  0xf6   : > { %1038 = vst.msk [vmem:[%s2225_s4 + $0x8] sm:$0xff] %vm987_vm1, %v2110_v26  ;;  %995 = vadd.xlane.f32.xlu1 %v994_v46  ;;  %989 = vadd.xlane.f32.xlu0 %v988_v47  ;;  %v1017_v48 = vsel %vm987_vm1, %v1013_v45, 0.0  ;;  %v1020_v52 = vsel %vm987_vm1, %v1014_v49, 0.0  ;;  %v1015_v54 = vmul.f32 %v2112_v36, %v2112_v36  ;;  %v1026_v55 = vsel %vm987_vm1, %v1016_v53, 0.0  ;;  %v984_v3 = vld [vmem:[#allocation2 + $0x8] sm:$0xff]  ;;  %v1012_v11 = vld [vmem:[#allocation3 + $0x18] sm:$0xff] }
  0xf7   : > { %1039 = vst.msk [vmem:[%s2225_s4 + $0x10] sm:$0xff] %vm987_vm1, %v2112_v36  ;;  %1018 = vadd.xlane.f32.xlu2 %v1017_v48  ;;  %vm1004_vm2 = vcmask 7168   ;;  %v1010_v4 = vld [vmem:[#allocation3 + $0x8] sm:$0xff]  ;;  %v1011_v12 = vld [vmem:[#allocation3 + $0x10] sm:$0xff] }
  0xf8   : > { %1040 = vst.msk [vmem:[%s2225_s4 + $0x18] sm:$0xff] %vm987_vm1, %v2114_v43  ;;  %v1023_v56 = vsel %vm987_vm1, %v1015_v54, 0.0 }
  0xfe   : > { %998 = vadd.xlane.f32.xlu1 %v997_v50  ;;  %992 = vadd.xlane.f32.xlu0 %v991_v51 }
  0xff   : > { %1021 = vadd.xlane.f32.xlu2 %v1020_v52 }
 0x106   : > { %1027 = vadd.xlane.f32.xlu1 %v1026_v55  ;;  %1024 = vadd.xlane.f32.xlu0 %v1023_v56 }
 0x169   : > { %v996_v60 = vpop.xlane.xlu1 %995  ;;  %v990_v61 = vpop.xlane.xlu0 %989 }
 0x16a   : > { %v1002_v62 = vadd.f32 %v996_v60, %v985_v57  ;;  %v1000_v63 = vadd.f32 %v990_v61, %v983_v58  ;;  %v1019_v0 = vpop.xlane.xlu2 %1018 }
 0x16b   : > { %v1029_v1 = vadd.f32 %v1019_v0, %v1009_v59 }
 0x16c   : > { %1007 = vst.msk [vmem:[#allocation2 + $0x10] sm:$0xff] %vm1004_vm2, %v1002_v62 }
 0x16d   : > { %1005 = vst.msk [vmem:[#allocation2] sm:$0xff] %vm1004_vm2, %v1000_v63 }
 0x16e   : > { %1033 = vst.msk [vmem:[#allocation3] sm:$0xff] %vm1004_vm2, %v1029_v1 }
 0x171   : > { %v999_v5 = vpop.xlane.xlu1 %998  ;;  %v993_v6 = vpop.xlane.xlu0 %992 }
 0x172   : > { %v1003_v7 = vadd.f32 %v999_v5, %v986_v2  ;;  %v1001_v8 = vadd.f32 %v993_v6, %v984_v3  ;;  %v1022_v9 = vpop.xlane.xlu2 %1021 }
 0x173   : > { %v1030_v10 = vadd.f32 %v1022_v9, %v1010_v4 }
 0x174   : > { %1008 = vst.msk [vmem:[#allocation2 + $0x18] sm:$0xff] %vm1004_vm2, %v1003_v7 }
 0x175   : > { %1006 = vst.msk [vmem:[#allocation2 + $0x8] sm:$0xff] %vm1004_vm2, %v1001_v8 }
 0x176   : > { %1034 = vst.msk [vmem:[#allocation3 + $0x8] sm:$0xff] %vm1004_vm2, %v1030_v10 }
 0x179   : > { %v1028_v13 = vpop.xlane.xlu1 %1027  ;;  %v1025_v14 = vpop.xlane.xlu0 %1024 }
 0x17a   : > { %v1032_v15 = vadd.f32 %v1028_v13, %v1012_v11  ;;  %v1031_v17 = vadd.f32 %v1025_v14, %v1011_v12 }
 0x17c   : > { %1036 = vst.msk [vmem:[#allocation3 + $0x18] sm:$0xff] %vm1004_vm2, %v1032_v15 }
 0x17d   : > { %1035 = vst.msk [vmem:[#allocation3 + $0x10] sm:$0xff] %vm1004_vm2, %v1031_v17 }
 0x17e PF: > { %p1626_p6 = scmp.ne.s32.totalorder %s1762_s15, 1 }
 0x180   : > { %1044 = sbr.rel (%p1626_p6) target bundleno = 555 (0x22b), region = 48 }
 0x185   : > { %v1047_v18 = vld [vmem:[#allocation2 + $0x10] sm:$0xff]  ;;  %v1045_v20 = vld [vmem:[#allocation2] sm:$0xff]  ;;  %v1773_v21 = vmov 0   ;;  %v1048_v27 = vld [vmem:[#allocation2 + $0x18] sm:$0xff]  ;;  %vm1233_vm15 = vcmask 130048  }
 0x186   : > { %v1055_v19 = vld [vmem:[#allocation3 + $0x10] sm:$0xff]  ;;  %1738 = vset.pattern.permute.xlu1 %v1773_v21  ;;  %1737 = vset.pattern.permute.xlu0 %v1773_v21  ;;  %v1051_v22 = vmul.f32 0.0625, %v1047_v18  ;;  %v1049_v24 = vmul.f32 0.0625, %v1045_v20  ;;  %v1053_v25 = vld [vmem:[#allocation3] sm:$0xff]  ;;  %v1056_v28 = vld [vmem:[#allocation3 + $0x18] sm:$0xff]  ;;  %v1052_v30 = vmul.f32 0.0625, %v1048_v27 }
 0x187   : > { %v1059_v23 = vmul.f32 0.0625, %v1055_v19  ;;  %v1057_v29 = vmul.f32 0.0625, %v1053_v25  ;;  %v1060_v31 = vmul.f32 0.0625, %v1056_v28  ;;  %v1046_v32 = vld [vmem:[#allocation2 + $0x8] sm:$0xff]  ;;  %1739 = vset.pattern.permute.xlu2 %v1773_v21  ;;  %v1165_v34 = vld [vmem:[%s2223_s2] sm:$0xff]  ;;  %v1168_v53 = vld [vmem:[%s2223_s2 + $0x18] sm:$0xff] }
 0x188   : > { %v1054_v33 = vld [vmem:[#allocation3 + $0x8] sm:$0xff]  ;;  %1085 = vperm.xlu1 %1738, %v1051_v22   ;;  %v1063_v35 = vmul.f32 %v1051_v22, %v1051_v22  ;;  %1075 = vperm.xlu0 %1737, %v1049_v24   ;;  %v1061_v37 = vmul.f32 %v1049_v24, %v1049_v24  ;;  %v1050_v38 = vmul.f32 0.0625, %v1046_v32  ;;  %v1064_v40 = vmul.f32 %v1052_v30, %v1052_v30  ;;  %v1167_v56 = vld [vmem:[%s2223_s2 + $0x10] sm:$0xff]  ;;  %v1193_v22 = vld [vmem:[%s2224_s3] sm:$0xff] }
 0x189   : > { %v1058_v39 = vmul.f32 0.0625, %v1054_v33  ;;  %1171 = vperm.xlu2 %1739, %v1165_v34   ;;  %v1166_v57 = vld [vmem:[%s2223_s2 + $0x8] sm:$0xff]  ;;  %v1196_v25 = vld [vmem:[%s2224_s3 + $0x18] sm:$0xff]  ;;  %v1195_v27 = vld [vmem:[%s2224_s3 + $0x10] sm:$0xff] }
 0x18a   : > { %v1067_v41 = vsub.f32 %v1059_v23, %v1063_v35  ;;  %v1065_v42 = vsub.f32 %v1057_v29, %v1061_v37  ;;  %v1062_v44 = vmul.f32 %v1050_v38, %v1050_v38  ;;  %v1068_v45 = vsub.f32 %v1060_v31, %v1064_v40  ;;  %v1194_v24 = vld [vmem:[%s2224_s3 + $0x8] sm:$0xff] }
 0x18c   : > { %v1071_v46 = vmax.f32 %v1067_v41, 0.0  ;;  %v1069_v47 = vmax.f32 %v1065_v42, 0.0  ;;  %v1066_v48 = vsub.f32 %v1058_v39, %v1062_v44  ;;  %v1072_v49 = vmax.f32 %v1068_v45, 0.0 }
 0x18e   : > { %v1099_v50 = vadd.f32 1e-05, %v1071_v46  ;;  %v1097_v51 = vadd.f32 1e-05, %v1069_v47  ;;  %v1070_v52 = vmax.f32 %v1066_v48, 0.0 }
 0x18f   : > { %v1100_v54 = vadd.f32 1e-05, %v1072_v49 }
 0x190   : > { %1740 = vrsqrt.f32 %v1099_v50  ;;  %1090 = vperm.xlu1 %1738, %v1052_v30   ;;  %v1098_v55 = vadd.f32 1e-05, %v1070_v52  ;;  %1080 = vperm.xlu0 %1737, %v1050_v38   ;;  %vm1127_vm3 = vweird.f32 %v1099_v50  ;;  %vm1107_vm5 = vweird.f32 %v1097_v51 }
 0x191   : > { %1742 = vrsqrt.f32 %v1097_v51  ;;  %1186 = vperm.xlu2 %1739, %v1168_v53   ;;  %vm1137_vm7 = vweird.f32 %v1100_v54 }
 0x192   : > { %1744 = vrsqrt.f32 %v1100_v54  ;;  %vm1117_vm12 = vweird.f32 %v1098_v55 }
 0x193   : > { %1746 = vrsqrt.f32 %v1098_v55 }
 0x196   : > { %v1741_v58 = vpop.eup %1740 }
 0x197   : > { %v1743_v59 = vpop.eup %1742  ;;  %v1122_v60 = vmul.f32 %v1741_v58, %v1099_v50  ;;  %vm1128_vm4 = vweird.f32 %v1741_v58 }
 0x198   : > { %v1745_v61 = vpop.eup %1744  ;;  %v1102_v62 = vmul.f32 %v1743_v59, %v1097_v51  ;;  %1181 = vperm.xlu1 %1738, %v1167_v56   ;;  %1176 = vperm.xlu0 %1737, %v1166_v57   ;;  %vm1108_vm6 = vweird.f32 %v1743_v59  ;;  %vm1129_vm9 = vmor %vm1127_vm3, %vm1128_vm4 }
 0x199   : > { %v1747_v63 = vpop.eup %1746  ;;  %v1132_v0 = vmul.f32 %v1745_v61, %v1100_v54  ;;  %v1123_v1 = vmul.f32 %v1741_v58, %v1122_v60  ;;  %vm1138_vm8 = vweird.f32 %v1745_v61  ;;  %vm1109_vm10 = vmor %vm1107_vm5, %vm1108_vm6 }
 0x19a   : > { %v1103_v2 = vmul.f32 %v1743_v59, %v1102_v62  ;;  %v1112_v3 = vmul.f32 %v1747_v63, %v1098_v55  ;;  %vm1139_vm11 = vmor %vm1137_vm7, %vm1138_vm8  ;;  %vm1118_vm13 = vweird.f32 %v1747_v63 }
 0x19b   : > { %v1133_v4 = vmul.f32 %v1745_v61, %v1132_v0  ;;  %v1124_v5 = vmul.f32 0.5, %v1123_v1  ;;  %vm1119_vm14 = vmor %vm1117_vm12, %vm1118_vm13 }
 0x19c   : > { %v1104_v6 = vmul.f32 0.5, %v1103_v2  ;;  %v1113_v7 = vmul.f32 %v1747_v63, %v1112_v3 }
 0x19d   : > { %v1134_v8 = vmul.f32 0.5, %v1133_v4  ;;  %v1125_v9 = vsub.f32 1.5, %v1124_v5 }
 0x19e   : > { %v1105_v10 = vsub.f32 1.5, %v1104_v6  ;;  %v1114_v11 = vmul.f32 0.5, %v1113_v7 }
 0x19f   : > { %v1135_v12 = vsub.f32 1.5, %v1134_v8  ;;  %v1126_v13 = vmul.f32 %v1741_v58, %v1125_v9 }
 0x1a0   : > { %v1106_v14 = vmul.f32 %v1743_v59, %v1105_v10  ;;  %v1115_v15 = vsub.f32 1.5, %v1114_v11 }
 0x1a1   : > { %v1136_v17 = vmul.f32 %v1745_v61, %v1135_v12  ;;  %v1130_v18 = vsel %vm1129_vm9, %v1741_v58, %v1126_v13 }
 0x1a2   : > { %1153 = vperm.xlu0 %1737, %v1130_v18   ;;  %v1110_v19 = vsel %vm1109_vm10, %v1743_v59, %v1106_v14  ;;  %v1116_v21 = vmul.f32 %v1747_v63, %v1115_v15 }
 0x1a3   : > { %v1140_v20 = vsel %vm1139_vm11, %v1745_v61, %v1136_v17  ;;  %1143 = vperm.xlu2 %1739, %v1110_v19  }
 0x1a4   : > { %1158 = vperm.xlu1 %1738, %v1140_v20   ;;  %v1120_v23 = vsel %vm1119_vm14, %v1747_v63, %v1116_v21 }
 0x1aa   : > { %1199 = vperm.xlu0 %1737, %v1193_v22  }
 0x1ab   : > { %1148 = vperm.xlu2 %1739, %v1120_v23  }
 0x1ac   : > { %1204 = vperm.xlu1 %1738, %v1194_v24  }
 0x1b2   : > { %1214 = vperm.xlu0 %1737, %v1196_v25  }
 0x1b3   : > { %1209 = vperm.xlu2 %1739, %v1195_v27  }
 0x1e3   : > { %v1172_v28 = vpop.permute.xlu2 %1171 }
 0x1eb   : > { %v1187_v29 = vpop.permute.xlu2 %1186 }
 0x1fa   : > { %v1086_v30 = vpop.permute.xlu1 %1085  ;;  %v1076_v31 = vpop.permute.xlu0 %1075 }
 0x1fb   : > { %v1095_v39 = vsub.f32 %v2112_v36, %v1086_v30  ;;  %v1093_v40 = vsub.f32 %v2108_v16, %v1076_v31 }
 0x1fd   : > { %v1144_v33 = vpop.permute.xlu2 %1143 }
 0x1fe   : > { %v1161_v45 = vmul.f32 %v1144_v33, %v1093_v40 }
 0x200   : > { %v1189_v52 = vmul.f32 %v1172_v28, %v1161_v45 }
 0x202   : > { %v1081_v32 = vpop.permute.xlu0 %1080  ;;  %v1091_v34 = vpop.permute.xlu1 %1090 }
 0x203   : > { %v1094_v46 = vsub.f32 %v2110_v26, %v1081_v32  ;;  %v1096_v54 = vsub.f32 %v2114_v43, %v1091_v34 }
 0x205   : > { %v1149_v37 = vpop.permute.xlu2 %1148 }
 0x206   : > { %v1162_v50 = vmul.f32 %v1149_v37, %v1094_v46 }
 0x20a   : > { %v1177_v35 = vpop.permute.xlu0 %1176  ;;  %v1182_v38 = vpop.permute.xlu1 %1181 }
 0x20b   : > { %v1190_v36 = vmul.f32 %v1177_v35, %v1162_v50 }
 0x20d   : > { %v1210_v48 = vpop.permute.xlu2 %1209 }
 0x214   : > { %v1154_v41 = vpop.permute.xlu0 %1153 }
 0x215   : > { %v1163_v42 = vmul.f32 %v1154_v41, %v1095_v39 }
 0x216   : > { %v1159_v44 = vpop.permute.xlu1 %1158 }
 0x217   : > { %v1191_v47 = vmul.f32 %v1182_v38, %v1163_v42  ;;  %v1164_v56 = vmul.f32 %v1159_v44, %v1096_v54 }
 0x219   : > { %v1219_v49 = vadd.f32 %v1210_v48, %v1191_v47  ;;  %v1192_v61 = vmul.f32 %v1187_v29, %v1164_v56 }
 0x21b   : > { %vm1223_vm0 = vcmp.ge.f32.partialorder %v1219_v49, 0.0  ;;  %v1227_v51 = vmul.f32 0.2, %v1219_v49 }
 0x21c   : > { %v1200_v53 = vpop.permute.xlu0 %1199 }
 0x21d   : > { %v1231_v55 = vsel %vm1223_vm0, %v1219_v49, %v1227_v51  ;;  %v1217_v16 = vadd.f32 %v1200_v53, %v1189_v52 }
 0x21e   : > { %1236 = vst.msk [vmem:[%s2225_s4 + $0x10] sm:$0xff] %vm1233_vm15, %v1231_v55  ;;  %v1205_v26 = vpop.permute.xlu1 %1204 }
 0x21f   : > { %v1218_v57 = vadd.f32 %v1205_v26, %v1190_v36  ;;  %vm1221_vm1 = vcmp.ge.f32.partialorder %v1217_v16, 0.0  ;;  %v1225_v58 = vmul.f32 0.2, %v1217_v16 }
 0x221   : > { %vm1222_vm2 = vcmp.ge.f32.partialorder %v1218_v57, 0.0  ;;  %v1226_v59 = vmul.f32 0.2, %v1218_v57  ;;  %v1229_v60 = vsel %vm1221_vm1, %v1217_v16, %v1225_v58 }
 0x222   : > { %1234 = vst.msk [vmem:[%s2225_s4] sm:$0xff] %vm1233_vm15, %v1229_v60 }
 0x223   : > { %v1230_v43 = vsel %vm1222_vm2, %v1218_v57, %v1226_v59 }
 0x224   : > { %1235 = vst.msk [vmem:[%s2225_s4 + $0x8] sm:$0xff] %vm1233_vm15, %v1230_v43  ;;  %v1215_v62 = vpop.permute.xlu0 %1214 }
 0x225   : > { %v1220_v63 = vadd.f32 %v1215_v62, %v1192_v61 }
 0x227   : > { %vm1224_vm3 = vcmp.ge.f32.partialorder %v1220_v63, 0.0  ;;  %v1228_v0 = vmul.f32 0.2, %v1220_v63 }
 0x229   : > { %v1232_v1 = vsel %vm1224_vm3, %v1220_v63, %v1228_v0 }
 0x22a   : > { %1237 = vst.msk [vmem:[%s2225_s4 + $0x18] sm:$0xff] %vm1233_vm15, %v1232_v1 }
 0x22b PF: > { %s14_s17 = sadd.s32 1, %s1770_s17   ;;  %s2226_s15 = smov %s1766_s16 }
 0x22c   : > { %p11_p7 = scmp.ge.s32.totalorder %s14_s17, 4   ;;  %s2227_s16 = smov %s2229_s18 }
 0x22e   :  { %13 = sbr.rel (!%p11_p7) target bundleno = 2 (0x2), region = 78 }

// kernel: discriminator_forward.9
= control target key start
LH: loop header
LB: loop body
LE: loop exit
PB: predicated region body
PF: predicated region fallthrough
CT: control target
= control target key end

     0   :  { %vm29_vm0 = vcmask 523264   ;;  %vm72_vm4 = vcmask 1024   ;;  %s137_s1 = inlined_call_operand.vmem [shape: f32[64,1], index: 1, kind: input, shape index: {}]   ;;  %s138_s2 = inlined_call_operand.<no memory space> [shape: f32[1,1], index: 2, kind: input, shape index: {}]   ;;  %s139_s0 = inlined_call_operand.vmem [shape: f32[2,64], index: 0, kind: input, shape index: {}]   ;;  %s140_s3 = inlined_call_operand.vmem [shape: f32[2,1], index: 3, kind: output, shape index: {}]  }
   0x1   :  { %v24_v0 = vld [vmem:[%s137_s1 + $0x38] sm:$0xff]  ;;  %v23_v1 = vld [vmem:[%s137_s1 + $0x30] sm:$0xff]  ;;  %v8_v2 = vstv %s138_s2  ;;  %v22_v3 = vld [vmem:[%s137_s1 + $0x28] sm:$0xff] }
   0x2   :  { %41 = vmatpush.msra.mxu0 %v24_v0  ;;  %9 = vst [vmem:[#allocation2] sm:$0x1] %v8_v2  ;;  %v21_v4 = vld [vmem:[%s137_s1 + $0x20] sm:$0xff]  ;;  %v20_v5 = vld [vmem:[%s137_s1 + $0x18] sm:$0xff]  ;;  %v19_v6 = vld [vmem:[%s137_s1 + $0x10] sm:$0xff] }
   0x3   :  { %v18_v7 = vld [vmem:[%s137_s1 + $0x8] sm:$0xff]  ;;  %v17_v8 = vld [vmem:[%s137_s1] sm:$0xff] }
   0x4   :  { %42 = vmatpush.msra.mxu0 %v23_v1  ;;  %v16_v9 = vld [vmem:[%s139_s0] sm:$0x3] }
   0x6   :  { %43 = vmatpush.msra.mxu0 %v22_v3 }
   0x8   :  { %44 = vmatpush.msra.mxu0 %v21_v4 }
   0x9   :  { %v79_v10 = vld [vmem:[#allocation2] ss:$0 sm:$0xff] }
   0xa   :  { %45 = vmatpush.msra.mxu0 %v20_v5 }
   0xc   :  { %46 = vmatpush.msra.mxu0 %v19_v6 }
   0xe   :  { %47 = vmatpush.msra.mxu0 %v18_v7 }
  0x10   :  { %48 = vmatpush.msra.mxu0 %v17_v8 }
  0x11   :  { %78 = vmatmul.msk.f32.vlgmr.msra.gmra.mxu0 %vm29_vm0, %v16_v9 }
  0x8e   :  { %v50_v11 = vpop.f32.mrf.mxu0 }
  0x8f   :  { %v51_v12 = vadd.f32 %v79_v10, %v50_v11 }
  0x91   :  { %v53_v13 = vsub.f32 0.0, %v51_v12 }
  0x93   :  { %v54_v14 = vmul.f32 1.442695, %v53_v13 }
  0x95   :  { %80 = vpow2.f32 %v54_v14 }
  0x9b   :  { %v81_v15 = vpop.eup %80 }
  0x9c   :  { %v56_v16 = vadd.f32 1.0, %v81_v15 }
  0x9e   :  { %82 = vrcp.f32 %v56_v16  ;;  %v68_v20 = vand.u32 2147483648, %v56_v16  ;;  %v66_v22 = vand.u32 2147483647, %v56_v16  ;;  %vm62_vm2 = vweird.f32 %v56_v16 }
  0xa0   :  { %v69_v24 = vor.u32 1.1754944e-38, %v68_v20  ;;  %vm67_vm5 = vcmp.eq.f32.partialorder %v66_v22, 8.507059e+37 }
  0xa4   :  { %v83_v17 = vpop.eup %82 }
  0xa5   :  { %v58_v18 = vmul.f32 %v83_v17, %v56_v16  ;;  %vm63_vm1 = vweird.f32 %v83_v17 }
  0xa6   :  { %vm64_vm3 = vmor %vm62_vm2, %vm63_vm1 }
  0xa7   :  { %v59_v19 = vsub.f32 1.0, %v58_v18 }
  0xa9   :  { %v60_v21 = vmul.f32 %v83_v17, %v59_v19 }
  0xab   :  { %v61_v23 = vadd.f32 %v83_v17, %v60_v21 }
  0xad   :  { %v65_v25 = vsel %vm64_vm3, %v83_v17, %v61_v23 }
  0xae   :  { %v70_v26 = vsel %vm67_vm5, %v69_v24, %v65_v25 }
  0xaf   :  { %73 = vst.msk [vmem:[%s140_s3] sm:$0x3] %vm72_vm4, %v70_v26 }

// kernel: discriminator_forward.8
= control target key start
LH: loop header
LB: loop body
LE: loop exit
PB: predicated region body
PF: predicated region fallthrough
CT: control target
= control target key end

     0   :  { %s3735_s15 = smov 0   ;;  %s3737_s16 = smov 0   ;;  %s4892_s0 = inlined_call_operand.vmem [shape: bf16[64,2048], index: 0, kind: input, shape index: {}]   ;;  %s4893_s1 = inlined_call_operand.vmem [shape: bf16[2048,2], index: 1, kind: input, shape index: {}]   ;;  %s4894_s2 = inlined_call_operand.vmem [shape: f32[64,1], index: 2, kind: input, shape index: {}]   ;;  %s4895_s3 = inlined_call_operand.vmem [shape: f32[64,1], index: 3, kind: input, shape index: {}]   ;;  %s4896_s4 = inlined_call_operand.vmem [shape: f32[64,2], index: 4, kind: output, shape index: {}]  }
   0x1   :  { %s3739_s17 = smov 0  }
   0x2 LB: > { %s26_s18 = sadd.s32 1, %s3702_s16  ;;  %p2671_p0 = scmp.ge.s32.totalorder %s3706_s17, 1  ;;  %s3706_s17 = sphi %s3739_s17, %s14_s17   ;;  %s3702_s16 = sphi %s3737_s16, %s4904_s16   ;;  %s3698_s15 = sphi %s3735_s15, %s4903_s15  }
   0x3   : > { %p28_p1 = scmp.ge.s32.totalorder %s26_s18, 2  ;;  %p173_p2 = scmp.lt.s32.totalorder %s3706_s17, 3 }
   0x5   : > { %s4906_s18 = smov (%p28_p1, %s26_s18), 0  ;;  %p174_p3 = pnand %p2671_p0, %p173_p2 }
   0x6   : > { %p2077_p4 = scmp.eq.s32.totalorder (!%p174_p3), %s3698_s15, 0 }
   0x7   : > { %177 = sbr.rel (%p174_p3) target bundleno = 813 (0x32d), region = 36 }
   0xc   : > { %v3517_v0 = vld [vmem:[%s4893_s1 + $0x38] sm:$0xff]  ;;  %v3516_v4 = vld [vmem:[%s4893_s1 + $0x30] sm:$0xff]  ;;  %v3515_v8 = vld [vmem:[%s4893_s1 + $0x28] sm:$0xff]  ;;  %vm2083_vm0 = vcmask (%p2077_p4), 7168  }
   0xd   : > { %v3525_v1 = vld [vmem:[%s4893_s1 + $0x78] sm:$0xff]  ;;  %1613 = vmatpush.bf16.msra.mxu0 %v3517_v0  ;;  %v3524_v5 = vld [vmem:[%s4893_s1 + $0x70] sm:$0xff]  ;;  %v3523_v9 = vld [vmem:[%s4893_s1 + $0x68] sm:$0xff] }
   0xe   : > { %v3533_v2 = vld [vmem:[%s4893_s1 + $0xb8] sm:$0xff]  ;;  %1642 = vmatpush.bf16.msra.mxu1 %v3525_v1  ;;  %v3532_v6 = vld [vmem:[%s4893_s1 + $0xb0] sm:$0xff]  ;;  %v3531_v10 = vld [vmem:[%s4893_s1 + $0xa8] sm:$0xff] }
   0xf   : > { %v3541_v3 = vld [vmem:[%s4893_s1 + $0xf8] sm:$0xff]  ;;  %1671 = vmatpush.bf16.msra.mxu2 %v3533_v2  ;;  %v3540_v7 = vld [vmem:[%s4893_s1 + $0xf0] sm:$0xff]  ;;  %v3539_v11 = vld [vmem:[%s4893_s1 + $0xe8] sm:$0xff] }
  0x10   : > { %1700 = vmatpush.bf16.msra.mxu3 %v3541_v3  ;;  %v3514_v12 = vld [vmem:[%s4893_s1 + $0x20] sm:$0xff]  ;;  %v3513_v16 = vld [vmem:[%s4893_s1 + $0x18] sm:$0xff]  ;;  %v3512_v20 = vld [vmem:[%s4893_s1 + $0x10] sm:$0xff] }
  0x11   : > { %1614 = vmatpush.bf16.msra.mxu0 %v3516_v4  ;;  %v3522_v13 = vld [vmem:[%s4893_s1 + $0x60] sm:$0xff]  ;;  %v3521_v17 = vld [vmem:[%s4893_s1 + $0x58] sm:$0xff]  ;;  %v3520_v21 = vld [vmem:[%s4893_s1 + $0x50] sm:$0xff] }
  0x12   : > { %1643 = vmatpush.bf16.msra.mxu1 %v3524_v5  ;;  %v3530_v14 = vld [vmem:[%s4893_s1 + $0xa0] sm:$0xff]  ;;  %v3529_v18 = vld [vmem:[%s4893_s1 + $0x98] sm:$0xff]  ;;  %v3528_v22 = vld [vmem:[%s4893_s1 + $0x90] sm:$0xff] }
  0x13   : > { %1672 = vmatpush.bf16.msra.mxu2 %v3532_v6  ;;  %v3538_v15 = vld [vmem:[%s4893_s1 + $0xe0] sm:$0xff]  ;;  %v3537_v19 = vld [vmem:[%s4893_s1 + $0xd8] sm:$0xff]  ;;  %v3536_v23 = vld [vmem:[%s4893_s1 + $0xd0] sm:$0xff] }
  0x14   : > { %1701 = vmatpush.bf16.msra.mxu3 %v3540_v7  ;;  %v3511_v24 = vld [vmem:[%s4893_s1 + $0x8] sm:$0xff]  ;;  %v3510_v28 = vld [vmem:[%s4893_s1] sm:$0xff]  ;;  %v3565_v40 = vld [vmem:[%s4893_s1 + $0x1b8] sm:$0xff] }
  0x15   : > { %1615 = vmatpush.bf16.msra.mxu0 %v3515_v8  ;;  %v3519_v25 = vld [vmem:[%s4893_s1 + $0x48] sm:$0xff]  ;;  %v3518_v29 = vld [vmem:[%s4893_s1 + $0x40] sm:$0xff]  ;;  %v3549_v41 = vld [vmem:[%s4893_s1 + $0x138] sm:$0xff] }
  0x16   : > { %1644 = vmatpush.bf16.msra.mxu1 %v3523_v9  ;;  %v3527_v26 = vld [vmem:[%s4893_s1 + $0x88] sm:$0xff]  ;;  %v3526_v30 = vld [vmem:[%s4893_s1 + $0x80] sm:$0xff]  ;;  %v3573_v46 = vld [vmem:[%s4893_s1 + $0x1f8] sm:$0xff] }
  0x17   : > { %1673 = vmatpush.bf16.msra.mxu2 %v3531_v10  ;;  %v3535_v27 = vld [vmem:[%s4893_s1 + $0xc8] sm:$0xff]  ;;  %v3534_v31 = vld [vmem:[%s4893_s1 + $0xc0] sm:$0xff]  ;;  %v3557_v47 = vld [vmem:[%s4893_s1 + $0x178] sm:$0xff] }
  0x18   : > { %1702 = vmatpush.bf16.msra.mxu3 %v3539_v11  ;;  %v2674_v32 = vld [vmem:[%s4892_s0] sm:$0xf]  ;;  %v3446_v34 = vld [vmem:[%s4892_s0 + $0x4] sm:$0xf]  ;;  %v2682_v36 = vld [vmem:[%s4892_s0 + $0x8] sm:$0xf] }
  0x19   : > { %1616 = vmatpush.bf16.msra.mxu0 %v3514_v12  ;;  %v3454_v33 = vld [vmem:[%s4892_s0 + $0x3c] sm:$0xf0]  ;;  %v2676_v35 = vld [vmem:[%s4892_s0 + $0x40] sm:$0xf0]  ;;  %v3455_v37 = vld [vmem:[%s4892_s0 + $0x44] sm:$0xf0] }
  0x1a   : > { %1645 = vmatpush.bf16.msra.mxu1 %v3522_v13  ;;  %v3447_v38 = vld [vmem:[%s4892_s0 + $0xc] sm:$0xf]  ;;  %v2675_v42 = vor.u32 %v3454_v33, %v2674_v32  ;;  %v2679_v43 = vor.u32 %v3446_v34, %v2676_v35  ;;  %v2683_v44 = vor.u32 %v3455_v37, %v2682_v36  ;;  %v3564_v48 = vld [vmem:[%s4893_s1 + $0x1b0] sm:$0xff]  ;;  %v2738_v56 = vld [vmem:[%s4892_s0 + $0x80] sm:$0xf] }
  0x1b   : > { %1674 = vmatpush.bf16.msra.mxu2 %v3530_v14  ;;  %v2684_v39 = vld [vmem:[%s4892_s0 + $0x48] sm:$0xf0]  ;;  %v3548_v49 = vld [vmem:[%s4893_s1 + $0x130] sm:$0xff]  ;;  %v3562_v57 = vld [vmem:[%s4893_s1 + $0x1a0] sm:$0xff] }
  0x1c   : > { %1703 = vmatpush.bf16.msra.mxu3 %v3538_v15  ;;  %v2687_v45 = vor.u32 %v3447_v38, %v2684_v39  ;;  %v3572_v50 = vld [vmem:[%s4893_s1 + $0x1f0] sm:$0xff]  ;;  %v3563_v52 = vld [vmem:[%s4893_s1 + $0x1a8] sm:$0xff]  ;;  %v3546_v58 = vld [vmem:[%s4893_s1 + $0x120] sm:$0xff] }
  0x1d   : > { %1617 = vmatpush.bf16.msra.mxu0 %v3513_v16  ;;  %v3556_v51 = vld [vmem:[%s4893_s1 + $0x170] sm:$0xff]  ;;  %v3547_v53 = vld [vmem:[%s4893_s1 + $0x128] sm:$0xff]  ;;  %v3470_v59 = vld [vmem:[%s4892_s0 + $0xbc] sm:$0xf0] }
  0x1e   : > { %1646 = vmatpush.bf16.msra.mxu1 %v3521_v17  ;;  %v3571_v54 = vld [vmem:[%s4893_s1 + $0x1e8] sm:$0xff]  ;;  %v3462_v60 = vld [vmem:[%s4892_s0 + $0x84] sm:$0xf]  ;;  %v3561_v4 = vld [vmem:[%s4893_s1 + $0x198] sm:$0xff]  ;;  %v2739_v6 = vor.u32 %v3470_v59, %v2738_v56 }
  0x1f   : > { %1675 = vmatpush.bf16.msra.mxu2 %v3529_v18  ;;  %v3555_v55 = vld [vmem:[%s4893_s1 + $0x168] sm:$0xff]  ;;  %v2740_v61 = vld [vmem:[%s4892_s0 + $0xc0] sm:$0xf0]  ;;  %v3545_v5 = vld [vmem:[%s4893_s1 + $0x118] sm:$0xff] }
  0x20   : > { %1704 = vmatpush.bf16.msra.mxu3 %v3537_v19  ;;  %v2746_v62 = vld [vmem:[%s4892_s0 + $0x88] sm:$0xf]  ;;  %v3463_v0 = vld [vmem:[%s4892_s0 + $0x8c] sm:$0xf]  ;;  %v3570_v2 = vld [vmem:[%s4893_s1 + $0x1e0] sm:$0xff]  ;;  %v2743_v7 = vor.u32 %v3462_v60, %v2740_v61 }
  0x21   : > { %1618 = vmatpush.bf16.msra.mxu0 %v3512_v20  ;;  %v3471_v63 = vld [vmem:[%s4892_s0 + $0xc4] sm:$0xf0]  ;;  %v2748_v1 = vld [vmem:[%s4892_s0 + $0xc8] sm:$0xf0]  ;;  %v3554_v3 = vld [vmem:[%s4893_s1 + $0x160] sm:$0xff] }
  0x22   : > { %1647 = vmatpush.bf16.msra.mxu1 %v3520_v21  ;;  %v2747_v8 = vor.u32 %v3471_v63, %v2746_v62  ;;  %v2751_v9 = vor.u32 %v3463_v0, %v2748_v1  ;;  %v3569_v10 = vld [vmem:[%s4893_s1 + $0x1d8] sm:$0xff]  ;;  %v3560_v12 = vld [vmem:[%s4893_s1 + $0x190] sm:$0xff]  ;;  %v3559_v16 = vld [vmem:[%s4893_s1 + $0x188] sm:$0xff] }
  0x23   : > { %1676 = vmatpush.bf16.msra.mxu2 %v3528_v22  ;;  %v3553_v11 = vld [vmem:[%s4893_s1 + $0x158] sm:$0xff]  ;;  %v3544_v13 = vld [vmem:[%s4893_s1 + $0x110] sm:$0xff]  ;;  %v3543_v17 = vld [vmem:[%s4893_s1 + $0x108] sm:$0xff] }
  0x24   : > { %1705 = vmatpush.bf16.msra.mxu3 %v3536_v23  ;;  %v3568_v14 = vld [vmem:[%s4893_s1 + $0x1d0] sm:$0xff]  ;;  %v3567_v18 = vld [vmem:[%s4893_s1 + $0x1c8] sm:$0xff]  ;;  %v2802_v20 = vld [vmem:[%s4892_s0 + $0x100] sm:$0xf] }
  0x25   : > { %1619 = vmatpush.bf16.msra.mxu0 %v3511_v24  ;;  %v3552_v15 = vld [vmem:[%s4893_s1 + $0x150] sm:$0xff]  ;;  %v3551_v19 = vld [vmem:[%s4893_s1 + $0x148] sm:$0xff]  ;;  %v3558_v21 = vld [vmem:[%s4893_s1 + $0x180] sm:$0xff] }
  0x26   : > { %1648 = vmatpush.bf16.msra.mxu1 %v3519_v25  ;;  %v3542_v22 = vld [vmem:[%s4893_s1 + $0x100] sm:$0xff]  ;;  %v3597_v36 = vld [vmem:[%s4893_s1 + $0x2b8] sm:$0xff]  ;;  %v3595_v56 = vld [vmem:[%s4893_s1 + $0x2a8] sm:$0xff] }
  0x27   : > { %1677 = vmatpush.bf16.msra.mxu2 %v3527_v26  ;;  %v3486_v23 = vld [vmem:[%s4892_s0 + $0x13c] sm:$0xf0]  ;;  %v3478_v24 = vld [vmem:[%s4892_s0 + $0x104] sm:$0xf]  ;;  %v2810_v26 = vld [vmem:[%s4892_s0 + $0x108] sm:$0xf] }
  0x28   : > { %1706 = vmatpush.bf16.msra.mxu3 %v3535_v27  ;;  %v2804_v25 = vld [vmem:[%s4892_s0 + $0x140] sm:$0xf0]  ;;  %v3487_v27 = vld [vmem:[%s4892_s0 + $0x144] sm:$0xf0]  ;;  %v2803_v32 = vor.u32 %v3486_v23, %v2802_v20  ;;  %v3581_v37 = vld [vmem:[%s4893_s1 + $0x238] sm:$0xff] }
  0x29   : > { %1620 = vmatpush.bf16.msra.mxu0 %v3510_v28  ;;  %v3479_v28 = vld [vmem:[%s4892_s0 + $0x10c] sm:$0xf]  ;;  %v2807_v33 = vor.u32 %v3478_v24, %v2804_v25  ;;  %v2811_v34 = vor.u32 %v3487_v27, %v2810_v26  ;;  %v3605_v38 = vld [vmem:[%s4893_s1 + $0x2f8] sm:$0xff]  ;;  %v3594_v60 = vld [vmem:[%s4893_s1 + $0x2a0] sm:$0xff] }
  0x2a   : > { %1649 = vmatpush.bf16.msra.mxu1 %v3518_v29  ;;  %v2812_v29 = vld [vmem:[%s4892_s0 + $0x148] sm:$0xf0]  ;;  %v3589_v39 = vld [vmem:[%s4893_s1 + $0x278] sm:$0xff]  ;;  %v3578_v61 = vld [vmem:[%s4893_s1 + $0x220] sm:$0xff] }
  0x2b   : > { %1678 = vmatpush.bf16.msra.mxu2 %v3526_v30  ;;  %v3566_v30 = vld [vmem:[%s4893_s1 + $0x1c0] sm:$0xff]  ;;  %v2815_v35 = vor.u32 %v3479_v28, %v2812_v29  ;;  %v3587_v59 = vld [vmem:[%s4893_s1 + $0x268] sm:$0xff]  ;;  %v2690_v0 = vld [vmem:[%s4892_s0 + $0x10] sm:$0xf] }
  0x2c   : > { %1707 = vmatpush.bf16.msra.mxu3 %v3534_v31  ;;  %1621 = vmatmul.bf16.vlgmr.msra.gmra.mxu0 %v2675_v42  ;;  %v3550_v31 = vld [vmem:[%s4893_s1 + $0x140] sm:$0xff]  ;;  %v3604_v42 = vld [vmem:[%s4893_s1 + $0x2f0] sm:$0xff]  ;;  %v2762_v24 = vld [vmem:[%s4892_s0 + $0x98] sm:$0xf] }
  0x2d   : > { %1729 = vmatpush.bf16.msrb.mxu0 %v3549_v41  ;;  %1650 = vmatmul.bf16.vlgmr.msra.gmra.mxu1 %v2679_v43  ;;  %v3580_v41 = vld [vmem:[%s4893_s1 + $0x230] sm:$0xff]  ;;  %v3602_v62 = vld [vmem:[%s4893_s1 + $0x2e0] sm:$0xff]  ;;  %v3473_v25 = vld [vmem:[%s4892_s0 + $0xd4] sm:$0xf0] }
  0x2e   : > { %1679 = vmatmul.bf16.vlgmr.msra.gmra.mxu2 %v2683_v44  ;;  %1758 = vmatpush.bf16.msrb.mxu1 %v3557_v47  ;;  %v3588_v43 = vld [vmem:[%s4893_s1 + $0x270] sm:$0xff]  ;;  %v2866_v44 = vld [vmem:[%s4892_s0 + $0x180] sm:$0xf]  ;;  %v2868_v47 = vld [vmem:[%s4892_s0 + $0x1c0] sm:$0xf0] }
  0x2f   : > { %1787 = vmatpush.bf16.msrb.mxu2 %v3565_v40  ;;  %1708 = vmatmul.bf16.vlgmr.msra.gmra.mxu3 %v2687_v45  ;;  %v3596_v40 = vld [vmem:[%s4893_s1 + $0x2b0] sm:$0xff]  ;;  %v3502_v45 = vld [vmem:[%s4892_s0 + $0x1bc] sm:$0xf0]  ;;  %v3465_v26 = vld [vmem:[%s4892_s0 + $0x9c] sm:$0xf] }
  0x30   : > { %1816 = vmatpush.bf16.msrb.mxu3 %v3573_v46  ;;  %v3494_v46 = vld [vmem:[%s4892_s0 + $0x184] sm:$0xf]  ;;  %v3456_v1 = vld [vmem:[%s4892_s0 + $0x4c] sm:$0xf0]  ;;  %v2756_v23 = vld [vmem:[%s4892_s0 + $0xd0] sm:$0xf0] }
  0x31   : > { %1730 = vmatpush.bf16.msrb.mxu0 %v3548_v49  ;;  %v3503_v49 = vld [vmem:[%s4892_s0 + $0x1c4] sm:$0xf0]  ;;  %v3586_v63 = vld [vmem:[%s4893_s1 + $0x260] sm:$0xff]  ;;  %v2754_v20 = vld [vmem:[%s4892_s0 + $0x90] sm:$0xf] }
  0x32   : > { %1759 = vmatpush.bf16.msrb.mxu1 %v3556_v51  ;;  %v2876_v51 = vld [vmem:[%s4892_s0 + $0x1c8] sm:$0xf0]  ;;  %v2764_v27 = vld [vmem:[%s4892_s0 + $0xd8] sm:$0xf0] }
  0x33   : > { %1788 = vmatpush.bf16.msrb.mxu2 %v3564_v48  ;;  %v2874_v48 = vld [vmem:[%s4892_s0 + $0x188] sm:$0xf] }
  0x34   : > { %1817 = vmatpush.bf16.msrb.mxu3 %v3572_v50  ;;  %v3495_v50 = vld [vmem:[%s4892_s0 + $0x18c] sm:$0xf] }
  0x35   : > { %1731 = vmatpush.bf16.msrb.mxu0 %v3547_v53  ;;  %v2871_v53 = vor.u32 %v3494_v46, %v2868_v47  ;;  %v3481_v46 = vld [vmem:[%s4892_s0 + $0x11c] sm:$0xf] }
  0x36   : > { %1760 = vmatpush.bf16.msrb.mxu1 %v3555_v55  ;;  %v2879_v55 = vor.u32 %v3495_v50, %v2876_v51  ;;  %v2828_v47 = vld [vmem:[%s4892_s0 + $0x158] sm:$0xf0] }
  0x37   : > { %1789 = vmatpush.bf16.msrb.mxu2 %v3563_v52  ;;  %v2867_v52 = vor.u32 %v3502_v45, %v2866_v44  ;;  %v2826_v44 = vld [vmem:[%s4892_s0 + $0x118] sm:$0xf]  ;;  %v2831_v51 = vor.u32 %v3481_v46, %v2828_v47  ;;  %v3632_v46 = vld [vmem:[%s4893_s1 + $0x3d0] sm:$0xff]  ;;  %v3466_v47 = vld [vmem:[%s4892_s0 + $0xa4] sm:$0xf] }
  0x38   : > { %1818 = vmatpush.bf16.msrb.mxu3 %v3571_v54  ;;  %v2875_v54 = vor.u32 %v3503_v49, %v2874_v48  ;;  %v3489_v45 = vld [vmem:[%s4892_s0 + $0x154] sm:$0xf0] }
  0x39   : > { %1732 = vmatpush.bf16.msrb.mxu0 %v3546_v58  ;;  %v3603_v58 = vld [vmem:[%s4893_s1 + $0x2e8] sm:$0xff]  ;;  %v2827_v50 = vor.u32 %v3489_v45, %v2826_v44  ;;  %v2770_v44 = vld [vmem:[%s4892_s0 + $0xa0] sm:$0xf] }
  0x3a   : > { %1761 = vmatpush.bf16.msrb.mxu1 %v3554_v3  ;;  %v2692_v3 = vld [vmem:[%s4892_s0 + $0x50] sm:$0xf0]  ;;  %v3474_v45 = vld [vmem:[%s4892_s0 + $0xdc] sm:$0xf0] }
  0x3b   : > { %1790 = vmatpush.bf16.msrb.mxu2 %v3562_v57  ;;  %v3579_v57 = vld [vmem:[%s4893_s1 + $0x228] sm:$0xff] }
  0x3c   : > { %1819 = vmatpush.bf16.msrb.mxu3 %v3570_v2  ;;  %1626 = vmatmul.bf16.gmra.mxu0 %v2739_v6  ;;  %v3448_v2 = vld [vmem:[%s4892_s0 + $0x14] sm:$0xf]  ;;  %v3449_v6 = vld [vmem:[%s4892_s0 + $0x1c] sm:$0xf] }
  0x3d   : > { %1733 = vmatpush.bf16.msrb.mxu0 %v3545_v5  ;;  %1655 = vmatmul.bf16.gmra.mxu1 %v2743_v7  ;;  %v3457_v5 = vld [vmem:[%s4892_s0 + $0x54] sm:$0xf0]  ;;  %v2700_v7 = vld [vmem:[%s4892_s0 + $0x58] sm:$0xf0] }
  0x3e   : > { %1684 = vmatmul.bf16.gmra.mxu2 %v2747_v8  ;;  %1762 = vmatpush.bf16.msrb.mxu1 %v3553_v11  ;;  %v2691_v8 = vor.u32 %v3456_v1, %v2690_v0  ;;  %v2703_v11 = vor.u32 %v3449_v6, %v2700_v7  ;;  %v3505_v0 = vld [vmem:[%s4892_s0 + $0x1d4] sm:$0xf0]  ;;  %v3497_v1 = vld [vmem:[%s4892_s0 + $0x19c] sm:$0xf]  ;;  %v3620_v7 = vld [vmem:[%s4893_s1 + $0x370] sm:$0xff] }
  0x3f   : > { %1791 = vmatpush.bf16.msrb.mxu2 %v3561_v4  ;;  %1713 = vmatmul.bf16.gmra.mxu3 %v2751_v9  ;;  %v2698_v4 = vld [vmem:[%s4892_s0 + $0x18] sm:$0xf]  ;;  %v2695_v9 = vor.u32 %v3448_v2, %v2692_v3  ;;  %v2892_v2 = vld [vmem:[%s4892_s0 + $0x1d8] sm:$0xf0] }
  0x40   : > { %1820 = vmatpush.bf16.msrb.mxu3 %v3569_v10  ;;  %v2699_v10 = vor.u32 %v3457_v5, %v2698_v4  ;;  %v2895_v6 = vor.u32 %v3497_v1, %v2892_v2  ;;  %v3623_v1 = vld [vmem:[%s4893_s1 + $0x388] sm:$0xff] }
  0x41   : > { %1734 = vmatpush.bf16.msrb.mxu0 %v3544_v13  ;;  %v3577_v13 = vld [vmem:[%s4893_s1 + $0x218] sm:$0xff]  ;;  %v3607_v2 = vld [vmem:[%s4893_s1 + $0x308] sm:$0xff] }
  0x42   : > { %1763 = vmatpush.bf16.msrb.mxu1 %v3552_v15  ;;  %v3585_v15 = vld [vmem:[%s4893_s1 + $0x258] sm:$0xff] }
  0x43   : > { %1792 = vmatpush.bf16.msrb.mxu2 %v3560_v12  ;;  %v3593_v12 = vld [vmem:[%s4893_s1 + $0x298] sm:$0xff] }
  0x44   : > { %1821 = vmatpush.bf16.msrb.mxu3 %v3568_v14  ;;  %v3601_v14 = vld [vmem:[%s4893_s1 + $0x2d8] sm:$0xff] }
  0x45   : > { %1735 = vmatpush.bf16.msrb.mxu0 %v3543_v17  ;;  %v3576_v17 = vld [vmem:[%s4893_s1 + $0x210] sm:$0xff] }
  0x46   : > { %1764 = vmatpush.bf16.msrb.mxu1 %v3551_v19  ;;  %v3584_v19 = vld [vmem:[%s4893_s1 + $0x250] sm:$0xff] }
  0x47   : > { %1793 = vmatpush.bf16.msrb.mxu2 %v3559_v16  ;;  %v3592_v16 = vld [vmem:[%s4893_s1 + $0x290] sm:$0xff] }
  0x48   : > { %1822 = vmatpush.bf16.msrb.mxu3 %v3567_v18  ;;  %v3600_v18 = vld [vmem:[%s4893_s1 + $0x2d0] sm:$0xff] }
  0x49   : > { %1736 = vmatpush.bf16.msrb.mxu0 %v3542_v22  ;;  %v3464_v22 = vld [vmem:[%s4892_s0 + $0x94] sm:$0xf] }
  0x4a   : > { %1765 = vmatpush.bf16.msrb.mxu1 %v3550_v31  ;;  %v2759_v29 = vor.u32 %v3464_v22, %v2756_v23  ;;  %v2767_v31 = vor.u32 %v3465_v26, %v2764_v27  ;;  %v2716_v22 = vld [vmem:[%s4892_s0 + $0x68] sm:$0xf0] }
  0x4b   : > { %1794 = vmatpush.bf16.msrb.mxu2 %v3558_v21  ;;  %v3472_v21 = vld [vmem:[%s4892_s0 + $0xcc] sm:$0xf0] }
  0x4c   : > { %1823 = vmatpush.bf16.msrb.mxu3 %v3566_v30  ;;  %1631 = vmatmul.bf16.gmra.mxu0 %v2803_v32  ;;  %v2755_v28 = vor.u32 %v3472_v21, %v2754_v20  ;;  %v2763_v30 = vor.u32 %v3473_v25, %v2762_v24  ;;  %v3591_v32 = vld [vmem:[%s4893_s1 + $0x288] sm:$0xff] }
  0x4d   : > { %1660 = vmatmul.bf16.gmra.mxu1 %v2807_v33  ;;  %1845 = vmatpush.bf16.msra.mxu0 %v3581_v37  ;;  %v3575_v33 = vld [vmem:[%s4893_s1 + $0x208] sm:$0xff]  ;;  %v3574_v37 = vld [vmem:[%s4893_s1 + $0x200] sm:$0xff] }
  0x4e   : > { %1689 = vmatmul.bf16.gmra.mxu2 %v2811_v34  ;;  %1874 = vmatpush.bf16.msra.mxu1 %v3589_v39  ;;  %v3599_v34 = vld [vmem:[%s4893_s1 + $0x2c8] sm:$0xff]  ;;  %v3582_v39 = vld [vmem:[%s4893_s1 + $0x240] sm:$0xff] }
  0x4f   : > { %1718 = vmatmul.bf16.gmra.mxu3 %v2815_v35  ;;  %1903 = vmatpush.bf16.msra.mxu2 %v3597_v36  ;;  %v3583_v35 = vld [vmem:[%s4893_s1 + $0x248] sm:$0xff]  ;;  %v3590_v36 = vld [vmem:[%s4893_s1 + $0x280] sm:$0xff] }
  0x50   : > { %1932 = vmatpush.bf16.msra.mxu3 %v3605_v38  ;;  %v3598_v38 = vld [vmem:[%s4893_s1 + $0x2c0] sm:$0xff]  ;;  %v3459_v20 = vld [vmem:[%s4892_s0 + $0x64] sm:$0xf0]  ;;  %v3451_v21 = vld [vmem:[%s4892_s0 + $0x2c] sm:$0xf] }
  0x51   : > { %1846 = vmatpush.bf16.msra.mxu0 %v3580_v41  ;;  %v3488_v41 = vld [vmem:[%s4892_s0 + $0x14c] sm:$0xf0] }
  0x52   : > { %1875 = vmatpush.bf16.msra.mxu1 %v3588_v43  ;;  %v2820_v43 = vld [vmem:[%s4892_s0 + $0x150] sm:$0xf0] }
  0x53   : > { %1904 = vmatpush.bf16.msra.mxu2 %v3596_v40  ;;  %v2818_v40 = vld [vmem:[%s4892_s0 + $0x110] sm:$0xf] }
  0x54   : > { %1933 = vmatpush.bf16.msra.mxu3 %v3604_v42  ;;  %v3480_v42 = vld [vmem:[%s4892_s0 + $0x114] sm:$0xf]  ;;  %v2819_v48 = vor.u32 %v3488_v41, %v2818_v40  ;;  %v3617_v41 = vld [vmem:[%s4893_s1 + $0x358] sm:$0xff] }
  0x55   : > { %1847 = vmatpush.bf16.msra.mxu0 %v3579_v57  ;;  %v2823_v49 = vor.u32 %v3480_v42, %v2820_v43  ;;  %v3612_v57 = vld [vmem:[%s4893_s1 + $0x330] sm:$0xff] }
  0x56   : > { %1876 = vmatpush.bf16.msra.mxu1 %v3587_v59  ;;  %v3504_v59 = vld [vmem:[%s4892_s0 + $0x1cc] sm:$0xf0] }
  0x57   : > { %1905 = vmatpush.bf16.msra.mxu2 %v3595_v56  ;;  %v3628_v56 = vld [vmem:[%s4893_s1 + $0x3b0] sm:$0xff] }
  0x58   : > { %1934 = vmatpush.bf16.msra.mxu3 %v3603_v58  ;;  %v2882_v58 = vld [vmem:[%s4892_s0 + $0x190] sm:$0xf] }
  0x59   : > { %1848 = vmatpush.bf16.msra.mxu0 %v3578_v61  ;;  %v3496_v61 = vld [vmem:[%s4892_s0 + $0x194] sm:$0xf]  ;;  %v2883_v3 = vor.u32 %v3504_v59, %v2882_v58 }
  0x5a   : > { %1877 = vmatpush.bf16.msra.mxu1 %v3586_v63  ;;  %v2890_v63 = vld [vmem:[%s4892_s0 + $0x198] sm:$0xf]  ;;  %v3624_v42 = vld [vmem:[%s4893_s1 + $0x390] sm:$0xff] }
  0x5b   : > { %1906 = vmatpush.bf16.msra.mxu2 %v3594_v60  ;;  %v3636_v60 = vld [vmem:[%s4893_s1 + $0x3f0] sm:$0xff]  ;;  %v2891_v5 = vor.u32 %v3505_v0, %v2890_v63 }
  0x5c   : > { %1636 = vmatmul.bf16.gmra.mxu0 %v2867_v52  ;;  %1935 = vmatpush.bf16.msra.mxu3 %v3602_v62  ;;  %v3629_v52 = vld [vmem:[%s4893_s1 + $0x3b8] sm:$0xff]  ;;  %v2884_v62 = vld [vmem:[%s4892_s0 + $0x1d0] sm:$0xf0] }
  0x5d   : > { %1665 = vmatmul.bf16.gmra.mxu1 %v2871_v53  ;;  %1849 = vmatpush.bf16.msra.mxu0 %v3577_v13  ;;  %v3613_v53 = vld [vmem:[%s4893_s1 + $0x338] sm:$0xff]  ;;  %v2887_v4 = vor.u32 %v3496_v61, %v2884_v62  ;;  %v3610_v13 = vld [vmem:[%s4893_s1 + $0x320] sm:$0xff]  ;;  %v3608_v43 = vld [vmem:[%s4893_s1 + $0x310] sm:$0xff] }
  0x5e   : > { %1694 = vmatmul.bf16.gmra.mxu2 %v2875_v54  ;;  %1878 = vmatpush.bf16.msra.mxu1 %v3585_v15  ;;  %v3637_v54 = vld [vmem:[%s4893_s1 + $0x3f8] sm:$0xff]  ;;  %v3458_v15 = vld [vmem:[%s4892_s0 + $0x5c] sm:$0xf0]  ;;  %v3616_v0 = vld [vmem:[%s4893_s1 + $0x350] sm:$0xff] }
  0x5f   : > { %1723 = vmatmul.bf16.gmra.mxu3 %v2879_v55  ;;  %1907 = vmatpush.bf16.msra.mxu2 %v3593_v12  ;;  %v3621_v55 = vld [vmem:[%s4893_s1 + $0x378] sm:$0xff]  ;;  %v3626_v12 = vld [vmem:[%s4893_s1 + $0x3a0] sm:$0xff] }
  0x60   : > { %1936 = vmatpush.bf16.msra.mxu3 %v3601_v14  ;;  %v2706_v14 = vld [vmem:[%s4892_s0 + $0x20] sm:$0xf] }
  0x61   : > { %1850 = vmatpush.bf16.msra.mxu0 %v3576_v17  ;;  %v3450_v17 = vld [vmem:[%s4892_s0 + $0x24] sm:$0xf]  ;;  %v2707_v23 = vor.u32 %v3458_v15, %v2706_v14  ;;  %v2834_v14 = vld [vmem:[%s4892_s0 + $0x120] sm:$0xf] }
  0x62   : > { %1879 = vmatpush.bf16.msra.mxu1 %v3584_v19  ;;  %v2714_v19 = vld [vmem:[%s4892_s0 + $0x28] sm:$0xf]  ;;  %v3490_v15 = vld [vmem:[%s4892_s0 + $0x15c] sm:$0xf0] }
  0x63   : > { %1908 = vmatpush.bf16.msra.mxu2 %v3592_v16  ;;  %v3634_v16 = vld [vmem:[%s4893_s1 + $0x3e0] sm:$0xff]  ;;  %v2715_v27 = vor.u32 %v3459_v20, %v2714_v19  ;;  %v2842_v19 = vld [vmem:[%s4892_s0 + $0x128] sm:$0xf] }
  0x64   : > { %1937 = vmatpush.bf16.msra.mxu3 %v3600_v18  ;;  %v2708_v18 = vld [vmem:[%s4892_s0 + $0x60] sm:$0xf0]  ;;  %v3491_v20 = vld [vmem:[%s4892_s0 + $0x164] sm:$0xf0] }
  0x65   : > { %1851 = vmatpush.bf16.msra.mxu0 %v3575_v33  ;;  %v2711_v24 = vor.u32 %v3450_v17, %v2708_v18  ;;  %v3633_v33 = vld [vmem:[%s4893_s1 + $0x3d8] sm:$0xff]  ;;  %v3482_v17 = vld [vmem:[%s4892_s0 + $0x124] sm:$0xf] }
  0x66   : > { %1880 = vmatpush.bf16.msra.mxu1 %v3583_v35  ;;  %v2836_v18 = vld [vmem:[%s4892_s0 + $0x160] sm:$0xf0] }
  0x67   : > { %1909 = vmatpush.bf16.msra.mxu2 %v3591_v32  ;;  %v3609_v32 = vld [vmem:[%s4893_s1 + $0x318] sm:$0xff] }
  0x68   : > { %1938 = vmatpush.bf16.msra.mxu3 %v3599_v34 }
  0x69   : > { %1852 = vmatpush.bf16.msra.mxu0 %v3574_v37 }
  0x6a   : > { %1881 = vmatpush.bf16.msra.mxu1 %v3582_v39 }
  0x6b   : > { %1910 = vmatpush.bf16.msra.mxu2 %v3590_v36 }
  0x6c   : > { %1737 = vmatmul.bf16.vlgmr.msrb.gmra.mxu0 %v2691_v8  ;;  %1939 = vmatpush.bf16.msra.mxu3 %v3598_v38  ;;  %v3627_v8 = vld [vmem:[%s4893_s1 + $0x3a8] sm:$0xff] }
  0x6d   : > { %1766 = vmatmul.bf16.vlgmr.msrb.gmra.mxu1 %v2695_v9  ;;  %1961 = vmatpush.bf16.msrb.mxu0 %v3613_v53  ;;  %v3611_v9 = vld [vmem:[%s4893_s1 + $0x328] sm:$0xff] }
  0x6e   : > { %1795 = vmatmul.bf16.vlgmr.msrb.gmra.mxu2 %v2699_v10  ;;  %1990 = vmatpush.bf16.msrb.mxu1 %v3621_v55  ;;  %v3635_v10 = vld [vmem:[%s4893_s1 + $0x3e8] sm:$0xff]  ;;  %v2771_v55 = vor.u32 %v3474_v45, %v2770_v44  ;;  %v3506_v44 = vld [vmem:[%s4892_s0 + $0x1dc] sm:$0xf0]  ;;  %v3498_v45 = vld [vmem:[%s4892_s0 + $0x1a4] sm:$0xf] }
  0x6f   : > { %1824 = vmatmul.bf16.vlgmr.msrb.gmra.mxu3 %v2703_v11  ;;  %2019 = vmatpush.bf16.msrb.mxu2 %v3629_v52  ;;  %v3619_v11 = vld [vmem:[%s4893_s1 + $0x368] sm:$0xff] }
  0x70   : > { %2048 = vmatpush.bf16.msrb.mxu3 %v3637_v54  ;;  %v2780_v52 = vld [vmem:[%s4892_s0 + $0xe8] sm:$0xf0] }
  0x71   : > { %1962 = vmatpush.bf16.msrb.mxu0 %v3612_v57 }
  0x72   : > { %1991 = vmatpush.bf16.msrb.mxu1 %v3620_v7 }
  0x73   : > { %2020 = vmatpush.bf16.msrb.mxu2 %v3628_v56 }
  0x74   : > { %2049 = vmatpush.bf16.msrb.mxu3 %v3636_v60 }
  0x75   : > { %1963 = vmatpush.bf16.msrb.mxu0 %v3611_v9 }
  0x76   : > { %1992 = vmatpush.bf16.msrb.mxu1 %v3619_v11  ;;  %v3615_v11 = vld [vmem:[%s4893_s1 + $0x348] sm:$0xff] }
  0x77   : > { %2021 = vmatpush.bf16.msrb.mxu2 %v3627_v8 }
  0x78   : > { %2050 = vmatpush.bf16.msrb.mxu3 %v3635_v10 }
  0x79   : > { %1964 = vmatpush.bf16.msrb.mxu0 %v3610_v13  ;;  %v3606_v13 = vld [vmem:[%s4893_s1 + $0x300] sm:$0xff] }
  0x7b   : > { %2022 = vmatpush.bf16.msrb.mxu2 %v3626_v12  ;;  %v3622_v12 = vld [vmem:[%s4893_s1 + $0x380] sm:$0xff] }
  0x7c   : > { %1742 = vmatmul.bf16.gmra.mxu0 %v2755_v28  ;;  %2051 = vmatpush.bf16.msrb.mxu3 %v3634_v16  ;;  %v2719_v28 = vor.u32 %v3451_v21, %v2716_v22  ;;  %v3630_v16 = vld [vmem:[%s4893_s1 + $0x3c0] sm:$0xff]  ;;  %v3483_v21 = vld [vmem:[%s4892_s0 + $0x12c] sm:$0xf] }
  0x7d   : > { %1771 = vmatmul.bf16.gmra.mxu1 %v2759_v29  ;;  %1965 = vmatpush.bf16.msrb.mxu0 %v3609_v32  ;;  %v2844_v22 = vld [vmem:[%s4892_s0 + $0x168] sm:$0xf0] }
  0x7e   : > { %1800 = vmatmul.bf16.gmra.mxu2 %v2763_v30  ;;  %v3618_v30 = vld [vmem:[%s4893_s1 + $0x360] sm:$0xff]  ;;  %v2847_v32 = vor.u32 %v3483_v21, %v2844_v22 }
  0x7f   : > { %1829 = vmatmul.bf16.gmra.mxu3 %v2767_v31  ;;  %v3625_v31 = vld [vmem:[%s4893_s1 + $0x398] sm:$0xff]  ;;  %1993 = vmatpush.bf16.msrb.mxu1 %v3618_v30 }
  0x80   : > { %2023 = vmatpush.bf16.msrb.mxu2 %v3625_v31  ;;  %2052 = vmatpush.bf16.msrb.mxu3 %v3633_v33  ;;  %v2843_v31 = vor.u32 %v3491_v20, %v2842_v19 }
  0x81   : > { %1966 = vmatpush.bf16.msrb.mxu0 %v3608_v43  ;;  %v2898_v43 = vld [vmem:[%s4892_s0 + $0x1a0] sm:$0xf] }
  0x83   : > { %1994 = vmatpush.bf16.msrb.mxu1 %v3617_v41 }
  0x84   : > { %2024 = vmatpush.bf16.msrb.mxu2 %v3624_v42  ;;  %2053 = vmatpush.bf16.msrb.mxu3 %v3632_v46  ;;  %v2900_v46 = vld [vmem:[%s4892_s0 + $0x1e0] sm:$0xf0] }
  0x85   : > { %1967 = vmatpush.bf16.msrb.mxu0 %v3607_v2 }
  0x87   : > { %1995 = vmatpush.bf16.msrb.mxu1 %v3616_v0 }
  0x88   : > { %2025 = vmatpush.bf16.msrb.mxu2 %v3623_v1 }
  0x89   : > { %1968 = vmatpush.bf16.msrb.mxu0 %v3606_v13  ;;  %v3453_v13 = vld [vmem:[%s4892_s0 + $0x3c] sm:$0xf] }
  0x8b   : > { %1996 = vmatpush.bf16.msrb.mxu1 %v3615_v11  ;;  %v2730_v11 = vld [vmem:[%s4892_s0 + $0x38] sm:$0xf] }
  0x8c   : > { %1747 = vmatmul.bf16.gmra.mxu0 %v2819_v48  ;;  %v2772_v48 = vld [vmem:[%s4892_s0 + $0xe0] sm:$0xf0]  ;;  %2026 = vmatpush.bf16.msrb.mxu2 %v3622_v12  ;;  %v3461_v12 = vld [vmem:[%s4892_s0 + $0x74] sm:$0xf0] }
  0x8d   : > { %1776 = vmatmul.bf16.gmra.mxu1 %v2823_v49  ;;  %v2778_v49 = vld [vmem:[%s4892_s0 + $0xa8] sm:$0xf]  ;;  %v2775_v56 = vor.u32 %v3466_v47, %v2772_v48  ;;  %v2731_v22 = vor.u32 %v3461_v12, %v2730_v11 }
  0x8e   : > { %1805 = vmatmul.bf16.gmra.mxu2 %v2827_v50  ;;  %v3475_v50 = vld [vmem:[%s4892_s0 + $0xe4] sm:$0xf0] }
  0x8f   : > { %1834 = vmatmul.bf16.gmra.mxu3 %v2831_v51  ;;  %v3467_v51 = vld [vmem:[%s4892_s0 + $0xac] sm:$0xf]  ;;  %v2779_v60 = vor.u32 %v3475_v50, %v2778_v49  ;;  %v2906_v47 = vld [vmem:[%s4892_s0 + $0x1a8] sm:$0xf] }
  0x90   : > { %v2783_v61 = vor.u32 %v3467_v51, %v2780_v52  ;;  %v3507_v48 = vld [vmem:[%s4892_s0 + $0x1e4] sm:$0xf0]  ;;  %v3499_v49 = vld [vmem:[%s4892_s0 + $0x1ac] sm:$0xf] }
  0x91   : > { %v2908_v50 = vld [vmem:[%s4892_s0 + $0x1e8] sm:$0xf0] }
  0x9c   : > { %1752 = vmatmul.bf16.gmra.mxu0 %v2883_v3  ;;  %v3631_v3 = vld [vmem:[%s4893_s1 + $0x3c8] sm:$0xff] }
  0x9d   : > { %1781 = vmatmul.bf16.gmra.mxu1 %v2887_v4  ;;  %2054 = vmatpush.bf16.msrb.mxu3 %v3631_v3 }
  0x9e   : > { %1810 = vmatmul.bf16.gmra.mxu2 %v2891_v5 }
  0x9f   : > { %1839 = vmatmul.bf16.gmra.mxu3 %v2895_v6 }
  0xa1   : > { %2055 = vmatpush.bf16.msrb.mxu3 %v3630_v16 }
  0xa9   : > { %v1622_v25 = vpop.f32.mrf.mxu0 }
  0xaa   : > { %v1651_v26 = vpop.f32.mrf.mxu1 }
  0xab   : > { %v1652_v29 = vadd.f32 %v1651_v26, %v1622_v25  ;;  %v2835_v25 = vor.u32 %v3490_v15, %v2834_v14  ;;  %v2839_v26 = vor.u32 %v3482_v17, %v2836_v18  ;;  %v2732_v14 = vld [vmem:[%s4892_s0 + $0x78] sm:$0xf0] }
  0xac   : > { %1853 = vmatmul.bf16.vlgmr.msra.gmra.mxu0 %v2707_v23 }
  0xad   : > { %1882 = vmatmul.bf16.vlgmr.msra.gmra.mxu1 %v2711_v24 }
  0xae   : > { %1911 = vmatmul.bf16.vlgmr.msra.gmra.mxu2 %v2715_v27  ;;  %v3614_v27 = vld [vmem:[%s4893_s1 + $0x340] sm:$0xff] }
  0xaf   : > { %1940 = vmatmul.bf16.vlgmr.msra.gmra.mxu3 %v2719_v28  ;;  %1997 = vmatpush.bf16.msrb.mxu1 %v3614_v27 }
  0xb1   : > { %v1680_v34 = vpop.f32.mrf.mxu2  ;;  %v1624_v37 = vpop.f32.mrf.mxu0 }
  0xb2   : > { %v1709_v35 = vpop.f32.mrf.mxu3  ;;  %v1681_v36 = vadd.f32 %v1680_v34, %v1652_v29  ;;  %v1653_v38 = vpop.f32.mrf.mxu1 }
  0xb3   : > { %v1654_v39 = vadd.f32 %v1653_v38, %v1624_v37 }
  0xb4   : > { %v4316_v40 = vadd.f32 %v1709_v35, %v1681_v36 }
  0xb9   : > { %v1682_v53 = vpop.f32.mrf.mxu2  ;;  %v1627_v58 = vpop.f32.mrf.mxu0 }
  0xba   : > { %v1711_v54 = vpop.f32.mrf.mxu3  ;;  %v1683_v57 = vadd.f32 %v1682_v53, %v1654_v39  ;;  %v1656_v59 = vpop.f32.mrf.mxu1  ;;  %v2899_v53 = vor.u32 %v3506_v44, %v2898_v43  ;;  %v2796_v43 = vld [vmem:[%s4892_s0 + $0xf8] sm:$0xf0] }
  0xbb   : > { %v1657_v62 = vadd.f32 %v1656_v59, %v1627_v58  ;;  %v2907_v58 = vor.u32 %v3507_v48, %v2906_v47  ;;  %v2911_v59 = vor.u32 %v3499_v49, %v2908_v50 }
  0xbc   : > { %v4354_v63 = vadd.f32 %v1711_v54, %v1683_v57  ;;  %1858 = vmatmul.bf16.gmra.mxu0 %v2771_v55  ;;  %v2903_v54 = vor.u32 %v3498_v45, %v2900_v46 }
  0xbd   : > { %1887 = vmatmul.bf16.gmra.mxu1 %v2775_v56 }
  0xbe   : > { %1916 = vmatmul.bf16.gmra.mxu2 %v2779_v60 }
  0xbf   : > { %1945 = vmatmul.bf16.gmra.mxu3 %v2783_v61 }
  0xc1   : > { %v1685_v4 = vpop.f32.mrf.mxu2  ;;  %v1629_v7 = vpop.f32.mrf.mxu0 }
  0xc2   : > { %v1714_v5 = vpop.f32.mrf.mxu3  ;;  %v1686_v6 = vadd.f32 %v1685_v4, %v1657_v62  ;;  %v1658_v8 = vpop.f32.mrf.mxu1 }
  0xc3   : > { %v1659_v9 = vadd.f32 %v1658_v8, %v1629_v7  ;;  %v3460_v7 = vld [vmem:[%s4892_s0 + $0x6c] sm:$0xf0]  ;;  %v3452_v8 = vld [vmem:[%s4892_s0 + $0x34] sm:$0xf] }
  0xc4   : > { %v4368_v10 = vadd.f32 %v1714_v5, %v1686_v6  ;;  %v2722_v6 = vld [vmem:[%s4892_s0 + $0x30] sm:$0xf] }
  0xc5   : > { %v2723_v17 = vor.u32 %v3460_v7, %v2722_v6  ;;  %v3493_v6 = vld [vmem:[%s4892_s0 + $0x174] sm:$0xf0]  ;;  %v3485_v7 = vld [vmem:[%s4892_s0 + $0x13c] sm:$0xf] }
  0xc9   : > { %v1687_v23 = vpop.f32.mrf.mxu2  ;;  %v1632_v29 = vpop.f32.mrf.mxu0 }
  0xca   : > { %v1716_v24 = vpop.f32.mrf.mxu3  ;;  %v1688_v28 = vadd.f32 %v1687_v23, %v1659_v9  ;;  %v1661_v30 = vpop.f32.mrf.mxu1  ;;  %v2724_v9 = vld [vmem:[%s4892_s0 + $0x70] sm:$0xf0]  ;;  %v2735_v23 = vor.u32 %v3453_v13, %v2732_v14 }
  0xcb   : > { %v1662_v33 = vadd.f32 %v1661_v30, %v1632_v29  ;;  %v2727_v18 = vor.u32 %v3452_v8, %v2724_v9  ;;  %v2860_v8 = vld [vmem:[%s4892_s0 + $0x178] sm:$0xf0] }
  0xcc   : > { %v4409_v34 = vadd.f32 %v1716_v24, %v1688_v28  ;;  %1863 = vmatmul.bf16.gmra.mxu0 %v2835_v25 }
  0xcd   : > { %1892 = vmatmul.bf16.gmra.mxu1 %v2839_v26 }
  0xce   : > { %1921 = vmatmul.bf16.gmra.mxu2 %v2843_v31 }
  0xcf   : > { %1950 = vmatmul.bf16.gmra.mxu3 %v2847_v32 }
  0xd1   : > { %v1690_v35 = vpop.f32.mrf.mxu2  ;;  %v1634_v38 = vpop.f32.mrf.mxu0 }
  0xd2   : > { %v1719_v36 = vpop.f32.mrf.mxu3  ;;  %v1691_v37 = vadd.f32 %v1690_v35, %v1662_v33  ;;  %v1663_v39 = vpop.f32.mrf.mxu1 }
  0xd3   : > { %v1664_v41 = vadd.f32 %v1663_v39, %v1634_v38  ;;  %v2788_v38 = vld [vmem:[%s4892_s0 + $0xf0] sm:$0xf0]  ;;  %v3477_v39 = vld [vmem:[%s4892_s0 + $0xf4] sm:$0xf0] }
  0xd4   : > { %v4411_v42 = vadd.f32 %v1719_v36, %v1691_v37  ;;  %v3476_v36 = vld [vmem:[%s4892_s0 + $0xec] sm:$0xf0]  ;;  %v3468_v37 = vld [vmem:[%s4892_s0 + $0xb4] sm:$0xf] }
  0xd5   : > { %v2791_v47 = vor.u32 %v3468_v37, %v2788_v38  ;;  %v2924_v37 = vld [vmem:[%s4892_s0 + $0x1f8] sm:$0xf0] }
  0xd9   : > { %v1692_v51 = vpop.f32.mrf.mxu2  ;;  %v1637_v56 = vpop.f32.mrf.mxu0 }
  0xda   : > { %v1721_v52 = vpop.f32.mrf.mxu3  ;;  %v1693_v55 = vadd.f32 %v1692_v51, %v1664_v41  ;;  %v1666_v57 = vpop.f32.mrf.mxu1  ;;  %v3469_v41 = vld [vmem:[%s4892_s0 + $0xbc] sm:$0xf] }
  0xdb   : > { %v1667_v60 = vadd.f32 %v1666_v57, %v1637_v56 }
  0xdc   : > { %v4437_v61 = vadd.f32 %v1721_v52, %v1693_v55  ;;  %1868 = vmatmul.bf16.gmra.mxu0 %v2899_v53  ;;  %v2799_v52 = vor.u32 %v3469_v41, %v2796_v43 }
  0xdd   : > { %1897 = vmatmul.bf16.gmra.mxu1 %v2903_v54 }
  0xde   : > { %1926 = vmatmul.bf16.gmra.mxu2 %v2907_v58 }
  0xdf   : > { %1955 = vmatmul.bf16.gmra.mxu3 %v2911_v59 }
  0xe1   : > { %v1695_v62 = vpop.f32.mrf.mxu2  ;;  %v1639_v2 = vpop.f32.mrf.mxu0 }
  0xe2   : > { %v1724_v0 = vpop.f32.mrf.mxu3  ;;  %v1696_v1 = vadd.f32 %v1695_v62, %v1667_v60  ;;  %v1668_v3 = vpop.f32.mrf.mxu1 }
  0xe3   : > { %v1669_v4 = vadd.f32 %v1668_v3, %v1639_v2  ;;  %v3492_v2 = vld [vmem:[%s4892_s0 + $0x16c] sm:$0xf0]  ;;  %v3484_v3 = vld [vmem:[%s4892_s0 + $0x134] sm:$0xf] }
  0xe4   : > { %v4439_v5 = vadd.f32 %v1724_v0, %v1696_v1 }
  0xe9   : > { %v1697_v15 = vpop.f32.mrf.mxu2  ;;  %v1738_v20 = vpop.f32.mrf.mxu0 }
  0xea   : > { %v1726_v16 = vpop.f32.mrf.mxu3  ;;  %v1698_v19 = vadd.f32 %v1697_v15, %v1669_v4  ;;  %v1767_v21 = vpop.f32.mrf.mxu1  ;;  %v1739_v24 = vadd.f32 %v1738_v20, %v4316_v40  ;;  %v2786_v40 = vld [vmem:[%s4892_s0 + $0xb0] sm:$0xf]  ;;  %v2852_v4 = vld [vmem:[%s4892_s0 + $0x170] sm:$0xf0] }
  0xeb   : > { %v2787_v46 = vor.u32 %v3476_v36, %v2786_v40  ;;  %v2855_v13 = vor.u32 %v3484_v3, %v2852_v4  ;;  %v3509_v40 = vld [vmem:[%s4892_s0 + $0x1f4] sm:$0xf0]  ;;  %v3501_v36 = vld [vmem:[%s4892_s0 + $0x1bc] sm:$0xf] }
  0xec   : > { %v4466_v25 = vadd.f32 %v1726_v16, %v1698_v19  ;;  %v1768_v26 = vadd.f32 %v1767_v21, %v1739_v24  ;;  %1969 = vmatmul.bf16.vlgmr.msrb.gmra.mxu0 %v2723_v17 }
  0xed   : > { %1998 = vmatmul.bf16.vlgmr.msrb.gmra.mxu1 %v2727_v18  ;;  %v2863_v18 = vor.u32 %v3485_v7, %v2860_v8 }
  0xee   : > { %2027 = vmatmul.bf16.vlgmr.msrb.gmra.mxu2 %v2731_v22 }
  0xef   : > { %2056 = vmatmul.bf16.vlgmr.msrb.gmra.mxu3 %v2735_v23 }
  0xf1   : > { %v1796_v27 = vpop.f32.mrf.mxu2  ;;  %v1740_v30 = vpop.f32.mrf.mxu0 }
  0xf2   : > { %v1825_v28 = vpop.f32.mrf.mxu3  ;;  %v1797_v29 = vadd.f32 %v1796_v27, %v1768_v26  ;;  %v1769_v31 = vpop.f32.mrf.mxu1  ;;  %v1741_v32 = vadd.f32 %v1740_v30, %v4354_v63  ;;  %v2794_v63 = vld [vmem:[%s4892_s0 + $0xb8] sm:$0xf] }
  0xf3   : > { %v2795_v51 = vor.u32 %v3477_v39, %v2794_v63 }
  0xf4   : > { %v4469_v33 = vadd.f32 %v1825_v28, %v1797_v29  ;;  %v1770_v35 = vadd.f32 %v1769_v31, %v1741_v32  ;;  %v3508_v31 = vld [vmem:[%s4892_s0 + $0x1ec] sm:$0xf0]  ;;  %v3500_v32 = vld [vmem:[%s4892_s0 + $0x1b4] sm:$0xf] }
  0xf9   : > { %v1798_v44 = vpop.f32.mrf.mxu2  ;;  %v1743_v49 = vpop.f32.mrf.mxu0 }
  0xfa   : > { %v1827_v45 = vpop.f32.mrf.mxu3  ;;  %v1799_v48 = vadd.f32 %v1798_v44, %v1770_v35  ;;  %v1772_v50 = vpop.f32.mrf.mxu1  ;;  %v1744_v53 = vadd.f32 %v1743_v49, %v4368_v10  ;;  %v2850_v10 = vld [vmem:[%s4892_s0 + $0x130] sm:$0xf]  ;;  %v2916_v35 = vld [vmem:[%s4892_s0 + $0x1f0] sm:$0xf0] }
  0xfb   : > { %v2851_v12 = vor.u32 %v3492_v2, %v2850_v10  ;;  %v2919_v41 = vor.u32 %v3500_v32, %v2916_v35 }
  0xfc   : > { %v4496_v54 = vadd.f32 %v1827_v45, %v1799_v48  ;;  %v1773_v55 = vadd.f32 %v1772_v50, %v1744_v53  ;;  %1974 = vmatmul.bf16.gmra.mxu0 %v2787_v46 }
  0xfd   : > { %2003 = vmatmul.bf16.gmra.mxu1 %v2791_v47  ;;  %v2927_v47 = vor.u32 %v3501_v36, %v2924_v37 }
  0xfe   : > { %2032 = vmatmul.bf16.gmra.mxu2 %v2795_v51 }
  0xff   : > { %2061 = vmatmul.bf16.gmra.mxu3 %v2799_v52 }
 0x101   : > { %v1801_v56 = vpop.f32.mrf.mxu2  ;;  %v1745_v59 = vpop.f32.mrf.mxu0 }
 0x102   : > { %v1830_v57 = vpop.f32.mrf.mxu3  ;;  %v1802_v58 = vadd.f32 %v1801_v56, %v1773_v55  ;;  %v1774_v60 = vpop.f32.mrf.mxu1  ;;  %v1746_v62 = vadd.f32 %v1745_v59, %v4409_v34  ;;  %v2858_v34 = vld [vmem:[%s4892_s0 + $0x138] sm:$0xf] }
 0x103   : > { %v2859_v17 = vor.u32 %v3493_v6, %v2858_v34 }
 0x104   : > { %v4499_v0 = vadd.f32 %v1830_v57, %v1802_v58  ;;  %v1775_v1 = vadd.f32 %v1774_v60, %v1746_v62 }
 0x109   : > { %v1803_v9 = vpop.f32.mrf.mxu2  ;;  %v1748_v15 = vpop.f32.mrf.mxu0 }
 0x10a   : > { %v1832_v11 = vpop.f32.mrf.mxu3  ;;  %v1804_v14 = vadd.f32 %v1803_v9, %v1775_v1  ;;  %v1777_v16 = vpop.f32.mrf.mxu1  ;;  %v1749_v19 = vadd.f32 %v1748_v15, %v4411_v42  ;;  %v2914_v42 = vld [vmem:[%s4892_s0 + $0x1b0] sm:$0xf] }
 0x10b   : > { %v2915_v39 = vor.u32 %v3508_v31, %v2914_v42 }
 0x10c   : > { %v4526_v20 = vadd.f32 %v1832_v11, %v1804_v14  ;;  %v1778_v21 = vadd.f32 %v1777_v16, %v1749_v19  ;;  %1979 = vmatmul.bf16.gmra.mxu0 %v2851_v12 }
 0x10d   : > { %2008 = vmatmul.bf16.gmra.mxu1 %v2855_v13 }
 0x10e   : > { %2037 = vmatmul.bf16.gmra.mxu2 %v2859_v17 }
 0x10f   : > { %2066 = vmatmul.bf16.gmra.mxu3 %v2863_v18 }
 0x111   : > { %v1806_v22 = vpop.f32.mrf.mxu2  ;;  %v1750_v26 = vpop.f32.mrf.mxu0 }
 0x112   : > { %v1835_v23 = vpop.f32.mrf.mxu3  ;;  %v1807_v24 = vadd.f32 %v1806_v22, %v1778_v21  ;;  %v1779_v27 = vpop.f32.mrf.mxu1  ;;  %v1751_v28 = vadd.f32 %v1750_v26, %v4437_v61  ;;  %v2922_v61 = vld [vmem:[%s4892_s0 + $0x1b8] sm:$0xf] }
 0x113   : > { %v2923_v46 = vor.u32 %v3509_v40, %v2922_v61 }
 0x114   : > { %v4529_v29 = vadd.f32 %v1835_v23, %v1807_v24  ;;  %v1780_v30 = vadd.f32 %v1779_v27, %v1751_v28 }
 0x119   : > { %v1808_v38 = vpop.f32.mrf.mxu2  ;;  %v1753_v44 = vpop.f32.mrf.mxu0 }
 0x11a   : > { %v1837_v63 = vpop.f32.mrf.mxu3  ;;  %v1809_v43 = vadd.f32 %v1808_v38, %v1780_v30  ;;  %v1782_v45 = vpop.f32.mrf.mxu1  ;;  %v1754_v48 = vadd.f32 %v1753_v44, %v4439_v5 }
 0x11c   : > { %v1838_v49 = vadd.f32 %v1837_v63, %v1809_v43  ;;  %v1783_v50 = vadd.f32 %v1782_v45, %v1754_v48  ;;  %1984 = vmatmul.bf16.gmra.mxu0 %v2915_v39 }
 0x11d   : > { %2013 = vmatmul.bf16.gmra.mxu1 %v2919_v41 }
 0x11e   : > { %2042 = vmatmul.bf16.gmra.mxu2 %v2923_v46 }
 0x11f   : > { %2071 = vmatmul.bf16.gmra.mxu3 %v2927_v47 }
 0x121   : > { %v1811_v51 = vpop.f32.mrf.mxu2  ;;  %v1755_v55 = vpop.f32.mrf.mxu0 }
 0x122   : > { %v1840_v52 = vpop.f32.mrf.mxu3  ;;  %v1812_v53 = vadd.f32 %v1811_v51, %v1783_v50  ;;  %v1784_v56 = vpop.f32.mrf.mxu1  ;;  %v1756_v57 = vadd.f32 %v1755_v55, %v4466_v25 }
 0x124   : > { %v1841_v58 = vadd.f32 %v1840_v52, %v1812_v53  ;;  %v1785_v59 = vadd.f32 %v1784_v56, %v1756_v57 }
 0x129   : > { %v1813_v60 = vpop.f32.mrf.mxu2  ;;  %v1854_v5 = vpop.f32.mrf.mxu0 }
 0x12a   : > { %v1842_v62 = vpop.f32.mrf.mxu3  ;;  %v1814_v1 = vadd.f32 %v1813_v60, %v1785_v59  ;;  %v1883_v10 = vpop.f32.mrf.mxu1  ;;  %v1855_v2 = vadd.f32 %v1854_v5, %v4469_v33 }
 0x12c   : > { %v4558_v3 = vadd.f32 %v1842_v62, %v1814_v1  ;;  %v1884_v4 = vadd.f32 %v1883_v10, %v1855_v2 }
 0x131   : > { %v1912_v34 = vpop.f32.mrf.mxu2  ;;  %v1856_v8 = vpop.f32.mrf.mxu0 }
 0x132   : > { %v1941_v6 = vpop.f32.mrf.mxu3  ;;  %v1913_v7 = vadd.f32 %v1912_v34, %v1884_v4  ;;  %v1885_v9 = vpop.f32.mrf.mxu1  ;;  %v1857_v25 = vadd.f32 %v1856_v8, %v4496_v54 }
 0x134   : > { %v1942_v11 = vadd.f32 %v1941_v6, %v1913_v7  ;;  %v1886_v12 = vadd.f32 %v1885_v9, %v1857_v25 }
 0x139   : > { %v1914_v13 = vpop.f32.mrf.mxu2  ;;  %v1859_v16 = vpop.f32.mrf.mxu0 }
 0x13a   : > { %v1943_v14 = vpop.f32.mrf.mxu3  ;;  %v1915_v15 = vadd.f32 %v1914_v13, %v1886_v12  ;;  %v1888_v17 = vpop.f32.mrf.mxu1  ;;  %v1860_v33 = vadd.f32 %v1859_v16, %v4499_v0 }
 0x13c   : > { %v1944_v18 = vadd.f32 %v1943_v14, %v1915_v15  ;;  %v1889_v19 = vadd.f32 %v1888_v17, %v1860_v33 }
 0x141   : > { %v1917_v21 = vpop.f32.mrf.mxu2  ;;  %v1861_v24 = vpop.f32.mrf.mxu0 }
 0x142   : > { %v1946_v22 = vpop.f32.mrf.mxu3  ;;  %v1918_v23 = vadd.f32 %v1917_v21, %v1889_v19  ;;  %v1890_v26 = vpop.f32.mrf.mxu1  ;;  %v1862_v27 = vadd.f32 %v1861_v24, %v4526_v20 }
 0x144   : > { %v1947_v28 = vadd.f32 %v1946_v22, %v1918_v23  ;;  %v1891_v54 = vadd.f32 %v1890_v26, %v1862_v27 }
 0x149   : > { %v1919_v30 = vpop.f32.mrf.mxu2  ;;  %v1864_v32 = vpop.f32.mrf.mxu0 }
 0x14a   : > { %v1948_v42 = vpop.f32.mrf.mxu3  ;;  %v1920_v31 = vadd.f32 %v1919_v30, %v1891_v54  ;;  %v1893_v35 = vpop.f32.mrf.mxu1  ;;  %v1865_v61 = vadd.f32 %v1864_v32, %v4529_v29 }
 0x14c   : > { %v1949_v40 = vadd.f32 %v1948_v42, %v1920_v31  ;;  %v1894_v0 = vadd.f32 %v1893_v35, %v1865_v61 }
 0x151   : > { %v1922_v36 = vpop.f32.mrf.mxu2  ;;  %v1866_v63 = vpop.f32.mrf.mxu0 }
 0x152   : > { %v1951_v37 = vpop.f32.mrf.mxu3  ;;  %v1923_v38 = vadd.f32 %v1922_v36, %v1894_v0  ;;  %v1895_v39 = vpop.f32.mrf.mxu1  ;;  %v1867_v41 = vadd.f32 %v1866_v63, %v1838_v49 }
 0x154   : > { %v1952_v43 = vadd.f32 %v1951_v37, %v1923_v38  ;;  %v1896_v44 = vadd.f32 %v1895_v39, %v1867_v41 }
 0x159   : > { %v1924_v20 = vpop.f32.mrf.mxu2  ;;  %v1869_v47 = vpop.f32.mrf.mxu0 }
 0x15a   : > { %v1953_v45 = vpop.f32.mrf.mxu3  ;;  %v1925_v46 = vadd.f32 %v1924_v20, %v1896_v44  ;;  %v1898_v48 = vpop.f32.mrf.mxu1  ;;  %v1870_v50 = vadd.f32 %v1869_v47, %v1841_v58 }
 0x15c   : > { %v1954_v51 = vadd.f32 %v1953_v45, %v1925_v46  ;;  %v1899_v52 = vadd.f32 %v1898_v48, %v1870_v50 }
 0x161   : > { %v1927_v53 = vpop.f32.mrf.mxu2  ;;  %v1871_v56 = vpop.f32.mrf.mxu0 }
 0x162   : > { %v1956_v29 = vpop.f32.mrf.mxu3  ;;  %v1928_v55 = vadd.f32 %v1927_v53, %v1899_v52  ;;  %v1900_v57 = vpop.f32.mrf.mxu1 }
 0x164   : > { %v1957_v59 = vadd.f32 %v1956_v29, %v1928_v55 }
 0x169   : > { %v1929_v60 = vpop.f32.mrf.mxu2  ;;  %v1970_v1 = vpop.f32.mrf.mxu0 }
 0x16a   : > { %v1958_v62 = vpop.f32.mrf.mxu3  ;;  %v1999_v49 = vpop.f32.mrf.mxu1  ;;  %v1971_v5 = vadd.f32 %v1970_v1, %v1942_v11 }
 0x16c   : > { %v2000_v10 = vadd.f32 %v1999_v49, %v1971_v5 }
 0x171   : > { %v2028_v2 = vpop.f32.mrf.mxu2  ;;  %v1972_v6 = vpop.f32.mrf.mxu0 }
 0x172   : > { %v2057_v4 = vpop.f32.mrf.mxu3  ;;  %v2029_v34 = vadd.f32 %v2028_v2, %v2000_v10  ;;  %v2001_v7 = vpop.f32.mrf.mxu1  ;;  %v1973_v8 = vadd.f32 %v1972_v6, %v1944_v18 }
 0x174   : > { %v4565_v58 = vadd.f32 %v2057_v4, %v2029_v34  ;;  %v2002_v9 = vadd.f32 %v2001_v7, %v1973_v8 }
 0x179   : > { %v2030_v25 = vpop.f32.mrf.mxu2  ;;  %v1975_v14 = vpop.f32.mrf.mxu0 }
 0x17a   : > { %v2059_v12 = vpop.f32.mrf.mxu3  ;;  %v2031_v13 = vadd.f32 %v2030_v25, %v2002_v9  ;;  %v2004_v15 = vpop.f32.mrf.mxu1  ;;  %v1976_v17 = vadd.f32 %v1975_v14, %v1947_v28 }
 0x17c   : > { %v4567_v16 = vadd.f32 %v2059_v12, %v2031_v13  ;;  %v2005_v33 = vadd.f32 %v2004_v15, %v1976_v17 }
 0x181   : > { %v2033_v11 = vpop.f32.mrf.mxu2  ;;  %v1977_v22 = vpop.f32.mrf.mxu0 }
 0x182   : > { %v2062_v19 = vpop.f32.mrf.mxu3  ;;  %v2034_v21 = vadd.f32 %v2033_v11, %v2005_v33  ;;  %v2006_v23 = vpop.f32.mrf.mxu1  ;;  %v1978_v26 = vadd.f32 %v1977_v22, %v1949_v40  ;;  %v1872_v40 = vadd.f32 %v1871_v56, %v4558_v3 }
 0x184   : > { %v4569_v24 = vadd.f32 %v2062_v19, %v2034_v21  ;;  %v2007_v27 = vadd.f32 %v2006_v23, %v1978_v26  ;;  %v1901_v47 = vadd.f32 %v1900_v57, %v1872_v40 }
 0x186   : > { %v1930_v52 = vadd.f32 %v1929_v60, %v1901_v47 }
 0x188   : > { %v1959_v1 = vadd.f32 %v1958_v62, %v1930_v52 }
 0x189   : > { %v2035_v18 = vpop.f32.mrf.mxu2  ;;  %v1980_v42 = vpop.f32.mrf.mxu0 }
 0x18a   : > { %v2064_v54 = vpop.f32.mrf.mxu3  ;;  %v2036_v30 = vadd.f32 %v2035_v18, %v2007_v27  ;;  %v2009_v31 = vpop.f32.mrf.mxu1  ;;  %v1981_v35 = vadd.f32 %v1980_v42, %v1952_v43 }
 0x18c   : > { %v4571_v32 = vadd.f32 %v2064_v54, %v2036_v30  ;;  %v2010_v61 = vadd.f32 %v2009_v31, %v1981_v35 }
 0x191   : > { %v2038_v28 = vpop.f32.mrf.mxu2  ;;  %v1982_v37 = vpop.f32.mrf.mxu0 }
 0x192   : > { %v2067_v0 = vpop.f32.mrf.mxu3  ;;  %v2039_v36 = vadd.f32 %v2038_v28, %v2010_v61  ;;  %v2011_v38 = vpop.f32.mrf.mxu1  ;;  %v1983_v39 = vadd.f32 %v1982_v37, %v1954_v51 }
 0x194   : > { %v4573_v63 = vadd.f32 %v2067_v0, %v2039_v36  ;;  %v2012_v41 = vadd.f32 %v2011_v38, %v1983_v39 }
 0x199   : > { %v2040_v44 = vpop.f32.mrf.mxu2  ;;  %v1985_v46 = vpop.f32.mrf.mxu0 }
 0x19a   : > { %v2069_v20 = vpop.f32.mrf.mxu3  ;;  %v2041_v45 = vadd.f32 %v2040_v44, %v2012_v41  ;;  %v1986_v43 = vadd.f32 %v1985_v46, %v1957_v59  ;;  %v2014_v50 = vpop.f32.mrf.mxu1  ;;  %v3708_v59 = vmov (%p2077_p4), 0.0  }
 0x19b   : > { %2084 = vst.msk [vmem:[#allocation2] sm:$0xff] (%p2077_p4), %vm2083_vm0, %v3708_v59 }
 0x19c   : > { %v4576_v48 = vadd.f32 %v2069_v20, %v2041_v45  ;;  %v2015_v53 = vadd.f32 %v2014_v50, %v1986_v43  ;;  %2085 = vst.msk [vmem:[#allocation2 + $0x8] sm:$0xff] (%p2077_p4), %vm2083_vm0, %v3708_v59 }
 0x19d   : > { %2086 = vst.msk [vmem:[#allocation2 + $0x10] sm:$0xff] (%p2077_p4), %vm2083_vm0, %v3708_v59 }
 0x19e   : > { %2087 = vst.msk [vmem:[#allocation2 + $0x18] sm:$0xff] (%p2077_p4), %vm2083_vm0, %v3708_v59 }
 0x19f   : > { %2088 = vst.msk [vmem:[#allocation2 + $0x20] sm:$0xff] (%p2077_p4), %vm2083_vm0, %v3708_v59 }
 0x1a0   : > { %2089 = vst.msk [vmem:[#allocation2 + $0x28] sm:$0xff] (%p2077_p4), %vm2083_vm0, %v3708_v59 }
 0x1a1   : > { %v2043_v29 = vpop.f32.mrf.mxu2  ;;  %v1987_v5 = vpop.f32.mrf.mxu0  ;;  %2090 = vst.msk [vmem:[#allocation2 + $0x30] sm:$0xff] (%p2077_p4), %vm2083_vm0, %v3708_v59 }
 0x1a2   : > { %v2072_v55 = vpop.f32.mrf.mxu3  ;;  %v2044_v49 = vadd.f32 %v2043_v29, %v2015_v53  ;;  %v1988_v3 = vadd.f32 %v1987_v5, %v1959_v1  ;;  %v2016_v56 = vpop.f32.mrf.mxu1  ;;  %2091 = vst.msk [vmem:[#allocation2 + $0x38] sm:$0xff] (%p2077_p4), %vm2083_vm0, %v3708_v59 }
 0x1a3   : > { %2092 = vst.msk [vmem:[#allocation3] sm:$0xff] (%p2077_p4), %vm2083_vm0, %v3708_v59 }
 0x1a4   : > { %v4578_v51 = vadd.f32 %v2072_v55, %v2044_v49  ;;  %v2017_v10 = vadd.f32 %v2016_v56, %v1988_v3  ;;  %2093 = vst.msk [vmem:[#allocation3 + $0x8] sm:$0xff] (%p2077_p4), %vm2083_vm0, %v3708_v59 }
 0x1a5   : > { %2094 = vst.msk [vmem:[#allocation3 + $0x10] sm:$0xff] (%p2077_p4), %vm2083_vm0, %v3708_v59 }
 0x1a6   : > { %2095 = vst.msk [vmem:[#allocation3 + $0x18] sm:$0xff] (%p2077_p4), %vm2083_vm0, %v3708_v59 }
 0x1a7   : > { %2096 = vst.msk [vmem:[#allocation3 + $0x20] sm:$0xff] (%p2077_p4), %vm2083_vm0, %v3708_v59 }
 0x1a8   : > { %2082 = sbr.rel (!%p2077_p4) target bundleno = 429 (0x1ad), region = 40  ;;  %2097 = vst.msk [vmem:[#allocation3 + $0x28] sm:$0xff] (%p2077_p4), %vm2083_vm0, %v3708_v59 }
 0x1a9   : > { %v2045_v2 = vpop.f32.mrf.mxu2  ;;  %2098 = vst.msk [vmem:[#allocation3 + $0x30] sm:$0xff] (%p2077_p4), %vm2083_vm0, %v3708_v59 }
 0x1aa   : > { %v2046_v4 = vadd.f32 %v2045_v2, %v2017_v10  ;;  %v2074_v34 = vpop.f32.mrf.mxu3  ;;  %2099 = vst.msk [vmem:[#allocation3 + $0x38] sm:$0xff] (%p2077_p4), %vm2083_vm0, %v3708_v59 }
 0x1ac   : > { %v4580_v57 = vadd.f32 %v2074_v34, %v2046_v4 }
 0x1ad PF: > { %p3441_p5 = scmp.ne.s32.totalorder %s3698_s15, 0 }
 0x1af   : > { %2102 = sbr.rel (%p3441_p5) target bundleno = 597 (0x255), region = 44 }
 0x1b4   : > { %vm2111_vm1 = vcmask 15360   ;;  %v2161_v25 = vmul.f32 %v4565_v58, %v4565_v58  ;;  %v2162_v15 = vmul.f32 %v4567_v16, %v4567_v16  ;;  %v2164_v17 = vmul.f32 %v4571_v32, %v4571_v32  ;;  %v2103_v31 = vld [vmem:[#allocation2] sm:$0xff]  ;;  %v2105_v61 = vld [vmem:[#allocation2 + $0x10] sm:$0xff]  ;;  %v2104_v40 = vld [vmem:[#allocation2 + $0x8] sm:$0xff] }
 0x1b5   : > { %v2112_v60 = vsel %vm2111_vm1, %v4565_v58, 0.0  ;;  %2209 = vst.msk [vmem:[%s4896_s4] sm:$0xff] %vm2111_vm1, %v4565_v58  ;;  %v2124_v62 = vsel %vm2111_vm1, %v4573_v63, 0.0  ;;  %v2118_v6 = vsel %vm2111_vm1, %v4569_v24, 0.0  ;;  %v2115_v7 = vsel %vm2111_vm1, %v4567_v16, 0.0  ;;  %v2107_v35 = vld [vmem:[#allocation2 + $0x20] sm:$0xff] }
 0x1b6   : > { %2210 = vst.msk [vmem:[%s4896_s4 + $0x8] sm:$0xff] %vm2111_vm1, %v4567_v16  ;;  %2113 = vadd.xlane.f32.xlu0 %v2112_v60  ;;  %2125 = vadd.xlane.f32.xlu2 %v2124_v62  ;;  %v2127_v8 = vsel %vm2111_vm1, %v4576_v48, 0.0  ;;  %v2121_v9 = vsel %vm2111_vm1, %v4571_v32, 0.0  ;;  %v2130_v12 = vsel %vm2111_vm1, %v4578_v51, 0.0  ;;  %v2169_v13 = vsel %vm2111_vm1, %v2161_v25, 0.0  ;;  %v2108_v41 = vld [vmem:[#allocation2 + $0x28] sm:$0xff] }
 0x1b7   : > { %2211 = vst.msk [vmem:[%s4896_s4 + $0x10] sm:$0xff] %vm2111_vm1, %v4569_v24  ;;  %2119 = vadd.xlane.f32.xlu1 %v2118_v6  ;;  %v2133_v14 = vsel %vm2111_vm1, %v4580_v57, 0.0  ;;  %v2163_v33 = vmul.f32 %v4569_v24, %v4569_v24  ;;  %v2172_v11 = vsel %vm2111_vm1, %v2162_v15, 0.0  ;;  %v2178_v19 = vsel %vm2111_vm1, %v2164_v17, 0.0  ;;  %v2106_v44 = vld [vmem:[#allocation2 + $0x18] sm:$0xff]  ;;  %v2109_v52 = vld [vmem:[#allocation2 + $0x30] sm:$0xff] }
 0x1b8   : > { %2212 = vst.msk [vmem:[%s4896_s4 + $0x18] sm:$0xff] %vm2111_vm1, %v4571_v32  ;;  %v2165_v22 = vmul.f32 %v4573_v63, %v4573_v63  ;;  %v2167_v23 = vmul.f32 %v4578_v51, %v4578_v51  ;;  %v2166_v26 = vmul.f32 %v4576_v48, %v4576_v48  ;;  %v2168_v30 = vmul.f32 %v4580_v57, %v4580_v57  ;;  %v2153_v53 = vld [vmem:[#allocation3] sm:$0xff]  ;;  %v2110_v29 = vld [vmem:[#allocation2 + $0x38] sm:$0xff]  ;;  %v2154_v10 = vld [vmem:[#allocation3 + $0x8] sm:$0xff] }
 0x1b9   : > { %2213 = vst.msk [vmem:[%s4896_s4 + $0x20] sm:$0xff] %vm2111_vm1, %v4573_v63  ;;  %v2175_v21 = vsel %vm2111_vm1, %v2163_v33, 0.0  ;;  %vm2144_vm2 = vcmask 7168   ;;  %v2156_v2 = vld [vmem:[#allocation3 + $0x18] sm:$0xff]  ;;  %v2155_v4 = vld [vmem:[#allocation3 + $0x10] sm:$0xff]  ;;  %v2158_v25 = vld [vmem:[#allocation3 + $0x28] sm:$0xff] }
 0x1ba   : > { %2214 = vst.msk [vmem:[%s4896_s4 + $0x28] sm:$0xff] %vm2111_vm1, %v4576_v48  ;;  %v2181_v27 = vsel %vm2111_vm1, %v2165_v22, 0.0  ;;  %v2187_v18 = vsel %vm2111_vm1, %v2167_v23, 0.0  ;;  %v2184_v54 = vsel %vm2111_vm1, %v2166_v26, 0.0  ;;  %v2190_v42 = vsel %vm2111_vm1, %v2168_v30, 0.0 }
 0x1bb   : > { %2215 = vst.msk [vmem:[%s4896_s4 + $0x30] sm:$0xff] %vm2111_vm1, %v4578_v51 }
 0x1bc   : > { %2216 = vst.msk [vmem:[%s4896_s4 + $0x38] sm:$0xff] %vm2111_vm1, %v4580_v57 }
 0x1be   : > { %2116 = vadd.xlane.f32.xlu0 %v2115_v7  ;;  %2128 = vadd.xlane.f32.xlu2 %v2127_v8  ;;  %v2157_v8 = vld [vmem:[#allocation3 + $0x20] sm:$0xff] }
 0x1bf   : > { %2122 = vadd.xlane.f32.xlu1 %v2121_v9  ;;  %v2159_v9 = vld [vmem:[#allocation3 + $0x30] sm:$0xff] }
 0x1c6   : > { %2131 = vadd.xlane.f32.xlu0 %v2130_v12  ;;  %2170 = vadd.xlane.f32.xlu2 %v2169_v13 }
 0x1c7   : > { %2134 = vadd.xlane.f32.xlu1 %v2133_v14 }
 0x1ce   : > { %2173 = vadd.xlane.f32.xlu0 %v2172_v11  ;;  %2179 = vadd.xlane.f32.xlu2 %v2178_v19  ;;  %v2160_v11 = vld [vmem:[#allocation3 + $0x38] sm:$0xff] }
 0x1cf   : > { %2176 = vadd.xlane.f32.xlu1 %v2175_v21 }
 0x1d6   : > { %2182 = vadd.xlane.f32.xlu0 %v2181_v27  ;;  %2188 = vadd.xlane.f32.xlu2 %v2187_v18 }
 0x1d7   : > { %2185 = vadd.xlane.f32.xlu1 %v2184_v54 }
 0x1de   : > { %2191 = vadd.xlane.f32.xlu0 %v2190_v42 }
 0x229   : > { %v2114_v28 = vpop.xlane.xlu0 %2113  ;;  %v2126_v0 = vpop.xlane.xlu2 %2125 }
 0x22a   : > { %v2136_v36 = vadd.f32 %v2114_v28, %v2103_v31  ;;  %v2140_v37 = vadd.f32 %v2126_v0, %v2107_v35  ;;  %v2120_v38 = vpop.xlane.xlu1 %2119 }
 0x22b   : > { %v2138_v39 = vadd.f32 %v2120_v38, %v2105_v61 }
 0x22c   : > { %2145 = vst.msk [vmem:[#allocation2] sm:$0xff] %vm2144_vm2, %v2136_v36 }
 0x22d   : > { %2149 = vst.msk [vmem:[#allocation2 + $0x20] sm:$0xff] %vm2144_vm2, %v2140_v37 }
 0x22e   : > { %2147 = vst.msk [vmem:[#allocation2 + $0x10] sm:$0xff] %vm2144_vm2, %v2138_v39 }
 0x231   : > { %v2117_v20 = vpop.xlane.xlu0 %2116  ;;  %v2129_v45 = vpop.xlane.xlu2 %2128 }
 0x232   : > { %v2137_v46 = vadd.f32 %v2117_v20, %v2104_v40  ;;  %v2141_v47 = vadd.f32 %v2129_v45, %v2108_v41  ;;  %v2123_v43 = vpop.xlane.xlu1 %2122 }
 0x233   : > { %v2139_v50 = vadd.f32 %v2123_v43, %v2106_v44 }
 0x234   : > { %2146 = vst.msk [vmem:[#allocation2 + $0x8] sm:$0xff] %vm2144_vm2, %v2137_v46 }
 0x235   : > { %2150 = vst.msk [vmem:[#allocation2 + $0x28] sm:$0xff] %vm2144_vm2, %v2141_v47 }
 0x236   : > { %2148 = vst.msk [vmem:[#allocation2 + $0x18] sm:$0xff] %vm2144_vm2, %v2139_v50 }
 0x239   : > { %v2132_v55 = vpop.xlane.xlu0 %2131  ;;  %v2171_v1 = vpop.xlane.xlu2 %2170 }
 0x23a   : > { %v2142_v49 = vadd.f32 %v2132_v55, %v2109_v52  ;;  %v2193_v5 = vadd.f32 %v2171_v1, %v2153_v53  ;;  %v2135_v3 = vpop.xlane.xlu1 %2134 }
 0x23b   : > { %v2143_v56 = vadd.f32 %v2135_v3, %v2110_v29 }
 0x23c   : > { %2151 = vst.msk [vmem:[#allocation2 + $0x30] sm:$0xff] %vm2144_vm2, %v2142_v49 }
 0x23d   : > { %2201 = vst.msk [vmem:[#allocation3] sm:$0xff] %vm2144_vm2, %v2193_v5 }
 0x23e   : > { %2152 = vst.msk [vmem:[#allocation2 + $0x38] sm:$0xff] %vm2144_vm2, %v2143_v56 }
 0x241   : > { %v2174_v34 = vpop.xlane.xlu0 %2173  ;;  %v2180_v59 = vpop.xlane.xlu2 %2179 }
 0x242   : > { %v2194_v60 = vadd.f32 %v2174_v34, %v2154_v10  ;;  %v2196_v62 = vadd.f32 %v2180_v59, %v2156_v2  ;;  %v2177_v6 = vpop.xlane.xlu1 %2176 }
 0x243   : > { %v2195_v7 = vadd.f32 %v2177_v6, %v2155_v4 }
 0x244   : > { %2202 = vst.msk [vmem:[#allocation3 + $0x8] sm:$0xff] %vm2144_vm2, %v2194_v60 }
 0x245   : > { %2204 = vst.msk [vmem:[#allocation3 + $0x18] sm:$0xff] %vm2144_vm2, %v2196_v62 }
 0x246   : > { %2203 = vst.msk [vmem:[#allocation3 + $0x10] sm:$0xff] %vm2144_vm2, %v2195_v7 }
 0x249   : > { %v2183_v12 = vpop.xlane.xlu0 %2182  ;;  %v2189_v13 = vpop.xlane.xlu2 %2188 }
 0x24a   : > { %v2197_v14 = vadd.f32 %v2183_v12, %v2157_v8  ;;  %v2199_v15 = vadd.f32 %v2189_v13, %v2159_v9  ;;  %v2186_v17 = vpop.xlane.xlu1 %2185 }
 0x24b   : > { %v2198_v33 = vadd.f32 %v2186_v17, %v2158_v25 }
 0x24c   : > { %2205 = vst.msk [vmem:[#allocation3 + $0x20] sm:$0xff] %vm2144_vm2, %v2197_v14 }
 0x24d   : > { %2207 = vst.msk [vmem:[#allocation3 + $0x30] sm:$0xff] %vm2144_vm2, %v2199_v15 }
 0x24e   : > { %2206 = vst.msk [vmem:[#allocation3 + $0x28] sm:$0xff] %vm2144_vm2, %v2198_v33 }
 0x251   : > { %v2192_v19 = vpop.xlane.xlu0 %2191 }
 0x252   : > { %v2200_v21 = vadd.f32 %v2192_v19, %v2160_v11 }
 0x254   : > { %2208 = vst.msk [vmem:[#allocation3 + $0x38] sm:$0xff] %vm2144_vm2, %v2200_v21 }
 0x255 PF: > { %p3442_p6 = scmp.ne.s32.totalorder %s3698_s15, 1 }
 0x257   : > { %2220 = sbr.rel (%p3442_p6) target bundleno = 813 (0x32d), region = 48 }
 0x25c   : > { %v2223_v22 = vld [vmem:[#allocation2 + $0x10] sm:$0xff]  ;;  %v2221_v26 = vld [vmem:[#allocation2] sm:$0xff]  ;;  %v3709_v27 = vmov 0   ;;  %v2224_v31 = vld [vmem:[#allocation2 + $0x18] sm:$0xff] }
 0x25d   : > { %v2239_v23 = vld [vmem:[#allocation3 + $0x10] sm:$0xff]  ;;  %3666 = vset.pattern.permute.xlu1 %v3709_v27  ;;  %3665 = vset.pattern.permute.xlu0 %v3709_v27  ;;  %v2231_v18 = vmul.f32 0.5, %v2223_v22  ;;  %v2229_v30 = vmul.f32 0.5, %v2221_v26  ;;  %v2237_v42 = vld [vmem:[#allocation3] sm:$0xff]  ;;  %v2240_v35 = vld [vmem:[#allocation3 + $0x18] sm:$0xff]  ;;  %v2232_v28 = vmul.f32 0.5, %v2224_v31 }
 0x25e   : > { %v2247_v54 = vmul.f32 0.5, %v2239_v23  ;;  %v2245_v61 = vmul.f32 0.5, %v2237_v42  ;;  %v2248_v0 = vmul.f32 0.5, %v2240_v35  ;;  %v2222_v36 = vld [vmem:[#allocation2 + $0x8] sm:$0xff]  ;;  %3667 = vset.pattern.permute.xlu2 %v3709_v27  ;;  %v2225_v38 = vld [vmem:[#allocation2 + $0x20] sm:$0xff]  ;;  %v2228_v45 = vld [vmem:[#allocation2 + $0x38] sm:$0xff] }
 0x25f   : > { %v2238_v37 = vld [vmem:[#allocation3 + $0x8] sm:$0xff]  ;;  %2289 = vperm.xlu1 %3666, %v2231_v18   ;;  %v2255_v39 = vmul.f32 %v2231_v18, %v2231_v18  ;;  %2279 = vperm.xlu0 %3665, %v2229_v30   ;;  %v2253_v40 = vmul.f32 %v2229_v30, %v2229_v30  ;;  %v2230_v41 = vmul.f32 0.5, %v2222_v36  ;;  %v2241_v20 = vld [vmem:[#allocation3 + $0x20] sm:$0xff]  ;;  %v2244_v46 = vld [vmem:[#allocation3 + $0x38] sm:$0xff]  ;;  %v2256_v47 = vmul.f32 %v2232_v28, %v2232_v28 }
 0x260   : > { %v2246_v44 = vmul.f32 0.5, %v2238_v37  ;;  %v2233_v43 = vmul.f32 0.5, %v2225_v38  ;;  %v2249_v50 = vmul.f32 0.5, %v2241_v20  ;;  %v2236_v52 = vmul.f32 0.5, %v2228_v45  ;;  %v2227_v53 = vld [vmem:[#allocation2 + $0x30] sm:$0xff]  ;;  %v2226_v4 = vld [vmem:[#allocation2 + $0x28] sm:$0xff] }
 0x261   : > { %v2243_v29 = vld [vmem:[#allocation3 + $0x30] sm:$0xff]  ;;  %v2263_v55 = vsub.f32 %v2247_v54, %v2255_v39  ;;  %v2261_v1 = vsub.f32 %v2245_v61, %v2253_v40  ;;  %v2254_v49 = vmul.f32 %v2230_v41, %v2230_v41  ;;  %v2252_v5 = vmul.f32 0.5, %v2244_v46  ;;  %v2242_v25 = vld [vmem:[#allocation3 + $0x28] sm:$0xff] }
 0x262   : > { %v2264_v3 = vsub.f32 %v2248_v0, %v2256_v47  ;;  %2299 = vperm.xlu2 %3667, %v2233_v43   ;;  %v2257_v56 = vmul.f32 %v2233_v43, %v2233_v43  ;;  %v2260_v10 = vmul.f32 %v2236_v52, %v2236_v52  ;;  %v2235_v2 = vmul.f32 0.5, %v2227_v53 }
 0x263   : > { %v2271_v34 = vmax.f32 %v2263_v55, 0.0  ;;  %v2269_v59 = vmax.f32 %v2261_v1, 0.0  ;;  %v2262_v60 = vsub.f32 %v2246_v44, %v2254_v49  ;;  %v2251_v62 = vmul.f32 0.5, %v2243_v29 }
 0x264   : > { %v2272_v6 = vmax.f32 %v2264_v3, 0.0  ;;  %v2265_v7 = vsub.f32 %v2249_v50, %v2257_v56  ;;  %v2268_v8 = vsub.f32 %v2252_v5, %v2260_v10  ;;  %v2259_v9 = vmul.f32 %v2235_v2, %v2235_v2 }
 0x265   : > { %v2327_v12 = vadd.f32 1e-05, %v2271_v34  ;;  %v4698_v13 = vadd.f32 1e-05, %v2269_v59  ;;  %v2270_v14 = vmax.f32 %v2262_v60, 0.0  ;;  %v2234_v15 = vmul.f32 0.5, %v2226_v4 }
 0x266   : > { %v4700_v17 = vadd.f32 1e-05, %v2272_v6  ;;  %v2273_v33 = vmax.f32 %v2265_v7, 0.0  ;;  %v2276_v11 = vmax.f32 %v2268_v8, 0.0  ;;  %v2267_v19 = vsub.f32 %v2251_v62, %v2259_v9 }
 0x267   : > { %3668 = vrsqrt.f32 %v2327_v12  ;;  %2294 = vperm.xlu1 %3666, %v2232_v28   ;;  %v4702_v21 = vadd.f32 1e-05, %v2270_v14  ;;  %2284 = vperm.xlu0 %3665, %v2230_v41   ;;  %v2250_v22 = vmul.f32 0.5, %v2242_v25  ;;  %v2258_v23 = vmul.f32 %v2234_v15, %v2234_v15 }
 0x268   : > { %3670 = vrsqrt.f32 %v4698_v13  ;;  %v4705_v26 = vadd.f32 1e-05, %v2273_v33  ;;  %v4707_v27 = vadd.f32 1e-05, %v2276_v11  ;;  %v2275_v18 = vmax.f32 %v2267_v19, 0.0 }
 0x269   : > { %3672 = vrsqrt.f32 %v4700_v17  ;;  %v2266_v54 = vsub.f32 %v2250_v22, %v2258_v23  ;;  %vm2359_vm3 = vweird.f32 %v2327_v12  ;;  %vm2349_vm4 = vweird.f32 %v4702_v21 }
 0x26a   : > { %3674 = vrsqrt.f32 %v4702_v21  ;;  %v4711_v30 = vadd.f32 1e-05, %v2275_v18  ;;  %2304 = vperm.xlu2 %3667, %v2234_v15   ;;  %vm2339_vm6 = vweird.f32 %v4698_v13  ;;  %vm2369_vm11 = vweird.f32 %v4700_v17 }
 0x26b   : > { %3676 = vrsqrt.f32 %v4705_v26  ;;  %v2274_v42 = vmax.f32 %v2266_v54, 0.0  ;;  %vm2379_vm0 = vweird.f32 %v4705_v26 }
 0x26c   : > { %3678 = vrsqrt.f32 %v4707_v27 }
 0x26d   : > { %v3669_v31 = vpop.eup %3668  ;;  %3680 = vrsqrt.f32 %v4711_v30  ;;  %v4716_v35 = vadd.f32 1e-05, %v2274_v42 }
 0x26e   : > { %v3671_v61 = vpop.eup %3670  ;;  %v2354_v28 = vmul.f32 %v3669_v31, %v2327_v12  ;;  %vm2360_vm5 = vweird.f32 %v3669_v31 }
 0x26f   : > { %v4718_v0 = vpop.eup %3672  ;;  %v2334_v36 = vmul.f32 %v3671_v61, %v4698_v13  ;;  %2314 = vperm.xlu1 %3666, %v2236_v52   ;;  %2309 = vperm.xlu0 %3665, %v2235_v2   ;;  %3682 = vrsqrt.f32 %v4716_v35  ;;  %vm2340_vm7 = vweird.f32 %v3671_v61  ;;  %vm4740_vm8 = vmor %vm2359_vm3, %vm2360_vm5  ;;  %vm2389_vm14 = vweird.f32 %v4716_v35 }
 0x270   : > { %v3675_v37 = vpop.eup %3674  ;;  %v2355_v38 = vmul.f32 %v3669_v31, %v2354_v28  ;;  %v2364_v39 = vmul.f32 %v4718_v0, %v4700_v17  ;;  %vm4746_vm10 = vmor %vm2339_vm6, %vm2340_vm7  ;;  %vm2370_vm13 = vweird.f32 %v4718_v0  ;;  %vm2399_vm5 = vweird.f32 %v4711_v30 }
 0x271   : > { %v4724_v40 = vpop.eup %3676  ;;  %v2344_v41 = vmul.f32 %v3675_v37, %v4702_v21  ;;  %v2335_v44 = vmul.f32 %v3671_v61, %v2334_v36  ;;  %vm2350_vm9 = vweird.f32 %v3675_v37  ;;  %vm2371_vm2 = vmor %vm2369_vm11, %vm2370_vm13  ;;  %vm2409_vm7 = vweird.f32 %v4707_v27 }
 0x272   : > { %v4728_v20 = vpop.eup %3678  ;;  %v2374_v45 = vmul.f32 %v4724_v40, %v4705_v26  ;;  %v2356_v46 = vmul.f32 0.5, %v2355_v38  ;;  %v2365_v47 = vmul.f32 %v4718_v0, %v2364_v39  ;;  %vm4756_vm12 = vmor %vm2349_vm4, %vm2350_vm9  ;;  %vm2380_vm1 = vweird.f32 %v4724_v40  ;;  %v2463_v38 = vld [vmem:[%s4894_s2 + $0x10] sm:$0xff] }
 0x273   : > { %v4733_v43 = vpop.eup %3680  ;;  %v2345_v50 = vmul.f32 %v3675_v37, %v2344_v41  ;;  %v2336_v52 = vmul.f32 0.5, %v2335_v44  ;;  %v2404_v10 = vmul.f32 %v4728_v20, %v4707_v27  ;;  %vm2381_vm4 = vmor %vm2379_vm0, %vm2380_vm1  ;;  %v2464_v27 = vld [vmem:[%s4894_s2 + $0x18] sm:$0xff]  ;;  %v2467_v39 = vld [vmem:[%s4894_s2 + $0x30] sm:$0xff]  ;;  %vm2597_vm11 = vcmask 15360  }
 0x274   : > { %v2357_v53 = vsub.f32 1.5, %v2356_v46  ;;  %v2375_v29 = vmul.f32 %v4724_v40, %v2374_v45  ;;  %v2366_v55 = vmul.f32 0.5, %v2365_v47  ;;  %v2394_v1 = vmul.f32 %v4733_v43, %v4711_v30  ;;  %v2466_v41 = vld [vmem:[%s4894_s2 + $0x28] sm:$0xff]  ;;  %v2517_v45 = vld [vmem:[%s4895_s3] sm:$0xff]  ;;  %v2519_v47 = vld [vmem:[%s4895_s3 + $0x10] sm:$0xff] }
 0x275   : > { %v3683_v49 = vpop.eup %3682  ;;  %v2346_v3 = vmul.f32 0.5, %v2345_v50  ;;  %v2337_v56 = vsub.f32 1.5, %v2336_v52  ;;  %v2405_v15 = vmul.f32 %v4728_v20, %v2404_v10  ;;  %vm2400_vm6 = vweird.f32 %v4733_v43  ;;  %v2518_v44 = vld [vmem:[%s4895_s3 + $0x8] sm:$0xff]  ;;  %v2521_v46 = vld [vmem:[%s4895_s3 + $0x20] sm:$0xff]  ;;  %v2524_v50 = vld [vmem:[%s4895_s3 + $0x38] sm:$0xff] }
 0x276   : > { %v2358_v2 = vmul.f32 %v3669_v31, %v2357_v53  ;;  %v2384_v34 = vmul.f32 %v3683_v49, %v4716_v35  ;;  %v2376_v59 = vmul.f32 0.5, %v2375_v29  ;;  %v2367_v6 = vsub.f32 1.5, %v2366_v55  ;;  %vm2401_vm9 = vmor %vm2399_vm5, %vm2400_vm6  ;;  %v2522_v52 = vld [vmem:[%s4895_s3 + $0x28] sm:$0xff]  ;;  %v2523_v53 = vld [vmem:[%s4895_s3 + $0x30] sm:$0xff] }
 0x277   : > { %v2347_v60 = vsub.f32 1.5, %v2346_v3  ;;  %v2338_v62 = vmul.f32 %v3671_v61, %v2337_v56  ;;  %v2395_v25 = vmul.f32 %v4733_v43, %v2394_v1  ;;  %vm2390_vm15 = vweird.f32 %v3683_v49 }
 0x278   : > { %v2362_v7 = vsel %vm4740_vm8, %v3669_v31, %v2358_v2  ;;  %v2385_v9 = vmul.f32 %v3683_v49, %v2384_v34  ;;  %v2377_v14 = vsub.f32 1.5, %v2376_v59  ;;  %v2368_v19 = vmul.f32 %v4718_v0, %v2367_v6  ;;  %vm2391_vm3 = vmor %vm2389_vm14, %vm2390_vm15 }
 0x279   : > { %2425 = vperm.xlu1 %3666, %v2362_v7   ;;  %v2348_v12 = vmul.f32 %v3675_v37, %v2347_v60  ;;  %v2342_v13 = vsel %vm4746_vm10, %v3671_v61, %v2338_v62  ;;  %v2396_v21 = vmul.f32 0.5, %v2395_v25  ;;  %v2406_v18 = vmul.f32 0.5, %v2405_v15 }
 0x27a   : > { %2415 = vperm.xlu2 %3667, %v2342_v13   ;;  %v2386_v33 = vmul.f32 0.5, %v2385_v9  ;;  %v2378_v23 = vmul.f32 %v4724_v40, %v2377_v14  ;;  %v2372_v54 = vsel %vm2371_vm2, %v4718_v0, %v2368_v19  ;;  %vm2410_vm8 = vweird.f32 %v4728_v20  ;;  %v2461_v0 = vld [vmem:[%s4894_s2] sm:$0xff] }
 0x27b   : > { %v2352_v11 = vsel %vm4756_vm12, %v3675_v37, %v2348_v12  ;;  %v2397_v42 = vsub.f32 1.5, %v2396_v21  ;;  %v2407_v61 = vsub.f32 1.5, %v2406_v18  ;;  %vm2411_vm10 = vmor %vm2409_vm7, %vm2410_vm8  ;;  %v2462_v37 = vld [vmem:[%s4894_s2 + $0x8] sm:$0xff] }
 0x27c   : > { %2420 = vperm.xlu0 %3665, %v2352_v11   ;;  %v2387_v22 = vsub.f32 1.5, %v2386_v33  ;;  %v2382_v35 = vsel %vm2381_vm4, %v4724_v40, %v2378_v23  ;;  %v2465_v40 = vld [vmem:[%s4894_s2 + $0x20] sm:$0xff] }
 0x27d   : > { %v2398_v17 = vmul.f32 %v4733_v43, %v2397_v42  ;;  %v2408_v28 = vmul.f32 %v4728_v20, %v2407_v61 }
 0x27e   : > { %v2388_v26 = vmul.f32 %v3683_v49, %v2387_v22 }
 0x27f   : > { %v2402_v30 = vsel %vm2401_vm9, %v4733_v43, %v2398_v17  ;;  %v2412_v36 = vsel %vm2411_vm10, %v4728_v20, %v2408_v28  ;;  %v2468_v20 = vld [vmem:[%s4894_s2 + $0x38] sm:$0xff] }
 0x280   : > { %v2392_v31 = vsel %vm2391_vm3, %v3683_v49, %v2388_v26  ;;  %v2520_v43 = vld [vmem:[%s4895_s3 + $0x18] sm:$0xff] }
 0x281   : > { %2440 = vperm.xlu1 %3666, %v2392_v31  }
 0x282   : > { %2430 = vperm.xlu2 %3667, %v2372_v54  }
 0x284   : > { %2435 = vperm.xlu0 %3665, %v2382_v35  }
 0x289   : > { %2471 = vperm.xlu1 %3666, %v2461_v0  }
 0x28a   : > { %2445 = vperm.xlu2 %3667, %v2402_v30  }
 0x28c   : > { %2450 = vperm.xlu0 %3665, %v2412_v36  }
 0x291   : > { %2486 = vperm.xlu1 %3666, %v2464_v27  }
 0x292   : > { %2476 = vperm.xlu2 %3667, %v2462_v37  }
 0x294   : > { %2481 = vperm.xlu0 %3665, %v2463_v38  }
 0x299   : > { %2501 = vperm.xlu1 %3666, %v2467_v39  }
 0x29a   : > { %2491 = vperm.xlu2 %3667, %v2465_v40  }
 0x29c   : > { %2496 = vperm.xlu0 %3665, %v2466_v41  }
 0x2a1   : > { %2532 = vperm.xlu1 %3666, %v2518_v44  }
 0x2a2   : > { %2506 = vperm.xlu2 %3667, %v2468_v20  }
 0x2a4   : > { %2527 = vperm.xlu0 %3665, %v2517_v45  }
 0x2a9   : > { %2547 = vperm.xlu1 %3666, %v2521_v46  }
 0x2aa   : > { %2537 = vperm.xlu2 %3667, %v2519_v47  }
 0x2ac   : > { %2542 = vperm.xlu0 %3665, %v2520_v43  }
 0x2b1   : > { %2562 = vperm.xlu1 %3666, %v2524_v50  }
 0x2b2   : > { %2552 = vperm.xlu2 %3667, %v2522_v52  }
 0x2b4   : > { %2557 = vperm.xlu0 %3665, %v2523_v53  }
 0x2bc   : > { %v2300_v29 = vpop.permute.xlu2 %2299 }
 0x2c4   : > { %v2305_v55 = vpop.permute.xlu2 %2304 }
 0x2c5   : > { %v2322_v22 = vsub.f32 %v4576_v48, %v2305_v55 }
 0x2d1   : > { %v2290_v1 = vpop.permute.xlu1 %2289  ;;  %v2280_v49 = vpop.permute.xlu0 %2279 }
 0x2d2   : > { %v2319_v13 = vsub.f32 %v4569_v24, %v2290_v1  ;;  %v2317_v35 = vsub.f32 %v4565_v58, %v2280_v49 }
 0x2d4   : > { %v2416_v5 = vpop.permute.xlu2 %2415 }
 0x2d5   : > { %v2453_v0 = vmul.f32 %v2416_v5, %v2317_v35 }
 0x2d9   : > { %v2295_v3 = vpop.permute.xlu1 %2294  ;;  %v2285_v56 = vpop.permute.xlu0 %2284 }
 0x2da   : > { %v2318_v26 = vsub.f32 %v4567_v16, %v2285_v56  ;;  %v2321_v16 = vsub.f32 %v4573_v63, %v2300_v29  ;;  %v2320_v41 = vsub.f32 %v4571_v32, %v2295_v3 }
 0x2dc   : > { %v2431_v10 = vpop.permute.xlu2 %2430 }
 0x2dd   : > { %v2456_v46 = vmul.f32 %v2431_v10, %v2320_v41 }
 0x2e1   : > { %v4834_v2 = vpop.permute.xlu1 %2314  ;;  %v4838_v34 = vpop.permute.xlu0 %2309 }
 0x2e2   : > { %v2324_v50 = vsub.f32 %v4580_v57, %v4834_v2  ;;  %v2323_v1 = vsub.f32 %v4578_v51, %v4838_v34 }
 0x2e4   : > { %v4836_v4 = vpop.permute.xlu2 %2445 }
 0x2e5   : > { %v2459_v56 = vmul.f32 %v4836_v4, %v2323_v1 }
 0x2eb   : > { %v2426_v59 = vpop.permute.xlu1 %2425 }
 0x2ec   : > { %v2477_v60 = vpop.permute.xlu2 %2476  ;;  %v2455_v15 = vmul.f32 %v2426_v59, %v2319_v13 }
 0x2ee   : > { %v2421_v62 = vpop.permute.xlu0 %2420 }
 0x2ef   : > { %v2454_v31 = vmul.f32 %v2421_v62, %v2318_v26 }
 0x2f1   : > { %v2510_v28 = vmul.f32 %v2477_v60, %v2454_v31 }
 0x2f3   : > { %v2441_v6 = vpop.permute.xlu1 %2440 }
 0x2f4   : > { %v2492_v7 = vpop.permute.xlu2 %2491  ;;  %v2458_v54 = vmul.f32 %v2441_v6, %v2322_v22 }
 0x2f6   : > { %v2436_v8 = vpop.permute.xlu0 %2435 }
 0x2f7   : > { %v2457_v39 = vmul.f32 %v2436_v8, %v2321_v16 }
 0x2f9   : > { %v2513_v45 = vmul.f32 %v2492_v7, %v2457_v39 }
 0x2fb   : > { %v2472_v9 = vpop.permute.xlu1 %2471 }
 0x2fc   : > { %v2507_v25 = vpop.permute.xlu2 %2506  ;;  %v2509_v37 = vmul.f32 %v2472_v9, %v2453_v0 }
 0x2fe   : > { %v2451_v12 = vpop.permute.xlu0 %2450 }
 0x2ff   : > { %v2460_v53 = vmul.f32 %v2451_v12, %v2324_v50 }
 0x301   : > { %v2516_v3 = vmul.f32 %v2507_v25, %v2460_v53 }
 0x303   : > { %v2487_v14 = vpop.permute.xlu1 %2486 }
 0x304   : > { %v2538_v11 = vpop.permute.xlu2 %2537  ;;  %v2512_v52 = vmul.f32 %v2487_v14, %v2456_v46 }
 0x306   : > { %v2482_v33 = vpop.permute.xlu0 %2481 }
 0x307   : > { %v2511_v19 = vmul.f32 %v2482_v33, %v2455_v15 }
 0x309   : > { %v2567_v21 = vadd.f32 %v2538_v11, %v2511_v19 }
 0x30b   : > { %vm2575_vm12 = vcmp.ge.f32.partialorder %v2567_v21, 0.0  ;;  %v2583_v23 = vmul.f32 0.2, %v2567_v21  ;;  %v2502_v18 = vpop.permute.xlu1 %2501 }
 0x30c   : > { %v2553_v17 = vpop.permute.xlu2 %2552  ;;  %v2515_v34 = vmul.f32 %v2502_v18, %v2459_v56 }
 0x30d   : > { %v2591_v42 = vsel %vm2575_vm12, %v2567_v21, %v2583_v23 }
 0x30e   : > { %2600 = vst.msk [vmem:[%s4896_s4 + $0x10] sm:$0xff] %vm2597_vm11, %v2591_v42  ;;  %v2497_v24 = vpop.permute.xlu0 %2496 }
 0x30f   : > { %v2514_v61 = vmul.f32 %v2497_v24, %v2458_v54 }
 0x311   : > { %v2570_v48 = vadd.f32 %v2553_v17, %v2514_v61 }
 0x313   : > { %vm2578_vm13 = vcmp.ge.f32.partialorder %v2570_v48, 0.0  ;;  %v2586_v30 = vmul.f32 0.2, %v2570_v48  ;;  %v2533_v36 = vpop.permute.xlu1 %2532 }
 0x314   : > { %v2566_v27 = vadd.f32 %v2533_v36, %v2510_v28 }
 0x315   : > { %v2594_v38 = vsel %vm2578_vm13, %v2570_v48, %v2586_v30 }
 0x316   : > { %2603 = vst.msk [vmem:[%s4896_s4 + $0x28] sm:$0xff] %vm2597_vm11, %v2594_v38  ;;  %vm2574_vm14 = vcmp.ge.f32.partialorder %v2566_v27, 0.0  ;;  %v2582_v58 = vmul.f32 0.2, %v2566_v27  ;;  %v2528_v40 = vpop.permute.xlu0 %2527 }
 0x317   : > { %v2565_v44 = vadd.f32 %v2528_v40, %v2509_v37 }
 0x318   : > { %v2590_v20 = vsel %vm2574_vm14, %v2566_v27, %v2582_v58 }
 0x319   : > { %2599 = vst.msk [vmem:[%s4896_s4 + $0x8] sm:$0xff] %vm2597_vm11, %v2590_v20  ;;  %vm2573_vm15 = vcmp.ge.f32.partialorder %v2565_v44, 0.0  ;;  %v2581_v63 = vmul.f32 0.2, %v2565_v44 }
 0x31b   : > { %v2589_v47 = vsel %vm2573_vm15, %v2565_v44, %v2581_v63  ;;  %v2548_v43 = vpop.permute.xlu1 %2547 }
 0x31c   : > { %2598 = vst.msk [vmem:[%s4896_s4] sm:$0xff] %vm2597_vm11, %v2589_v47  ;;  %v2569_v32 = vadd.f32 %v2548_v43, %v2513_v45 }
 0x31e   : > { %vm2577_vm0 = vcmp.ge.f32.partialorder %v2569_v32, 0.0  ;;  %v2585_v29 = vmul.f32 0.2, %v2569_v32  ;;  %v2543_v55 = vpop.permute.xlu0 %2542 }
 0x31f   : > { %v2568_v49 = vadd.f32 %v2543_v55, %v2512_v52 }
 0x320   : > { %v2593_v5 = vsel %vm2577_vm0, %v2569_v32, %v2585_v29 }
 0x321   : > { %2602 = vst.msk [vmem:[%s4896_s4 + $0x20] sm:$0xff] %vm2597_vm11, %v2593_v5  ;;  %vm2576_vm1 = vcmp.ge.f32.partialorder %v2568_v49, 0.0  ;;  %v2584_v57 = vmul.f32 0.2, %v2568_v49 }
 0x323   : > { %v2592_v10 = vsel %vm2576_vm1, %v2568_v49, %v2584_v57  ;;  %v2563_v2 = vpop.permute.xlu1 %2562 }
 0x324   : > { %2601 = vst.msk [vmem:[%s4896_s4 + $0x18] sm:$0xff] %vm2597_vm11, %v2592_v10  ;;  %v2572_v51 = vadd.f32 %v2563_v2, %v2516_v3 }
 0x326   : > { %vm2580_vm2 = vcmp.ge.f32.partialorder %v2572_v51, 0.0  ;;  %v2588_v59 = vmul.f32 0.2, %v2572_v51  ;;  %v2558_v60 = vpop.permute.xlu0 %2557 }
 0x327   : > { %v2571_v62 = vadd.f32 %v2558_v60, %v2515_v34 }
 0x328   : > { %v2596_v6 = vsel %vm2580_vm2, %v2572_v51, %v2588_v59 }
 0x329   : > { %2605 = vst.msk [vmem:[%s4896_s4 + $0x38] sm:$0xff] %vm2597_vm11, %v2596_v6  ;;  %vm2579_vm3 = vcmp.ge.f32.partialorder %v2571_v62, 0.0  ;;  %v2587_v4 = vmul.f32 0.2, %v2571_v62 }
 0x32b   : > { %v2595_v7 = vsel %vm2579_vm3, %v2571_v62, %v2587_v4 }
 0x32c   : > { %2604 = vst.msk [vmem:[%s4896_s4 + $0x30] sm:$0xff] %vm2597_vm11, %v2595_v7 }
 0x32d PF: > { %s14_s17 = sadd.s32 1, %s3706_s17   ;;  %s4903_s15 = smov %s3702_s16 }
 0x32e   : > { %p11_p7 = scmp.ge.s32.totalorder %s14_s17, 4   ;;  %s4904_s16 = smov %s4906_s18 }
 0x330   :  { %13 = sbr.rel (!%p11_p7) target bundleno = 2 (0x2), region = 78 }

</bundles_post_ra>
